<compile_context>
chip_gen: v7x
topology: tpu7x:2x2x1
jax: 0.10.0
libtpu: 0.0.40
codegen_flags: <defaults>
</compile_context>

<pallas_src>
import functools

import jax
import jax.numpy as jnp
from jax.experimental import pallas as pl
from jax.experimental.pallas import tpu as pltpu


def _round_up(x, m):
    return (x + m - 1) // m * m


# ----------------------------------------------------------------------------
# Fused conv-GEMM Pallas kernels: grid = (B, Do, HW tiles, kD-reduction)
#   acc(f32, VMEM) += x[b, do+kd, hw_tile, :] @ w[kd]     (bf16 -> f32)
#   epilogue (last kd): + bias (+ residual), optional ReLU, store f32
# ----------------------------------------------------------------------------
def _conv_gemm_kernel(x_ref, w_ref, b_ref, o_ref, acc_ref, *, n_kd, relu_out):
    kd = pl.program_id(3)

    @pl.when(kd == 0)
    def _init():
        acc_ref[...] = jnp.zeros_like(acc_ref)

    acc_ref[...] += jnp.dot(x_ref[0, 0, :, :], w_ref[0, :, :],
                            preferred_element_type=jnp.float32)

    @pl.when(kd == n_kd - 1)
    def _fin():
        out = acc_ref[...] + b_ref[...]
        if relu_out:
            out = jnp.maximum(out, 0.0)
        o_ref[0, 0, :, :] = out.astype(o_ref.dtype)


def _conv_gemm_res_kernel(x_ref, w_ref, b_ref, r_ref, o_ref, acc_ref,
                          *, n_kd, relu_out):
    kd = pl.program_id(3)

    @pl.when(kd == 0)
    def _init():
        acc_ref[...] = jnp.zeros_like(acc_ref)

    acc_ref[...] += jnp.dot(x_ref[0, 0, :, :], w_ref[0, :, :],
                            preferred_element_type=jnp.float32)

    @pl.when(kd == n_kd - 1)
    def _fin():
        out = acc_ref[...] + b_ref[...] + r_ref[0, 0, :, :]
        if relu_out:
            out = jnp.maximum(out, 0.0)
        o_ref[0, 0, :, :] = out.astype(o_ref.dtype)


def _conv_gemm(xcol, wk, b2, n_out_d, tm, relu_out, residual=None):
    """xcol: (B, Dp, HWp, K) bf16, wk: (kD, K, Np) bf16, b2: (1, Np) f32.

    Returns (B, Do, HWp, Np) f32 where Do = n_out_d = Dp - kD + 1.
    """
    B, Dp, HWp, K = xcol.shape
    kD, _, Np = wk.shape
    Do = n_out_d
    grid = (B, Do, HWp // tm, kD)

    x_spec = pl.BlockSpec((1, 1, tm, K), lambda b, d, m, kd: (b, d + kd, m, 0))
    w_spec = pl.BlockSpec((1, K, Np), lambda b, d, m, kd: (kd, 0, 0))
    b_spec = pl.BlockSpec((1, Np), lambda b, d, m, kd: (0, 0))
    o_spec = pl.BlockSpec((1, 1, tm, Np), lambda b, d, m, kd: (b, d, m, 0))
    out_shape = jax.ShapeDtypeStruct((B, Do, HWp, Np), jnp.float32)
    scratch = [pltpu.VMEM((tm, Np), jnp.float32)]
    cparams = pltpu.CompilerParams(
        dimension_semantics=("parallel", "parallel", "parallel", "arbitrary"))

    if residual is None:
        kern = functools.partial(_conv_gemm_kernel, n_kd=kD, relu_out=relu_out)
        return pl.pallas_call(
            kern, out_shape=out_shape, grid=grid,
            in_specs=[x_spec, w_spec, b_spec], out_specs=o_spec,
            scratch_shapes=scratch, compiler_params=cparams,
        )(xcol, wk, b2)

    r_spec = pl.BlockSpec((1, 1, tm, Np), lambda b, d, m, kd: (b, d, m, 0))
    kern = functools.partial(_conv_gemm_res_kernel, n_kd=kD, relu_out=relu_out)
    return pl.pallas_call(
        kern, out_shape=out_shape, grid=grid,
        in_specs=[x_spec, w_spec, b_spec, r_spec], out_specs=o_spec,
        scratch_shapes=scratch, compiler_params=cparams,
    )(xcol, wk, b2, residual)


# ----------------------------------------------------------------------------
# Stride-1 Conv3d, channels-last (B, D, H, W, C)
# ----------------------------------------------------------------------------
def conv3d_cl(x, pconv, padding=(0, 0, 0), relu_in=False, relu_out=False,
              residual=None):
    kD, kH, kW = pconv["ksize"]
    Cout, Np = pconv["cout"], pconv["npad"]

    if relu_in:
        x = jnp.maximum(x, 0.0)           # ReLU on the compact activation
    xb = x.astype(jnp.bfloat16)
    pD, pH, pW = padding
    if pD or pH or pW:
        xb = jnp.pad(xb, ((0, 0), (pD, pD), (pH, pH), (pW, pW), (0, 0)))

    B, Dp, Hp, Wp, Cin = xb.shape
    Do, Ho, Wo = Dp - kD + 1, Hp - kH + 1, Wp - kW + 1

    # im2col over (kh, kw) only; kd is handled as a reduction grid axis.
    slabs = [xb[:, :, kh:kh + Ho, kw:kw + Wo, :]
             for kh in range(kH) for kw in range(kW)]
    xcol = jnp.stack(slabs, axis=4)                   # (B,Dp,Ho,Wo,kHkW,Cin)
    xcol = xcol.reshape(B, Dp, Ho * Wo, kH * kW * Cin)

    HW = Ho * Wo
    tm = 512 if HW > 512 else _round_up(HW, 8)
    HWp = _round_up(HW, tm)
    if HWp != HW:
        xcol = jnp.pad(xcol, ((0, 0), (0, 0), (0, HWp - HW), (0, 0)))

    res = None
    if residual is not None:
        r = residual.reshape(B, Do, HW, Cout).astype(jnp.float32)
        res = jnp.pad(r, ((0, 0), (0, 0), (0, HWp - HW), (0, Np - Cout)))

    out = _conv_gemm(xcol, pconv["wk"], pconv["b"], Do, tm, relu_out, res)
    out = out[:, :, :HW, :Cout].reshape(B, Do, Ho, Wo, Cout)
    return out


# ----------------------------------------------------------------------------
# ConvTranspose3d via sub-pixel (phase) decomposition
# ----------------------------------------------------------------------------
def _phase_axis(n_in, k, s, p, op, phi):
    """1-D phase bookkeeping for transposed conv (derived from
    out[o] = sum_{i*s+kappa-p=o} x[i]*w[kappa])."""
    n_out = (n_in - 1) * s - 2 * p + k + op
    taps = list(range(phi, k, s))
    r = len(taps)
    o0 = (phi - p) % s
    n = len(range(o0, n_out, s))
    c = (o0 + p - phi) // s
    s0 = c - r + 1
    pad_l = max(0, -s0)
    pad_r = max(0, s0 + n + r - 1 - n_in)
    start = s0 + pad_l
    return {"n_out": n_out, "r": r, "o0": o0, "n": n,
            "pad_l": pad_l, "pad_r": pad_r, "start": start}


def conv_transpose3d_cl(x, ct, relu_out=False):
    B, D, H, W, _ = x.shape
    kD, kH, kW = ct["ksize"]
    sD, sH, sW = ct["stride"]
    pD, pH, pW = ct["padding"]
    oD, oH, oW = ct["out_padding"]
    Cout = ct["cout"]

    Dout = (D - 1) * sD - 2 * pD + kD + oD
    Hout = (H - 1) * sH - 2 * pH + kH + oH
    Wout = (W - 1) * sW - 2 * pW + kW + oW

    xb = x.astype(jnp.bfloat16)
    out = jnp.zeros((B, Dout, Hout, Wout, Cout), jnp.float32)
    for (phd, phh, phw), pconv in ct["phases"]:
        ad = _phase_axis(D, kD, sD, pD, oD, phd)
        ah = _phase_axis(H, kH, sH, pH, oH, phh)
        aw = _phase_axis(W, kW, sW, pW, oW, phw)
        if ad["n"] == 0 or ah["n"] == 0 or aw["n"] == 0:
            continue
        xs = jnp.pad(xb, ((0, 0),
                          (ad["pad_l"], ad["pad_r"]),
                          (ah["pad_l"], ah["pad_r"]),
                          (aw["pad_l"], aw["pad_r"]),
                          (0, 0)))
        xs = xs[:, ad["start"]:ad["start"] + ad["n"] + ad["r"] - 1,
                   ah["start"]:ah["start"] + ah["n"] + ah["r"] - 1,
                   aw["start"]:aw["start"] + aw["n"] + aw["r"] - 1, :]
        ph_out = conv3d_cl(xs, pconv, padding=(0, 0, 0), relu_out=relu_out)
        out = out.at[:, ad["o0"]::sD, ah["o0"]::sH, aw["o0"]::sW, :].set(ph_out)
    return out


# ----------------------------------------------------------------------------
# Weight packing (done once at init): bf16, (kd, kh*kw*cin, Cout_pad) layout.
# ----------------------------------------------------------------------------
def _pack_conv(w, b):
    """w: (Cout, Cin, kD, kH, kW) PyTorch Conv3d layout, b: (Cout,) or None."""
    Cout, Cin, kD, kH, kW = w.shape
    Np = _round_up(Cout, 128)
    wt = jnp.transpose(w, (2, 3, 4, 1, 0)).reshape(kD, kH * kW * Cin, Cout)
    wt = jnp.pad(wt, ((0, 0), (0, 0), (0, Np - Cout))).astype(jnp.bfloat16)
    if b is None:
        b = jnp.zeros((Cout,), jnp.float32)
    b2 = jnp.pad(jnp.reshape(b, (1, Cout)).astype(jnp.float32),
                 ((0, 0), (0, Np - Cout)))
    return {"wk": wt, "b": b2, "cout": Cout, "npad": Np, "ksize": (kD, kH, kW)}


def _pack_conv_transpose(w, b, stride, padding, out_padding):
    """w: (Cin, Cout, kD, kH, kW) PyTorch ConvTranspose3d layout."""
    Cin, Cout, kD, kH, kW = w.shape
    sD, sH, sW = stride
    assert sD <= kD and sH <= kH and sW <= kW, "phase decomposition needs s<=k"
    phases = []
    for phd in range(sD):
        td = list(range(phd, kD, sD))
        for phh in range(sH):
            th = list(range(phh, kH, sH))
            for phw in range(sW):
                tw = list(range(phw, kW, sW))
                sub = w[:, :, td][:, :, :, th][:, :, :, :, tw]  # (Cin,Cout,Rd,Rh,Rw)
                sub = jnp.flip(sub, axis=(2, 3, 4))
                sub = jnp.transpose(sub, (1, 0, 2, 3, 4))       # regular conv layout
                phases.append(((phd, phh, phw), _pack_conv(sub, b)))
    return {"phases": phases, "stride": stride, "padding": padding,
            "out_padding": out_padding, "ksize": (kD, kH, kW), "cout": Cout}


# ----------------------------------------------------------------------------
# Decoder_bev_sep parameters + forward
# ----------------------------------------------------------------------------
def init_params(key, in_channels, num_hiddens, num_residual_layers,
                num_residual_hiddens, num_out):
    keys = iter(jax.random.split(key, 8 + 2 * num_residual_layers + 8))

    def winit(shape):
        fan = 1
        for s in shape[1:]:
            fan *= s
        return (jax.random.normal(next(keys), shape, jnp.float32)
                / jnp.sqrt(float(fan)))

    def binit(n):
        return 0.01 * jax.random.normal(next(keys), (n,), jnp.float32)

    p = {}
    p["conv1"] = _pack_conv(winit((num_hiddens, in_channels, 3, 3, 3)),
                            binit(num_hiddens))
    p["res"] = []
    for _ in range(num_residual_layers):
        w1 = winit((num_residual_hiddens, num_hiddens, 3, 3, 3))   # no bias
        w2 = winit((num_hiddens, num_residual_hiddens, 1, 1, 1))   # no bias
        p["res"].append((_pack_conv(w1, None), _pack_conv(w2, None)))
    # ConvTranspose3d weights are (Cin, Cout, kD, kH, kW)
    p["ct1"] = _pack_conv_transpose(winit((num_hiddens, num_hiddens, 3, 4, 4)),
                                    binit(num_hiddens), stride=(1, 2, 2),
                                    padding=(1, 1, 1), out_padding=(0, 1, 0))
    p["ct2"] = _pack_conv_transpose(
        winit((num_hiddens, num_hiddens // 2, 3, 4, 4)),
        binit(num_hiddens // 2), stride=(1, 2, 2),
        padding=(1, 1, 1), out_padding=(0, 1, 0))
    p["ct3"] = _pack_conv_transpose(
        winit((num_hiddens // 2, num_out, 4, 5, 5)),
        binit(num_out), stride=(2, 3, 3),
        padding=(1, 1, 1), out_padding=(0, 0, 0))
    return p


def decoder_forward(params, inputs, latent_shape):
    B = inputs.shape[0]
    D = inputs.shape[2]
    # torch.reshape(inputs, (B, -1, inputs.shape[2], latent[0], latent[1]))
    x = jnp.reshape(inputs, (B, -1, D, latent_shape[0], latent_shape[1]))
    x = jnp.transpose(x, (0, 2, 3, 4, 1))        # NCDHW -> NDHWC (channels-last)

    # _conv_1
    x = conv3d_cl(x, params["conv1"], padding=(1, 1, 1))

    # _residual_stack (canonical VQ-VAE 3D residual stack)
    n_res = len(params["res"])
    for i, (p1, p2) in enumerate(params["res"]):
        h = conv3d_cl(x, p1, padding=(1, 1, 1), relu_in=True, relu_out=True)
        x = conv3d_cl(h, p2, padding=(0, 0, 0), residual=x,
                      relu_out=(i == n_res - 1))   # fuse the stack-final ReLU
    if n_res == 0:
        x = jnp.maximum(x, 0.0)

    # _conv_trans_1 + F.relu (post-ReLU fused into each phase GEMM epilogue)
    x = conv_transpose3d_cl(x, params["ct1"], relu_out=True)
    # _conv_trans_2
    x = conv_transpose3d_cl(x, params["ct2"])
    # _conv_trans_3
    x = conv_transpose3d_cl(x, params["ct3"])

    return jnp.transpose(x, (0, 4, 1, 2, 3))     # NDHWC -> NCDHW


# ----------------------------------------------------------------------------
if __name__ == "__main__":
    key = jax.random.PRNGKey(0)
    k_in, k_par = jax.random.split(key)

    # small, shape-consistent config
    in_channels = 4
    num_hiddens = 8
    num_residual_layers = 2
    num_residual_hiddens = 4
    latent_shape = (4, 4)
    channel_type = ("occ", "sem", "flow")   # len == 3 output channels
    B, D = 2, 2

    inputs = jax.random.normal(
        k_in, (B, in_channels, D, latent_shape[0], latent_shape[1]), jnp.float32)
    params = init_params(k_par, in_channels, num_hiddens,
                         num_residual_layers, num_residual_hiddens,
                         len(channel_type))

    fwd = jax.jit(functools.partial(decoder_forward, params,
                                    latent_shape=latent_shape))
    out = jax.block_until_ready(fwd(inputs))

    # expected: D:2->2->2->4, H:4->9->19->57, W:4->8->16->48
    assert out.shape == (B, len(channel_type), 4, 57, 48), out.shape
    assert out.dtype == jnp.float32
    assert bool(jnp.all(jnp.isfinite(out)))
    print("KERNEL_OK")
</pallas_src>

<mosaic_0001>
module attributes {stable_mosaic.version = 11 : i64} {
  func.func @_conv_gemm_kernel(%arg0: i32, %arg1: i32, %arg2: i32, %arg3: i32, %arg4: memref<1x1x16x36xbf16, #tpu.memory_space<vmem>>, %arg5: memref<1x36x128xbf16, #tpu.memory_space<vmem>>, %arg6: memref<1x128xf32, #tpu.memory_space<vmem>>, %arg7: memref<1x1x16x128xf32, #tpu.memory_space<vmem>>, %arg8: memref<16x128xf32, #tpu.memory_space<vmem>>) attributes {dimension_semantics = [#tpu.dimension_semantics<parallel>, #tpu.dimension_semantics<parallel>, #tpu.dimension_semantics<parallel>, #tpu.dimension_semantics<arbitrary>], iteration_bounds = array<i64: 2, 2, 1, 3>, scalar_prefetch = 0 : i64, scratch_operands = 1 : i64, tpu.core_type = #tpu.core_type<tc>, window_params = [{transform_indices = @transform_0, window_bounds = array<i64: 1, 1, 16, 36>}, {transform_indices = @transform_1, window_bounds = array<i64: 1, 36, 128>}, {pipeline_mode = #tpu.pipeline_mode<synchronous>, transform_indices = @transform_2, window_bounds = array<i64: 1, 128>}, {transform_indices = @transform_3, window_bounds = array<i64: 1, 1, 16, 128>}]} {
    %c0_i32 = arith.constant 0 : i32
    %0 = arith.cmpi eq, %arg3, %c0_i32 : i32
    %1 = arith.extui %0 : i1 to i32
    %c0_i32_0 = arith.constant 0 : i32
    %2 = arith.cmpi ne, %1, %c0_i32_0 : i32
    scf.if %2 {
      %cst_12 = arith.constant 0.000000e+00 : f32
      %14 = vector.broadcast %cst_12 : f32 to vector<16x128xf32>
      %c0_13 = arith.constant 0 : index
      %c0_14 = arith.constant 0 : index
      %15 = vector.load %arg8[%c0_13, %c0_14] : memref<16x128xf32, #tpu.memory_space<vmem>>, vector<16x128xf32>
      tpu.vector_store %arg8[%c0_13, %c0_14], %14 {strides = array<i32>} : memref<16x128xf32, #tpu.memory_space<vmem>>, vector<16x128xf32>,
    } else {
    }
    %c0 = arith.constant 0 : index
    %c0_1 = arith.constant 0 : index
    %3 = vector.load %arg8[%c0, %c0_1] : memref<16x128xf32, #tpu.memory_space<vmem>>, vector<16x128xf32>
    %c0_2 = arith.constant 0 : index
    %c0_3 = arith.constant 0 : index
    %c0_4 = arith.constant 0 : index
    %c0_5 = arith.constant 0 : index
    %4 = vector.load %arg4[%c0_2, %c0_3, %c0_4, %c0_5] : memref<1x1x16x36xbf16, #tpu.memory_space<vmem>>, vector<1x1x16x36xbf16>
    %5 = vector.shape_cast %4 : vector<1x1x16x36xbf16> to vector<16x36xbf16>
    %c0_6 = arith.constant 0 : index
    %c0_7 = arith.constant 0 : index
    %c0_8 = arith.constant 0 : index
    %6 = vector.load %arg5[%c0_6, %c0_7, %c0_8] : memref<1x36x128xbf16, #tpu.memory_space<vmem>>, vector<1x36x128xbf16>
    %7 = vector.shape_cast %6 : vector<1x36x128xbf16> to vector<36x128xbf16>
    %cst = arith.constant dense<0.000000e+00> : vector<16x128xf32>
    %8 = tpu.matmul %5, %7, %cst {dimension_numbers = #tpu.dot_dimension_numbers<[1], [0], [0], [1], [0, 0, 1, 1], [], []>} : vector<16x36xbf16>, vector<36x128xbf16>, vector<16x128xf32> -> vector<16x128xf32>
    %9 = arith.addf %3, %8 : vector<16x128xf32>
    %c0_9 = arith.constant 0 : index
    %c0_10 = arith.constant 0 : index
    %10 = vector.load %arg8[%c0_9, %c0_10] : memref<16x128xf32, #tpu.memory_space<vmem>>, vector<16x128xf32>
    tpu.vector_store %arg8[%c0_9, %c0_10], %9 {strides = array<i32>} : memref<16x128xf32, #tpu.memory_space<vmem>>, vector<16x128xf32>,
    %c2_i32 = arith.constant 2 : i32
    %11 = arith.cmpi eq, %arg3, %c2_i32 : i32
    %12 = arith.extui %11 : i1 to i32
    %c0_i32_11 = arith.constant 0 : i32
    %13 = arith.cmpi ne, %12, %c0_i32_11 : i32
    scf.if %13 {
      %c0_12 = arith.constant 0 : index
      %c0_13 = arith.constant 0 : index
      %14 = vector.load %arg8[%c0_12, %c0_13] : memref<16x128xf32, #tpu.memory_space<vmem>>, vector<16x128xf32>
      %c0_14 = arith.constant 0 : index
      %c0_15 = arith.constant 0 : index
      %15 = vector.load %arg6[%c0_14, %c0_15] : memref<1x128xf32, #tpu.memory_space<vmem>>, vector<1x128xf32>
      %16 = vector.broadcast %15 : vector<1x128xf32> to vector<16x128xf32>
      %17 = arith.addf %14, %16 : vector<16x128xf32>
      %c0_16 = arith.constant 0 : index
      %c0_17 = arith.constant 0 : index
      %c0_18 = arith.constant 0 : index
      %c0_19 = arith.constant 0 : index
      %18 = vector.load %arg7[%c0_16, %c0_17, %c0_18, %c0_19] : memref<1x1x16x128xf32, #tpu.memory_space<vmem>>, vector<1x1x16x128xf32>
      %19 = vector.shape_cast %18 : vector<1x1x16x128xf32> to vector<16x128xf32>
      %20 = vector.shape_cast %17 : vector<16x128xf32> to vector<1x1x16x128xf32>
      tpu.vector_store %arg7[%c0_16, %c0_17, %c0_18, %c0_19], %20 {strides = array<i32>} : memref<1x1x16x128xf32, #tpu.memory_space<vmem>>, vector<1x1x16x128xf32>,
    } else {
    }
    return
  }
  func.func @transform_0(%arg0: i32, %arg1: i32, %arg2: i32, %arg3: i32) -> (i32, i32, i32, i32) {
    %0 = arith.addi %arg1, %arg3 : i32
    %c0_i32 = arith.constant 0 : i32
    %c0_i32_0 = arith.constant 0 : i32
    return %arg0, %0, %arg2, %c0_i32 : i32, i32, i32, i32
  }
  func.func @transform_1(%arg0: i32, %arg1: i32, %arg2: i32, %arg3: i32) -> (i32, i32, i32) {
    %c0_i32 = arith.constant 0 : i32
    %c0_i32_0 = arith.constant 0 : i32
    %c0_i32_1 = arith.constant 0 : i32
    return %arg3, %c0_i32, %c0_i32_0 : i32, i32, i32
  }
  func.func @transform_2(%arg0: i32, %arg1: i32, %arg2: i32, %arg3: i32) -> (i32, i32) {
    %c0_i32 = arith.constant 0 : i32
    %c0_i32_0 = arith.constant 0 : i32
    %c0_i32_1 = arith.constant 0 : i32
    return %c0_i32, %c0_i32_0 : i32, i32
  }
  func.func @transform_3(%arg0: i32, %arg1: i32, %arg2: i32, %arg3: i32) -> (i32, i32, i32, i32) {
    %c0_i32 = arith.constant 0 : i32
    %c0_i32_0 = arith.constant 0 : i32
    return %arg0, %arg1, %arg2, %c0_i32 : i32, i32, i32, i32
  }
}

module attributes {stable_mosaic.version = 11 : i64} {
  func.func @_conv_gemm_kernel(%arg0: i32, %arg1: i32, %arg2: i32, %arg3: i32, %arg4: memref<1x1x16x72xbf16, #tpu.memory_space<vmem>>, %arg5: memref<1x72x128xbf16, #tpu.memory_space<vmem>>, %arg6: memref<1x128xf32, #tpu.memory_space<vmem>>, %arg7: memref<1x1x16x128xf32, #tpu.memory_space<vmem>>, %arg8: memref<16x128xf32, #tpu.memory_space<vmem>>) attributes {dimension_semantics = [#tpu.dimension_semantics<parallel>, #tpu.dimension_semantics<parallel>, #tpu.dimension_semantics<parallel>, #tpu.dimension_semantics<arbitrary>], iteration_bounds = array<i64: 2, 2, 1, 3>, scalar_prefetch = 0 : i64, scratch_operands = 1 : i64, tpu.core_type = #tpu.core_type<tc>, window_params = [{transform_indices = @transform_0, window_bounds = array<i64: 1, 1, 16, 72>}, {transform_indices = @transform_1, window_bounds = array<i64: 1, 72, 128>}, {pipeline_mode = #tpu.pipeline_mode<synchronous>, transform_indices = @transform_2, window_bounds = array<i64: 1, 128>}, {transform_indices = @transform_3, window_bounds = array<i64: 1, 1, 16, 128>}]} {
    %c0_i32 = arith.constant 0 : i32
    %0 = arith.cmpi eq, %arg3, %c0_i32 : i32
    %1 = arith.extui %0 : i1 to i32
    %c0_i32_0 = arith.constant 0 : i32
    %2 = arith.cmpi ne, %1, %c0_i32_0 : i32
    scf.if %2 {
      %cst_12 = arith.constant 0.000000e+00 : f32
      %14 = vector.broadcast %cst_12 : f32 to vector<16x128xf32>
      %c0_13 = arith.constant 0 : index
      %c0_14 = arith.constant 0 : index
      %15 = vector.load %arg8[%c0_13, %c0_14] : memref<16x128xf32, #tpu.memory_space<vmem>>, vector<16x128xf32>
      tpu.vector_store %arg8[%c0_13, %c0_14], %14 {strides = array<i32>} : memref<16x128xf32, #tpu.memory_space<vmem>>, vector<16x128xf32>,
    } else {
    }
    %c0 = arith.constant 0 : index
    %c0_1 = arith.constant 0 : index
    %3 = vector.load %arg8[%c0, %c0_1] : memref<16x128xf32, #tpu.memory_space<vmem>>, vector<16x128xf32>
    %c0_2 = arith.constant 0 : index
    %c0_3 = arith.constant 0 : index
    %c0_4 = arith.constant 0 : index
    %c0_5 = arith.constant 0 : index
    %4 = vector.load %arg4[%c0_2, %c0_3, %c0_4, %c0_5] : memref<1x1x16x72xbf16, #tpu.memory_space<vmem>>, vector<1x1x16x72xbf16>
    %5 = vector.shape_cast %4 : vector<1x1x16x72xbf16> to vector<16x72xbf16>
    %c0_6 = arith.constant 0 : index
    %c0_7 = arith.constant 0 : index
    %c0_8 = arith.constant 0 : index
    %6 = vector.load %arg5[%c0_6, %c0_7, %c0_8] : memref<1x72x128xbf16, #tpu.memory_space<vmem>>, vector<1x72x128xbf16>
    %7 = vector.shape_cast %6 : vector<1x72x128xbf16> to vector<72x128xbf16>
    %cst = arith.constant dense<0.000000e+00> : vector<16x128xf32>
    %8 = tpu.matmul %5, %7, %cst {dimension_numbers = #tpu.dot_dimension_numbers<[1], [0], [0], [1], [0, 0, 1, 1], [], []>} : vector<16x72xbf16>, vector<72x128xbf16>, vector<16x128xf32> -> vector<16x128xf32>
    %9 = arith.addf %3, %8 : vector<16x128xf32>
    %c0_9 = arith.constant 0 : index
    %c0_10 = arith.constant 0 : index
    %10 = vector.load %arg8[%c0_9, %c0_10] : memref<16x128xf32, #tpu.memory_space<vmem>>, vector<16x128xf32>
    tpu.vector_store %arg8[%c0_9, %c0_10], %9 {strides = array<i32>} : memref<16x128xf32, #tpu.memory_space<vmem>>, vector<16x128xf32>,
    %c2_i32 = arith.constant 2 : i32
    %11 = arith.cmpi eq, %arg3, %c2_i32 : i32
    %12 = arith.extui %11 : i1 to i32
    %c0_i32_11 = arith.constant 0 : i32
    %13 = arith.cmpi ne, %12, %c0_i32_11 : i32
    scf.if %13 {
      %c0_12 = arith.constant 0 : index
      %c0_13 = arith.constant 0 : index
      %14 = vector.load %arg8[%c0_12, %c0_13] : memref<16x128xf32, #tpu.memory_space<vmem>>, vector<16x128xf32>
      %c0_14 = arith.constant 0 : index
      %c0_15 = arith.constant 0 : index
      %15 = vector.load %arg6[%c0_14, %c0_15] : memref<1x128xf32, #tpu.memory_space<vmem>>, vector<1x128xf32>
      %16 = vector.broadcast %15 : vector<1x128xf32> to vector<16x128xf32>
      %17 = arith.addf %14, %16 : vector<16x128xf32>
      %cst_16 = arith.constant 0.000000e+00 : f32
      %18 = vector.broadcast %cst_16 : f32 to vector<16x128xf32>
      %19 = arith.maximumf %17, %18 : vector<16x128xf32>
      %c0_17 = arith.constant 0 : index
      %c0_18 = arith.constant 0 : index
      %c0_19 = arith.constant 0 : index
      %c0_20 = arith.constant 0 : index
      %20 = vector.load %arg7[%c0_17, %c0_18, %c0_19, %c0_20] : memref<1x1x16x128xf32, #tpu.memory_space<vmem>>, vector<1x1x16x128xf32>
      %21 = vector.shape_cast %20 : vector<1x1x16x128xf32> to vector<16x128xf32>
      %22 = vector.shape_cast %19 : vector<16x128xf32> to vector<1x1x16x128xf32>
      tpu.vector_store %arg7[%c0_17, %c0_18, %c0_19, %c0_20], %22 {strides = array<i32>} : memref<1x1x16x128xf32, #tpu.memory_space<vmem>>, vector<1x1x16x128xf32>,
    } else {
    }
    return
  }
  func.func @transform_0(%arg0: i32, %arg1: i32, %arg2: i32, %arg3: i32) -> (i32, i32, i32, i32) {
    %0 = arith.addi %arg1, %arg3 : i32
    %c0_i32 = arith.constant 0 : i32
    %c0_i32_0 = arith.constant 0 : i32
    return %arg0, %0, %arg2, %c0_i32 : i32, i32, i32, i32
  }
  func.func @transform_1(%arg0: i32, %arg1: i32, %arg2: i32, %arg3: i32) -> (i32, i32, i32) {
    %c0_i32 = arith.constant 0 : i32
    %c0_i32_0 = arith.constant 0 : i32
    %c0_i32_1 = arith.constant 0 : i32
    return %arg3, %c0_i32, %c0_i32_0 : i32, i32, i32
  }
  func.func @transform_2(%arg0: i32, %arg1: i32, %arg2: i32, %arg3: i32) -> (i32, i32) {
    %c0_i32 = arith.constant 0 : i32
    %c0_i32_0 = arith.constant 0 : i32
    %c0_i32_1 = arith.constant 0 : i32
    return %c0_i32, %c0_i32_0 : i32, i32
  }
  func.func @transform_3(%arg0: i32, %arg1: i32, %arg2: i32, %arg3: i32) -> (i32, i32, i32, i32) {
    %c0_i32 = arith.constant 0 : i32
    %c0_i32_0 = arith.constant 0 : i32
    return %arg0, %arg1, %arg2, %c0_i32 : i32, i32, i32, i32
  }
}

module attributes {stable_mosaic.version = 11 : i64} {
  func.func @_conv_gemm_res_kernel(%arg0: i32, %arg1: i32, %arg2: i32, %arg3: i32, %arg4: memref<1x1x16x4xbf16, #tpu.memory_space<vmem>>, %arg5: memref<1x4x128xbf16, #tpu.memory_space<vmem>>, %arg6: memref<1x128xf32, #tpu.memory_space<vmem>>, %arg7: memref<1x1x16x128xf32, #tpu.memory_space<vmem>>, %arg8: memref<1x1x16x128xf32, #tpu.memory_space<vmem>>, %arg9: memref<16x128xf32, #tpu.memory_space<vmem>>) attributes {dimension_semantics = [#tpu.dimension_semantics<parallel>, #tpu.dimension_semantics<parallel>, #tpu.dimension_semantics<parallel>, #tpu.dimension_semantics<arbitrary>], iteration_bounds = array<i64: 2, 2, 1, 1>, scalar_prefetch = 0 : i64, scratch_operands = 1 : i64, tpu.core_type = #tpu.core_type<tc>, window_params = [{transform_indices = @transform_0, window_bounds = array<i64: 1, 1, 16, 4>}, {transform_indices = @transform_1, window_bounds = array<i64: 1, 4, 128>}, {pipeline_mode = #tpu.pipeline_mode<synchronous>, transform_indices = @transform_2, window_bounds = array<i64: 1, 128>}, {transform_indices = @transform_3, window_bounds = array<i64: 1, 1, 16, 128>}, {transform_indices = @transform_4, window_bounds = array<i64: 1, 1, 16, 128>}]} {
    %c0_i32 = arith.constant 0 : i32
    %0 = arith.cmpi eq, %arg3, %c0_i32 : i32
    %1 = arith.extui %0 : i1 to i32
    %c0_i32_0 = arith.constant 0 : i32
    %2 = arith.cmpi ne, %1, %c0_i32_0 : i32
    scf.if %2 {
      %cst_13 = arith.constant 0.000000e+00 : f32
      %14 = vector.broadcast %cst_13 : f32 to vector<16x128xf32>
      %c0_14 = arith.constant 0 : index
      %c0_15 = arith.constant 0 : index
      %15 = vector.load %arg9[%c0_14, %c0_15] : memref<16x128xf32, #tpu.memory_space<vmem>>, vector<16x128xf32>
      tpu.vector_store %arg9[%c0_14, %c0_15], %14 {strides = array<i32>} : memref<16x128xf32, #tpu.memory_space<vmem>>, vector<16x128xf32>,
    } else {
    }
    %c0 = arith.constant 0 : index
    %c0_1 = arith.constant 0 : index
    %3 = vector.load %arg9[%c0, %c0_1] : memref<16x128xf32, #tpu.memory_space<vmem>>, vector<16x128xf32>
    %c0_2 = arith.constant 0 : index
    %c0_3 = arith.constant 0 : index
    %c0_4 = arith.constant 0 : index
    %c0_5 = arith.constant 0 : index
    %4 = vector.load %arg4[%c0_2, %c0_3, %c0_4, %c0_5] : memref<1x1x16x4xbf16, #tpu.memory_space<vmem>>, vector<1x1x16x4xbf16>
    %5 = vector.shape_cast %4 : vector<1x1x16x4xbf16> to vector<16x4xbf16>
    %c0_6 = arith.constant 0 : index
    %c0_7 = arith.constant 0 : index
    %c0_8 = arith.constant 0 : index
    %6 = vector.load %arg5[%c0_6, %c0_7, %c0_8] : memref<1x4x128xbf16, #tpu.memory_space<vmem>>, vector<1x4x128xbf16>
    %7 = vector.shape_cast %6 : vector<1x4x128xbf16> to vector<4x128xbf16>
    %cst = arith.constant dense<0.000000e+00> : vector<16x128xf32>
    %8 = tpu.matmul %5, %7, %cst {dimension_numbers = #tpu.dot_dimension_numbers<[1], [0], [0], [1], [0, 0, 1, 1], [], []>} : vector<16x4xbf16>, vector<4x128xbf16>, vector<16x128xf32> -> vector<16x128xf32>
    %9 = arith.addf %3, %8 : vector<16x128xf32>
    %c0_9 = arith.constant 0 : index
    %c0_10 = arith.constant 0 : index
    %10 = vector.load %arg9[%c0_9, %c0_10] : memref<16x128xf32, #tpu.memory_space<vmem>>, vector<16x128xf32>
    tpu.vector_store %arg9[%c0_9, %c0_10], %9 {strides = array<i32>} : memref<16x128xf32, #tpu.memory_space<vmem>>, vector<16x128xf32>,
    %c0_i32_11 = arith.constant 0 : i32
    %11 = arith.cmpi eq, %arg3, %c0_i32_11 : i32
    %12 = arith.extui %11 : i1 to i32
    %c0_i32_12 = arith.constant 0 : i32
    %13 = arith.cmpi ne, %12, %c0_i32_12 : i32
    scf.if %13 {
      %c0_13 = arith.constant 0 : index
      %c0_14 = arith.constant 0 : index
      %14 = vector.load %arg9[%c0_13, %c0_14] : memref<16x128xf32, #tpu.memory_space<vmem>>, vector<16x128xf32>
      %c0_15 = arith.constant 0 : index
      %c0_16 = arith.constant 0 : index
      %15 = vector.load %arg6[%c0_15, %c0_16] : memref<1x128xf32, #tpu.memory_space<vmem>>, vector<1x128xf32>
      %16 = vector.broadcast %15 : vector<1x128xf32> to vector<16x128xf32>
      %17 = arith.addf %14, %16 : vector<16x128xf32>
      %c0_17 = arith.constant 0 : index
      %c0_18 = arith.constant 0 : index
      %c0_19 = arith.constant 0 : index
      %c0_20 = arith.constant 0 : index
      %18 = vector.load %arg7[%c0_17, %c0_18, %c0_19, %c0_20] : memref<1x1x16x128xf32, #tpu.memory_space<vmem>>, vector<1x1x16x128xf32>
      %19 = vector.shape_cast %18 : vector<1x1x16x128xf32> to vector<16x128xf32>
      %20 = arith.addf %17, %19 : vector<16x128xf32>
      %c0_21 = arith.constant 0 : index
      %c0_22 = arith.constant 0 : index
      %c0_23 = arith.constant 0 : index
      %c0_24 = arith.constant 0 : index
      %21 = vector.load %arg8[%c0_21, %c0_22, %c0_23, %c0_24] : memref<1x1x16x128xf32, #tpu.memory_space<vmem>>, vector<1x1x16x128xf32>
      %22 = vector.shape_cast %21 : vector<1x1x16x128xf32> to vector<16x128xf32>
      %23 = vector.shape_cast %20 : vector<16x128xf32> to vector<1x1x16x128xf32>
      tpu.vector_store %arg8[%c0_21, %c0_22, %c0_23, %c0_24], %23 {strides = array<i32>} : memref<1x1x16x128xf32, #tpu.memory_space<vmem>>, vector<1x1x16x128xf32>,
    } else {
    }
    return
  }
  func.func @transform_0(%arg0: i32, %arg1: i32, %arg2: i32, %arg3: i32) -> (i32, i32, i32, i32) {
    %0 = arith.addi %arg1, %arg3 : i32
    %c0_i32 = arith.constant 0 : i32
    %c0_i32_0 = arith.constant 0 : i32
    return %arg0, %0, %arg2, %c0_i32 : i32, i32, i32, i32
  }
  func.func @transform_1(%arg0: i32, %arg1: i32, %arg2: i32, %arg3: i32) -> (i32, i32, i32) {
    %c0_i32 = arith.constant 0 : i32
    %c0_i32_0 = arith.constant 0 : i32
    %c0_i32_1 = arith.constant 0 : i32
    return %arg3, %c0_i32, %c0_i32_0 : i32, i32, i32
  }
  func.func @transform_2(%arg0: i32, %arg1: i32, %arg2: i32, %arg3: i32) -> (i32, i32) {
    %c0_i32 = arith.constant 0 : i32
    %c0_i32_0 = arith.constant 0 : i32
    %c0_i32_1 = arith.constant 0 : i32
    return %c0_i32, %c0_i32_0 : i32, i32
  }
  func.func @transform_3(%arg0: i32, %arg1: i32, %arg2: i32, %arg3: i32) -> (i32, i32, i32, i32) {
    %c0_i32 = arith.constant 0 : i32
    %c0_i32_0 = arith.constant 0 : i32
    return %arg0, %arg1, %arg2, %c0_i32 : i32, i32, i32, i32
  }
  func.func @transform_4(%arg0: i32, %arg1: i32, %arg2: i32, %arg3: i32) -> (i32, i32, i32, i32) {
    %c0_i32 = arith.constant 0 : i32
    %c0_i32_0 = arith.constant 0 : i32
    return %arg0, %arg1, %arg2, %c0_i32 : i32, i32, i32, i32
  }
}

module attributes {stable_mosaic.version = 11 : i64} {
  func.func @_conv_gemm_res_kernel(%arg0: i32, %arg1: i32, %arg2: i32, %arg3: i32, %arg4: memref<1x1x16x4xbf16, #tpu.memory_space<vmem>>, %arg5: memref<1x4x128xbf16, #tpu.memory_space<vmem>>, %arg6: memref<1x128xf32, #tpu.memory_space<vmem>>, %arg7: memref<1x1x16x128xf32, #tpu.memory_space<vmem>>, %arg8: memref<1x1x16x128xf32, #tpu.memory_space<vmem>>, %arg9: memref<16x128xf32, #tpu.memory_space<vmem>>) attributes {dimension_semantics = [#tpu.dimension_semantics<parallel>, #tpu.dimension_semantics<parallel>, #tpu.dimension_semantics<parallel>, #tpu.dimension_semantics<arbitrary>], iteration_bounds = array<i64: 2, 2, 1, 1>, scalar_prefetch = 0 : i64, scratch_operands = 1 : i64, tpu.core_type = #tpu.core_type<tc>, window_params = [{transform_indices = @transform_0, window_bounds = array<i64: 1, 1, 16, 4>}, {transform_indices = @transform_1, window_bounds = array<i64: 1, 4, 128>}, {pipeline_mode = #tpu.pipeline_mode<synchronous>, transform_indices = @transform_2, window_bounds = array<i64: 1, 128>}, {transform_indices = @transform_3, window_bounds = array<i64: 1, 1, 16, 128>}, {transform_indices = @transform_4, window_bounds = array<i64: 1, 1, 16, 128>}]} {
    %c0_i32 = arith.constant 0 : i32
    %0 = arith.cmpi eq, %arg3, %c0_i32 : i32
    %1 = arith.extui %0 : i1 to i32
    %c0_i32_0 = arith.constant 0 : i32
    %2 = arith.cmpi ne, %1, %c0_i32_0 : i32
    scf.if %2 {
      %cst_13 = arith.constant 0.000000e+00 : f32
      %14 = vector.broadcast %cst_13 : f32 to vector<16x128xf32>
      %c0_14 = arith.constant 0 : index
      %c0_15 = arith.constant 0 : index
      %15 = vector.load %arg9[%c0_14, %c0_15] : memref<16x128xf32, #tpu.memory_space<vmem>>, vector<16x128xf32>
      tpu.vector_store %arg9[%c0_14, %c0_15], %14 {strides = array<i32>} : memref<16x128xf32, #tpu.memory_space<vmem>>, vector<16x128xf32>,
    } else {
    }
    %c0 = arith.constant 0 : index
    %c0_1 = arith.constant 0 : index
    %3 = vector.load %arg9[%c0, %c0_1] : memref<16x128xf32, #tpu.memory_space<vmem>>, vector<16x128xf32>
    %c0_2 = arith.constant 0 : index
    %c0_3 = arith.constant 0 : index
    %c0_4 = arith.constant 0 : index
    %c0_5 = arith.constant 0 : index
    %4 = vector.load %arg4[%c0_2, %c0_3, %c0_4, %c0_5] : memref<1x1x16x4xbf16, #tpu.memory_space<vmem>>, vector<1x1x16x4xbf16>
    %5 = vector.shape_cast %4 : vector<1x1x16x4xbf16> to vector<16x4xbf16>
    %c0_6 = arith.constant 0 : index
    %c0_7 = arith.constant 0 : index
    %c0_8 = arith.constant 0 : index
    %6 = vector.load %arg5[%c0_6, %c0_7, %c0_8] : memref<1x4x128xbf16, #tpu.memory_space<vmem>>, vector<1x4x128xbf16>
    %7 = vector.shape_cast %6 : vector<1x4x128xbf16> to vector<4x128xbf16>
    %cst = arith.constant dense<0.000000e+00> : vector<16x128xf32>
    %8 = tpu.matmul %5, %7, %cst {dimension_numbers = #tpu.dot_dimension_numbers<[1], [0], [0], [1], [0, 0, 1, 1], [], []>} : vector<16x4xbf16>, vector<4x128xbf16>, vector<16x128xf32> -> vector<16x128xf32>
    %9 = arith.addf %3, %8 : vector<16x128xf32>
    %c0_9 = arith.constant 0 : index
    %c0_10 = arith.constant 0 : index
    %10 = vector.load %arg9[%c0_9, %c0_10] : memref<16x128xf32, #tpu.memory_space<vmem>>, vector<16x128xf32>
    tpu.vector_store %arg9[%c0_9, %c0_10], %9 {strides = array<i32>} : memref<16x128xf32, #tpu.memory_space<vmem>>, vector<16x128xf32>,
    %c0_i32_11 = arith.constant 0 : i32
    %11 = arith.cmpi eq, %arg3, %c0_i32_11 : i32
    %12 = arith.extui %11 : i1 to i32
    %c0_i32_12 = arith.constant 0 : i32
    %13 = arith.cmpi ne, %12, %c0_i32_12 : i32
    scf.if %13 {
      %c0_13 = arith.constant 0 : index
      %c0_14 = arith.constant 0 : index
      %14 = vector.load %arg9[%c0_13, %c0_14] : memref<16x128xf32, #tpu.memory_space<vmem>>, vector<16x128xf32>
      %c0_15 = arith.constant 0 : index
      %c0_16 = arith.constant 0 : index
      %15 = vector.load %arg6[%c0_15, %c0_16] : memref<1x128xf32, #tpu.memory_space<vmem>>, vector<1x128xf32>
      %16 = vector.broadcast %15 : vector<1x128xf32> to vector<16x128xf32>
      %17 = arith.addf %14, %16 : vector<16x128xf32>
      %c0_17 = arith.constant 0 : index
      %c0_18 = arith.constant 0 : index
      %c0_19 = arith.constant 0 : index
      %c0_20 = arith.constant 0 : index
      %18 = vector.load %arg7[%c0_17, %c0_18, %c0_19, %c0_20] : memref<1x1x16x128xf32, #tpu.memory_space<vmem>>, vector<1x1x16x128xf32>
      %19 = vector.shape_cast %18 : vector<1x1x16x128xf32> to vector<16x128xf32>
      %20 = arith.addf %17, %19 : vector<16x128xf32>
      %cst_21 = arith.constant 0.000000e+00 : f32
      %21 = vector.broadcast %cst_21 : f32 to vector<16x128xf32>
      %22 = arith.maximumf %20, %21 : vector<16x128xf32>
      %c0_22 = arith.constant 0 : index
      %c0_23 = arith.constant 0 : index
      %c0_24 = arith.constant 0 : index
      %c0_25 = arith.constant 0 : index
      %23 = vector.load %arg8[%c0_22, %c0_23, %c0_24, %c0_25] : memref<1x1x16x128xf32, #tpu.memory_space<vmem>>, vector<1x1x16x128xf32>
      %24 = vector.shape_cast %23 : vector<1x1x16x128xf32> to vector<16x128xf32>
      %25 = vector.shape_cast %22 : vector<16x128xf32> to vector<1x1x16x128xf32>
      tpu.vector_store %arg8[%c0_22, %c0_23, %c0_24, %c0_25], %25 {strides = array<i32>} : memref<1x1x16x128xf32, #tpu.memory_space<vmem>>, vector<1x1x16x128xf32>,
    } else {
    }
    return
  }
  func.func @transform_0(%arg0: i32, %arg1: i32, %arg2: i32, %arg3: i32) -> (i32, i32, i32, i32) {
    %0 = arith.addi %arg1, %arg3 : i32
    %c0_i32 = arith.constant 0 : i32
    %c0_i32_0 = arith.constant 0 : i32
    return %arg0, %0, %arg2, %c0_i32 : i32, i32, i32, i32
  }
  func.func @transform_1(%arg0: i32, %arg1: i32, %arg2: i32, %arg3: i32) -> (i32, i32, i32) {
    %c0_i32 = arith.constant 0 : i32
    %c0_i32_0 = arith.constant 0 : i32
    %c0_i32_1 = arith.constant 0 : i32
    return %arg3, %c0_i32, %c0_i32_0 : i32, i32, i32
  }
  func.func @transform_2(%arg0: i32, %arg1: i32, %arg2: i32, %arg3: i32) -> (i32, i32) {
    %c0_i32 = arith.constant 0 : i32
    %c0_i32_0 = arith.constant 0 : i32
    %c0_i32_1 = arith.constant 0 : i32
    return %c0_i32, %c0_i32_0 : i32, i32
  }
  func.func @transform_3(%arg0: i32, %arg1: i32, %arg2: i32, %arg3: i32) -> (i32, i32, i32, i32) {
    %c0_i32 = arith.constant 0 : i32
    %c0_i32_0 = arith.constant 0 : i32
    return %arg0, %arg1, %arg2, %c0_i32 : i32, i32, i32, i32
  }
  func.func @transform_4(%arg0: i32, %arg1: i32, %arg2: i32, %arg3: i32) -> (i32, i32, i32, i32) {
    %c0_i32 = arith.constant 0 : i32
    %c0_i32_0 = arith.constant 0 : i32
    return %arg0, %arg1, %arg2, %c0_i32 : i32, i32, i32, i32
  }
}

module attributes {stable_mosaic.version = 11 : i64} {
  func.func @_conv_gemm_kernel(%arg0: i32, %arg1: i32, %arg2: i32, %arg3: i32, %arg4: memref<1x1x16x32xbf16, #tpu.memory_space<vmem>>, %arg5: memref<1x32x128xbf16, #tpu.memory_space<vmem>>, %arg6: memref<1x128xf32, #tpu.memory_space<vmem>>, %arg7: memref<1x1x16x128xf32, #tpu.memory_space<vmem>>, %arg8: memref<16x128xf32, #tpu.memory_space<vmem>>) attributes {dimension_semantics = [#tpu.dimension_semantics<parallel>, #tpu.dimension_semantics<parallel>, #tpu.dimension_semantics<parallel>, #tpu.dimension_semantics<arbitrary>], iteration_bounds = array<i64: 2, 2, 1, 3>, scalar_prefetch = 0 : i64, scratch_operands = 1 : i64, tpu.core_type = #tpu.core_type<tc>, window_params = [{transform_indices = @transform_0, window_bounds = array<i64: 1, 1, 16, 32>}, {transform_indices = @transform_1, window_bounds = array<i64: 1, 32, 128>}, {pipeline_mode = #tpu.pipeline_mode<synchronous>, transform_indices = @transform_2, window_bounds = array<i64: 1, 128>}, {transform_indices = @transform_3, window_bounds = array<i64: 1, 1, 16, 128>}]} {
    %c0_i32 = arith.constant 0 : i32
    %0 = arith.cmpi eq, %arg3, %c0_i32 : i32
    %1 = arith.extui %0 : i1 to i32
    %c0_i32_0 = arith.constant 0 : i32
    %2 = arith.cmpi ne, %1, %c0_i32_0 : i32
    scf.if %2 {
      %cst_12 = arith.constant 0.000000e+00 : f32
      %14 = vector.broadcast %cst_12 : f32 to vector<16x128xf32>
      %c0_13 = arith.constant 0 : index
      %c0_14 = arith.constant 0 : index
      %15 = vector.load %arg8[%c0_13, %c0_14] : memref<16x128xf32, #tpu.memory_space<vmem>>, vector<16x128xf32>
      tpu.vector_store %arg8[%c0_13, %c0_14], %14 {strides = array<i32>} : memref<16x128xf32, #tpu.memory_space<vmem>>, vector<16x128xf32>,
    } else {
    }
    %c0 = arith.constant 0 : index
    %c0_1 = arith.constant 0 : index
    %3 = vector.load %arg8[%c0, %c0_1] : memref<16x128xf32, #tpu.memory_space<vmem>>, vector<16x128xf32>
    %c0_2 = arith.constant 0 : index
    %c0_3 = arith.constant 0 : index
    %c0_4 = arith.constant 0 : index
    %c0_5 = arith.constant 0 : index
    %4 = vector.load %arg4[%c0_2, %c0_3, %c0_4, %c0_5] : memref<1x1x16x32xbf16, #tpu.memory_space<vmem>>, vector<1x1x16x32xbf16>
    %5 = vector.shape_cast %4 : vector<1x1x16x32xbf16> to vector<16x32xbf16>
    %c0_6 = arith.constant 0 : index
    %c0_7 = arith.constant 0 : index
    %c0_8 = arith.constant 0 : index
    %6 = vector.load %arg5[%c0_6, %c0_7, %c0_8] : memref<1x32x128xbf16, #tpu.memory_space<vmem>>, vector<1x32x128xbf16>
    %7 = vector.shape_cast %6 : vector<1x32x128xbf16> to vector<32x128xbf16>
    %cst = arith.constant dense<0.000000e+00> : vector<16x128xf32>
    %8 = tpu.matmul %5, %7, %cst {dimension_numbers = #tpu.dot_dimension_numbers<[1], [0], [0], [1], [0, 0, 1, 1], [], []>} : vector<16x32xbf16>, vector<32x128xbf16>, vector<16x128xf32> -> vector<16x128xf32>
    %9 = arith.addf %3, %8 : vector<16x128xf32>
    %c0_9 = arith.constant 0 : index
    %c0_10 = arith.constant 0 : index
    %10 = vector.load %arg8[%c0_9, %c0_10] : memref<16x128xf32, #tpu.memory_space<vmem>>, vector<16x128xf32>
    tpu.vector_store %arg8[%c0_9, %c0_10], %9 {strides = array<i32>} : memref<16x128xf32, #tpu.memory_space<vmem>>, vector<16x128xf32>,
    %c2_i32 = arith.constant 2 : i32
    %11 = arith.cmpi eq, %arg3, %c2_i32 : i32
    %12 = arith.extui %11 : i1 to i32
    %c0_i32_11 = arith.constant 0 : i32
    %13 = arith.cmpi ne, %12, %c0_i32_11 : i32
    scf.if %13 {
      %c0_12 = arith.constant 0 : index
      %c0_13 = arith.constant 0 : index
      %14 = vector.load %arg8[%c0_12, %c0_13] : memref<16x128xf32, #tpu.memory_space<vmem>>, vector<16x128xf32>
      %c0_14 = arith.constant 0 : index
      %c0_15 = arith.constant 0 : index
      %15 = vector.load %arg6[%c0_14, %c0_15] : memref<1x128xf32, #tpu.memory_space<vmem>>, vector<1x128xf32>
      %16 = vector.broadcast %15 : vector<1x128xf32> to vector<16x128xf32>
      %17 = arith.addf %14, %16 : vector<16x128xf32>
      %cst_16 = arith.constant 0.000000e+00 : f32
      %18 = vector.broadcast %cst_16 : f32 to vector<16x128xf32>
      %19 = arith.maximumf %17, %18 : vector<16x128xf32>
      %c0_17 = arith.constant 0 : index
      %c0_18 = arith.constant 0 : index
      %c0_19 = arith.constant 0 : index
      %c0_20 = arith.constant 0 : index
      %20 = vector.load %arg7[%c0_17, %c0_18, %c0_19, %c0_20] : memref<1x1x16x128xf32, #tpu.memory_space<vmem>>, vector<1x1x16x128xf32>
      %21 = vector.shape_cast %20 : vector<1x1x16x128xf32> to vector<16x128xf32>
      %22 = vector.shape_cast %19 : vector<16x128xf32> to vector<1x1x16x128xf32>
      tpu.vector_store %arg7[%c0_17, %c0_18, %c0_19, %c0_20], %22 {strides = array<i32>} : memref<1x1x16x128xf32, #tpu.memory_space<vmem>>, vector<1x1x16x128xf32>,
    } else {
    }
    return
  }
  func.func @transform_0(%arg0: i32, %arg1: i32, %arg2: i32, %arg3: i32) -> (i32, i32, i32, i32) {
    %0 = arith.addi %arg1, %arg3 : i32
    %c0_i32 = arith.constant 0 : i32
    %c0_i32_0 = arith.constant 0 : i32
    return %arg0, %0, %arg2, %c0_i32 : i32, i32, i32, i32
  }
  func.func @transform_1(%arg0: i32, %arg1: i32, %arg2: i32, %arg3: i32) -> (i32, i32, i32) {
    %c0_i32 = arith.constant 0 : i32
    %c0_i32_0 = arith.constant 0 : i32
    %c0_i32_1 = arith.constant 0 : i32
    return %arg3, %c0_i32, %c0_i32_0 : i32, i32, i32
  }
  func.func @transform_2(%arg0: i32, %arg1: i32, %arg2: i32, %arg3: i32) -> (i32, i32) {
    %c0_i32 = arith.constant 0 : i32
    %c0_i32_0 = arith.constant 0 : i32
    %c0_i32_1 = arith.constant 0 : i32
    return %c0_i32, %c0_i32_0 : i32, i32
  }
  func.func @transform_3(%arg0: i32, %arg1: i32, %arg2: i32, %arg3: i32) -> (i32, i32, i32, i32) {
    %c0_i32 = arith.constant 0 : i32
    %c0_i32_0 = arith.constant 0 : i32
    return %arg0, %arg1, %arg2, %c0_i32 : i32, i32, i32, i32
  }
}

module attributes {stable_mosaic.version = 11 : i64} {
  func.func @_conv_gemm_kernel(%arg0: i32, %arg1: i32, %arg2: i32, %arg3: i32, %arg4: memref<1x1x24x32xbf16, #tpu.memory_space<vmem>>, %arg5: memref<1x32x128xbf16, #tpu.memory_space<vmem>>, %arg6: memref<1x128xf32, #tpu.memory_space<vmem>>, %arg7: memref<1x1x24x128xf32, #tpu.memory_space<vmem>>, %arg8: memref<24x128xf32, #tpu.memory_space<vmem>>) attributes {dimension_semantics = [#tpu.dimension_semantics<parallel>, #tpu.dimension_semantics<parallel>, #tpu.dimension_semantics<parallel>, #tpu.dimension_semantics<arbitrary>], iteration_bounds = array<i64: 2, 2, 1, 3>, scalar_prefetch = 0 : i64, scratch_operands = 1 : i64, tpu.core_type = #tpu.core_type<tc>, window_params = [{transform_indices = @transform_0, window_bounds = array<i64: 1, 1, 24, 32>}, {transform_indices = @transform_1, window_bounds = array<i64: 1, 32, 128>}, {pipeline_mode = #tpu.pipeline_mode<synchronous>, transform_indices = @transform_2, window_bounds = array<i64: 1, 128>}, {transform_indices = @transform_3, window_bounds = array<i64: 1, 1, 24, 128>}]} {
    %c0_i32 = arith.constant 0 : i32
    %0 = arith.cmpi eq, %arg3, %c0_i32 : i32
    %1 = arith.extui %0 : i1 to i32
    %c0_i32_0 = arith.constant 0 : i32
    %2 = arith.cmpi ne, %1, %c0_i32_0 : i32
    scf.if %2 {
      %cst_12 = arith.constant 0.000000e+00 : f32
      %14 = vector.broadcast %cst_12 : f32 to vector<24x128xf32>
      %c0_13 = arith.constant 0 : index
      %c0_14 = arith.constant 0 : index
      %15 = vector.load %arg8[%c0_13, %c0_14] : memref<24x128xf32, #tpu.memory_space<vmem>>, vector<24x128xf32>
      tpu.vector_store %arg8[%c0_13, %c0_14], %14 {strides = array<i32>} : memref<24x128xf32, #tpu.memory_space<vmem>>, vector<24x128xf32>,
    } else {
    }
    %c0 = arith.constant 0 : index
    %c0_1 = arith.constant 0 : index
    %3 = vector.load %arg8[%c0, %c0_1] : memref<24x128xf32, #tpu.memory_space<vmem>>, vector<24x128xf32>
    %c0_2 = arith.constant 0 : index
    %c0_3 = arith.constant 0 : index
    %c0_4 = arith.constant 0 : index
    %c0_5 = arith.constant 0 : index
    %4 = vector.load %arg4[%c0_2, %c0_3, %c0_4, %c0_5] : memref<1x1x24x32xbf16, #tpu.memory_space<vmem>>, vector<1x1x24x32xbf16>
    %5 = vector.shape_cast %4 : vector<1x1x24x32xbf16> to vector<24x32xbf16>
    %c0_6 = arith.constant 0 : index
    %c0_7 = arith.constant 0 : index
    %c0_8 = arith.constant 0 : index
    %6 = vector.load %arg5[%c0_6, %c0_7, %c0_8] : memref<1x32x128xbf16, #tpu.memory_space<vmem>>, vector<1x32x128xbf16>
    %7 = vector.shape_cast %6 : vector<1x32x128xbf16> to vector<32x128xbf16>
    %cst = arith.constant dense<0.000000e+00> : vector<24x128xf32>
    %8 = tpu.matmul %5, %7, %cst {dimension_numbers = #tpu.dot_dimension_numbers<[1], [0], [0], [1], [0, 0, 1, 1], [], []>} : vector<24x32xbf16>, vector<32x128xbf16>, vector<24x128xf32> -> vector<24x128xf32>
    %9 = arith.addf %3, %8 : vector<24x128xf32>
    %c0_9 = arith.constant 0 : index
    %c0_10 = arith.constant 0 : index
    %10 = vector.load %arg8[%c0_9, %c0_10] : memref<24x128xf32, #tpu.memory_space<vmem>>, vector<24x128xf32>
    tpu.vector_store %arg8[%c0_9, %c0_10], %9 {strides = array<i32>} : memref<24x128xf32, #tpu.memory_space<vmem>>, vector<24x128xf32>,
    %c2_i32 = arith.constant 2 : i32
    %11 = arith.cmpi eq, %arg3, %c2_i32 : i32
    %12 = arith.extui %11 : i1 to i32
    %c0_i32_11 = arith.constant 0 : i32
    %13 = arith.cmpi ne, %12, %c0_i32_11 : i32
    scf.if %13 {
      %c0_12 = arith.constant 0 : index
      %c0_13 = arith.constant 0 : index
      %14 = vector.load %arg8[%c0_12, %c0_13] : memref<24x128xf32, #tpu.memory_space<vmem>>, vector<24x128xf32>
      %c0_14 = arith.constant 0 : index
      %c0_15 = arith.constant 0 : index
      %15 = vector.load %arg6[%c0_14, %c0_15] : memref<1x128xf32, #tpu.memory_space<vmem>>, vector<1x128xf32>
      %16 = vector.broadcast %15 : vector<1x128xf32> to vector<24x128xf32>
      %17 = arith.addf %14, %16 : vector<24x128xf32>
      %cst_16 = arith.constant 0.000000e+00 : f32
      %18 = vector.broadcast %cst_16 : f32 to vector<24x128xf32>
      %19 = arith.maximumf %17, %18 : vector<24x128xf32>
      %c0_17 = arith.constant 0 : index
      %c0_18 = arith.constant 0 : index
      %c0_19 = arith.constant 0 : index
      %c0_20 = arith.constant 0 : index
      %20 = vector.load %arg7[%c0_17, %c0_18, %c0_19, %c0_20] : memref<1x1x24x128xf32, #tpu.memory_space<vmem>>, vector<1x1x24x128xf32>
      %21 = vector.shape_cast %20 : vector<1x1x24x128xf32> to vector<24x128xf32>
      %22 = vector.shape_cast %19 : vector<24x128xf32> to vector<1x1x24x128xf32>
      tpu.vector_store %arg7[%c0_17, %c0_18, %c0_19, %c0_20], %22 {strides = array<i32>} : memref<1x1x24x128xf32, #tpu.memory_space<vmem>>, vector<1x1x24x128xf32>,
    } else {
    }
    return
  }
  func.func @transform_0(%arg0: i32, %arg1: i32, %arg2: i32, %arg3: i32) -> (i32, i32, i32, i32) {
    %0 = arith.addi %arg1, %arg3 : i32
    %c0_i32 = arith.constant 0 : i32
    %c0_i32_0 = arith.constant 0 : i32
    return %arg0, %0, %arg2, %c0_i32 : i32, i32, i32, i32
  }
  func.func @transform_1(%arg0: i32, %arg1: i32, %arg2: i32, %arg3: i32) -> (i32, i32, i32) {
    %c0_i32 = arith.constant 0 : i32
    %c0_i32_0 = arith.constant 0 : i32
    %c0_i32_1 = arith.constant 0 : i32
    return %arg3, %c0_i32, %c0_i32_0 : i32, i32, i32
  }
  func.func @transform_2(%arg0: i32, %arg1: i32, %arg2: i32, %arg3: i32) -> (i32, i32) {
    %c0_i32 = arith.constant 0 : i32
    %c0_i32_0 = arith.constant 0 : i32
    %c0_i32_1 = arith.constant 0 : i32
    return %c0_i32, %c0_i32_0 : i32, i32
  }
  func.func @transform_3(%arg0: i32, %arg1: i32, %arg2: i32, %arg3: i32) -> (i32, i32, i32, i32) {
    %c0_i32 = arith.constant 0 : i32
    %c0_i32_0 = arith.constant 0 : i32
    return %arg0, %arg1, %arg2, %c0_i32 : i32, i32, i32, i32
  }
}

module attributes {stable_mosaic.version = 11 : i64} {
  func.func @_conv_gemm_kernel(%arg0: i32, %arg1: i32, %arg2: i32, %arg3: i32, %arg4: memref<1x1x72x32xbf16, #tpu.memory_space<vmem>>, %arg5: memref<1x32x128xbf16, #tpu.memory_space<vmem>>, %arg6: memref<1x128xf32, #tpu.memory_space<vmem>>, %arg7: memref<1x1x72x128xf32, #tpu.memory_space<vmem>>, %arg8: memref<72x128xf32, #tpu.memory_space<vmem>>) attributes {dimension_semantics = [#tpu.dimension_semantics<parallel>, #tpu.dimension_semantics<parallel>, #tpu.dimension_semantics<parallel>, #tpu.dimension_semantics<arbitrary>], iteration_bounds = array<i64: 2, 2, 1, 3>, scalar_prefetch = 0 : i64, scratch_operands = 1 : i64, tpu.core_type = #tpu.core_type<tc>, window_params = [{transform_indices = @transform_0, window_bounds = array<i64: 1, 1, 72, 32>}, {transform_indices = @transform_1, window_bounds = array<i64: 1, 32, 128>}, {pipeline_mode = #tpu.pipeline_mode<synchronous>, transform_indices = @transform_2, window_bounds = array<i64: 1, 128>}, {transform_indices = @transform_3, window_bounds = array<i64: 1, 1, 72, 128>}]} {
    %c0_i32 = arith.constant 0 : i32
    %0 = arith.cmpi eq, %arg3, %c0_i32 : i32
    %1 = arith.extui %0 : i1 to i32
    %c0_i32_0 = arith.constant 0 : i32
    %2 = arith.cmpi ne, %1, %c0_i32_0 : i32
    scf.if %2 {
      %cst_12 = arith.constant 0.000000e+00 : f32
      %14 = vector.broadcast %cst_12 : f32 to vector<72x128xf32>
      %c0_13 = arith.constant 0 : index
      %c0_14 = arith.constant 0 : index
      %15 = vector.load %arg8[%c0_13, %c0_14] : memref<72x128xf32, #tpu.memory_space<vmem>>, vector<72x128xf32>
      tpu.vector_store %arg8[%c0_13, %c0_14], %14 {strides = array<i32>} : memref<72x128xf32, #tpu.memory_space<vmem>>, vector<72x128xf32>,
    } else {
    }
    %c0 = arith.constant 0 : index
    %c0_1 = arith.constant 0 : index
    %3 = vector.load %arg8[%c0, %c0_1] : memref<72x128xf32, #tpu.memory_space<vmem>>, vector<72x128xf32>
    %c0_2 = arith.constant 0 : index
    %c0_3 = arith.constant 0 : index
    %c0_4 = arith.constant 0 : index
    %c0_5 = arith.constant 0 : index
    %4 = vector.load %arg4[%c0_2, %c0_3, %c0_4, %c0_5] : memref<1x1x72x32xbf16, #tpu.memory_space<vmem>>, vector<1x1x72x32xbf16>
    %5 = vector.shape_cast %4 : vector<1x1x72x32xbf16> to vector<72x32xbf16>
    %c0_6 = arith.constant 0 : index
    %c0_7 = arith.constant 0 : index
    %c0_8 = arith.constant 0 : index
    %6 = vector.load %arg5[%c0_6, %c0_7, %c0_8] : memref<1x32x128xbf16, #tpu.memory_space<vmem>>, vector<1x32x128xbf16>
    %7 = vector.shape_cast %6 : vector<1x32x128xbf16> to vector<32x128xbf16>
    %cst = arith.constant dense<0.000000e+00> : vector<72x128xf32>
    %8 = tpu.matmul %5, %7, %cst {dimension_numbers = #tpu.dot_dimension_numbers<[1], [0], [0], [1], [0, 0, 1, 1], [], []>} : vector<72x32xbf16>, vector<32x128xbf16>, vector<72x128xf32> -> vector<72x128xf32>
    %9 = arith.addf %3, %8 : vector<72x128xf32>
    %c0_9 = arith.constant 0 : index
    %c0_10 = arith.constant 0 : index
    %10 = vector.load %arg8[%c0_9, %c0_10] : memref<72x128xf32, #tpu.memory_space<vmem>>, vector<72x128xf32>
    tpu.vector_store %arg8[%c0_9, %c0_10], %9 {strides = array<i32>} : memref<72x128xf32, #tpu.memory_space<vmem>>, vector<72x128xf32>,
    %c2_i32 = arith.constant 2 : i32
    %11 = arith.cmpi eq, %arg3, %c2_i32 : i32
    %12 = arith.extui %11 : i1 to i32
    %c0_i32_11 = arith.constant 0 : i32
    %13 = arith.cmpi ne, %12, %c0_i32_11 : i32
    scf.if %13 {
      %c0_12 = arith.constant 0 : index
      %c0_13 = arith.constant 0 : index
      %14 = vector.load %arg8[%c0_12, %c0_13] : memref<72x128xf32, #tpu.memory_space<vmem>>, vector<72x128xf32>
      %c0_14 = arith.constant 0 : index
      %c0_15 = arith.constant 0 : index
      %15 = vector.load %arg6[%c0_14, %c0_15] : memref<1x128xf32, #tpu.memory_space<vmem>>, vector<1x128xf32>
      %16 = vector.broadcast %15 : vector<1x128xf32> to vector<72x128xf32>
      %17 = arith.addf %14, %16 : vector<72x128xf32>
      %c0_16 = arith.constant 0 : index
      %c0_17 = arith.constant 0 : index
      %c0_18 = arith.constant 0 : index
      %c0_19 = arith.constant 0 : index
      %18 = vector.load %arg7[%c0_16, %c0_17, %c0_18, %c0_19] : memref<1x1x72x128xf32, #tpu.memory_space<vmem>>, vector<1x1x72x128xf32>
      %19 = vector.shape_cast %18 : vector<1x1x72x128xf32> to vector<72x128xf32>
      %20 = vector.shape_cast %17 : vector<72x128xf32> to vector<1x1x72x128xf32>
      tpu.vector_store %arg7[%c0_16, %c0_17, %c0_18, %c0_19], %20 {strides = array<i32>} : memref<1x1x72x128xf32, #tpu.memory_space<vmem>>, vector<1x1x72x128xf32>,
    } else {
    }
    return
  }
  func.func @transform_0(%arg0: i32, %arg1: i32, %arg2: i32, %arg3: i32) -> (i32, i32, i32, i32) {
    %0 = arith.addi %arg1, %arg3 : i32
    %c0_i32 = arith.constant 0 : i32
    %c0_i32_0 = arith.constant 0 : i32
    return %arg0, %0, %arg2, %c0_i32 : i32, i32, i32, i32
  }
  func.func @transform_1(%arg0: i32, %arg1: i32, %arg2: i32, %arg3: i32) -> (i32, i32, i32) {
    %c0_i32 = arith.constant 0 : i32
    %c0_i32_0 = arith.constant 0 : i32
    %c0_i32_1 = arith.constant 0 : i32
    return %arg3, %c0_i32, %c0_i32_0 : i32, i32, i32
  }
  func.func @transform_2(%arg0: i32, %arg1: i32, %arg2: i32, %arg3: i32) -> (i32, i32) {
    %c0_i32 = arith.constant 0 : i32
    %c0_i32_0 = arith.constant 0 : i32
    %c0_i32_1 = arith.constant 0 : i32
    return %c0_i32, %c0_i32_0 : i32, i32
  }
  func.func @transform_3(%arg0: i32, %arg1: i32, %arg2: i32, %arg3: i32) -> (i32, i32, i32, i32) {
    %c0_i32 = arith.constant 0 : i32
    %c0_i32_0 = arith.constant 0 : i32
    return %arg0, %arg1, %arg2, %c0_i32 : i32, i32, i32, i32
  }
}

module attributes {stable_mosaic.version = 11 : i64} {
  func.func @_conv_gemm_kernel(%arg0: i32, %arg1: i32, %arg2: i32, %arg3: i32, %arg4: memref<1x1x80x32xbf16, #tpu.memory_space<vmem>>, %arg5: memref<1x32x128xbf16, #tpu.memory_space<vmem>>, %arg6: memref<1x128xf32, #tpu.memory_space<vmem>>, %arg7: memref<1x1x80x128xf32, #tpu.memory_space<vmem>>, %arg8: memref<80x128xf32, #tpu.memory_space<vmem>>) attributes {dimension_semantics = [#tpu.dimension_semantics<parallel>, #tpu.dimension_semantics<parallel>, #tpu.dimension_semantics<parallel>, #tpu.dimension_semantics<arbitrary>], iteration_bounds = array<i64: 2, 2, 1, 3>, scalar_prefetch = 0 : i64, scratch_operands = 1 : i64, tpu.core_type = #tpu.core_type<tc>, window_params = [{transform_indices = @transform_0, window_bounds = array<i64: 1, 1, 80, 32>}, {transform_indices = @transform_1, window_bounds = array<i64: 1, 32, 128>}, {pipeline_mode = #tpu.pipeline_mode<synchronous>, transform_indices = @transform_2, window_bounds = array<i64: 1, 128>}, {transform_indices = @transform_3, window_bounds = array<i64: 1, 1, 80, 128>}]} {
    %c0_i32 = arith.constant 0 : i32
    %0 = arith.cmpi eq, %arg3, %c0_i32 : i32
    %1 = arith.extui %0 : i1 to i32
    %c0_i32_0 = arith.constant 0 : i32
    %2 = arith.cmpi ne, %1, %c0_i32_0 : i32
    scf.if %2 {
      %cst_12 = arith.constant 0.000000e+00 : f32
      %14 = vector.broadcast %cst_12 : f32 to vector<80x128xf32>
      %c0_13 = arith.constant 0 : index
      %c0_14 = arith.constant 0 : index
      %15 = vector.load %arg8[%c0_13, %c0_14] : memref<80x128xf32, #tpu.memory_space<vmem>>, vector<80x128xf32>
      tpu.vector_store %arg8[%c0_13, %c0_14], %14 {strides = array<i32>} : memref<80x128xf32, #tpu.memory_space<vmem>>, vector<80x128xf32>,
    } else {
    }
    %c0 = arith.constant 0 : index
    %c0_1 = arith.constant 0 : index
    %3 = vector.load %arg8[%c0, %c0_1] : memref<80x128xf32, #tpu.memory_space<vmem>>, vector<80x128xf32>
    %c0_2 = arith.constant 0 : index
    %c0_3 = arith.constant 0 : index
    %c0_4 = arith.constant 0 : index
    %c0_5 = arith.constant 0 : index
    %4 = vector.load %arg4[%c0_2, %c0_3, %c0_4, %c0_5] : memref<1x1x80x32xbf16, #tpu.memory_space<vmem>>, vector<1x1x80x32xbf16>
    %5 = vector.shape_cast %4 : vector<1x1x80x32xbf16> to vector<80x32xbf16>
    %c0_6 = arith.constant 0 : index
    %c0_7 = arith.constant 0 : index
    %c0_8 = arith.constant 0 : index
    %6 = vector.load %arg5[%c0_6, %c0_7, %c0_8] : memref<1x32x128xbf16, #tpu.memory_space<vmem>>, vector<1x32x128xbf16>
    %7 = vector.shape_cast %6 : vector<1x32x128xbf16> to vector<32x128xbf16>
    %cst = arith.constant dense<0.000000e+00> : vector<80x128xf32>
    %8 = tpu.matmul %5, %7, %cst {dimension_numbers = #tpu.dot_dimension_numbers<[1], [0], [0], [1], [0, 0, 1, 1], [], []>} : vector<80x32xbf16>, vector<32x128xbf16>, vector<80x128xf32> -> vector<80x128xf32>
    %9 = arith.addf %3, %8 : vector<80x128xf32>
    %c0_9 = arith.constant 0 : index
    %c0_10 = arith.constant 0 : index
    %10 = vector.load %arg8[%c0_9, %c0_10] : memref<80x128xf32, #tpu.memory_space<vmem>>, vector<80x128xf32>
    tpu.vector_store %arg8[%c0_9, %c0_10], %9 {strides = array<i32>} : memref<80x128xf32, #tpu.memory_space<vmem>>, vector<80x128xf32>,
    %c2_i32 = arith.constant 2 : i32
    %11 = arith.cmpi eq, %arg3, %c2_i32 : i32
    %12 = arith.extui %11 : i1 to i32
    %c0_i32_11 = arith.constant 0 : i32
    %13 = arith.cmpi ne, %12, %c0_i32_11 : i32
    scf.if %13 {
      %c0_12 = arith.constant 0 : index
      %c0_13 = arith.constant 0 : index
      %14 = vector.load %arg8[%c0_12, %c0_13] : memref<80x128xf32, #tpu.memory_space<vmem>>, vector<80x128xf32>
      %c0_14 = arith.constant 0 : index
      %c0_15 = arith.constant 0 : index
      %15 = vector.load %arg6[%c0_14, %c0_15] : memref<1x128xf32, #tpu.memory_space<vmem>>, vector<1x128xf32>
      %16 = vector.broadcast %15 : vector<1x128xf32> to vector<80x128xf32>
      %17 = arith.addf %14, %16 : vector<80x128xf32>
      %c0_16 = arith.constant 0 : index
      %c0_17 = arith.constant 0 : index
      %c0_18 = arith.constant 0 : index
      %c0_19 = arith.constant 0 : index
      %18 = vector.load %arg7[%c0_16, %c0_17, %c0_18, %c0_19] : memref<1x1x80x128xf32, #tpu.memory_space<vmem>>, vector<1x1x80x128xf32>
      %19 = vector.shape_cast %18 : vector<1x1x80x128xf32> to vector<80x128xf32>
      %20 = vector.shape_cast %17 : vector<80x128xf32> to vector<1x1x80x128xf32>
      tpu.vector_store %arg7[%c0_16, %c0_17, %c0_18, %c0_19], %20 {strides = array<i32>} : memref<1x1x80x128xf32, #tpu.memory_space<vmem>>, vector<1x1x80x128xf32>,
    } else {
    }
    return
  }
  func.func @transform_0(%arg0: i32, %arg1: i32, %arg2: i32, %arg3: i32) -> (i32, i32, i32, i32) {
    %0 = arith.addi %arg1, %arg3 : i32
    %c0_i32 = arith.constant 0 : i32
    %c0_i32_0 = arith.constant 0 : i32
    return %arg0, %0, %arg2, %c0_i32 : i32, i32, i32, i32
  }
  func.func @transform_1(%arg0: i32, %arg1: i32, %arg2: i32, %arg3: i32) -> (i32, i32, i32) {
    %c0_i32 = arith.constant 0 : i32
    %c0_i32_0 = arith.constant 0 : i32
    %c0_i32_1 = arith.constant 0 : i32
    return %arg3, %c0_i32, %c0_i32_0 : i32, i32, i32
  }
  func.func @transform_2(%arg0: i32, %arg1: i32, %arg2: i32, %arg3: i32) -> (i32, i32) {
    %c0_i32 = arith.constant 0 : i32
    %c0_i32_0 = arith.constant 0 : i32
    %c0_i32_1 = arith.constant 0 : i32
    return %c0_i32, %c0_i32_0 : i32, i32
  }
  func.func @transform_3(%arg0: i32, %arg1: i32, %arg2: i32, %arg3: i32) -> (i32, i32, i32, i32) {
    %c0_i32 = arith.constant 0 : i32
    %c0_i32_0 = arith.constant 0 : i32
    return %arg0, %arg1, %arg2, %c0_i32 : i32, i32, i32, i32
  }
}

module attributes {stable_mosaic.version = 11 : i64} {
  func.func @_conv_gemm_kernel(%arg0: i32, %arg1: i32, %arg2: i32, %arg3: i32, %arg4: memref<1x1x304x4xbf16, #tpu.memory_space<vmem>>, %arg5: memref<1x4x128xbf16, #tpu.memory_space<vmem>>, %arg6: memref<1x128xf32, #tpu.memory_space<vmem>>, %arg7: memref<1x1x304x128xf32, #tpu.memory_space<vmem>>, %arg8: memref<304x128xf32, #tpu.memory_space<vmem>>) attributes {dimension_semantics = [#tpu.dimension_semantics<parallel>, #tpu.dimension_semantics<parallel>, #tpu.dimension_semantics<parallel>, #tpu.dimension_semantics<arbitrary>], iteration_bounds = array<i64: 2, 2, 1, 2>, scalar_prefetch = 0 : i64, scratch_operands = 1 : i64, tpu.core_type = #tpu.core_type<tc>, window_params = [{transform_indices = @transform_0, window_bounds = array<i64: 1, 1, 304, 4>}, {transform_indices = @transform_1, window_bounds = array<i64: 1, 4, 128>}, {pipeline_mode = #tpu.pipeline_mode<synchronous>, transform_indices = @transform_2, window_bounds = array<i64: 1, 128>}, {transform_indices = @transform_3, window_bounds = array<i64: 1, 1, 304, 128>}]} {
    %c0_i32 = arith.constant 0 : i32
    %0 = arith.cmpi eq, %arg3, %c0_i32 : i32
    %1 = arith.extui %0 : i1 to i32
    %c0_i32_0 = arith.constant 0 : i32
    %2 = arith.cmpi ne, %1, %c0_i32_0 : i32
    scf.if %2 {
      %cst_12 = arith.constant 0.000000e+00 : f32
      %14 = vector.broadcast %cst_12 : f32 to vector<304x128xf32>
      %c0_13 = arith.constant 0 : index
      %c0_14 = arith.constant 0 : index
      %15 = vector.load %arg8[%c0_13, %c0_14] : memref<304x128xf32, #tpu.memory_space<vmem>>, vector<304x128xf32>
      tpu.vector_store %arg8[%c0_13, %c0_14], %14 {strides = array<i32>} : memref<304x128xf32, #tpu.memory_space<vmem>>, vector<304x128xf32>,
    } else {
    }
    %c0 = arith.constant 0 : index
    %c0_1 = arith.constant 0 : index
    %3 = vector.load %arg8[%c0, %c0_1] : memref<304x128xf32, #tpu.memory_space<vmem>>, vector<304x128xf32>
    %c0_2 = arith.constant 0 : index
    %c0_3 = arith.constant 0 : index
    %c0_4 = arith.constant 0 : index
    %c0_5 = arith.constant 0 : index
    %4 = vector.load %arg4[%c0_2, %c0_3, %c0_4, %c0_5] : memref<1x1x304x4xbf16, #tpu.memory_space<vmem>>, vector<1x1x304x4xbf16>
    %5 = vector.shape_cast %4 : vector<1x1x304x4xbf16> to vector<304x4xbf16>
    %c0_6 = arith.constant 0 : index
    %c0_7 = arith.constant 0 : index
    %c0_8 = arith.constant 0 : index
    %6 = vector.load %arg5[%c0_6, %c0_7, %c0_8] : memref<1x4x128xbf16, #tpu.memory_space<vmem>>, vector<1x4x128xbf16>
    %7 = vector.shape_cast %6 : vector<1x4x128xbf16> to vector<4x128xbf16>
    %cst = arith.constant dense<0.000000e+00> : vector<304x128xf32>
    %8 = tpu.matmul %5, %7, %cst {dimension_numbers = #tpu.dot_dimension_numbers<[1], [0], [0], [1], [0, 0, 1, 1], [], []>} : vector<304x4xbf16>, vector<4x128xbf16>, vector<304x128xf32> -> vector<304x128xf32>
    %9 = arith.addf %3, %8 : vector<304x128xf32>
    %c0_9 = arith.constant 0 : index
    %c0_10 = arith.constant 0 : index
    %10 = vector.load %arg8[%c0_9, %c0_10] : memref<304x128xf32, #tpu.memory_space<vmem>>, vector<304x128xf32>
    tpu.vector_store %arg8[%c0_9, %c0_10], %9 {strides = array<i32>} : memref<304x128xf32, #tpu.memory_space<vmem>>, vector<304x128xf32>,
    %c1_i32 = arith.constant 1 : i32
    %11 = arith.cmpi eq, %arg3, %c1_i32 : i32
    %12 = arith.extui %11 : i1 to i32
    %c0_i32_11 = arith.constant 0 : i32
    %13 = arith.cmpi ne, %12, %c0_i32_11 : i32
    scf.if %13 {
      %c0_12 = arith.constant 0 : index
      %c0_13 = arith.constant 0 : index
      %14 = vector.load %arg8[%c0_12, %c0_13] : memref<304x128xf32, #tpu.memory_space<vmem>>, vector<304x128xf32>
      %c0_14 = arith.constant 0 : index
      %c0_15 = arith.constant 0 : index
      %15 = vector.load %arg6[%c0_14, %c0_15] : memref<1x128xf32, #tpu.memory_space<vmem>>, vector<1x128xf32>
      %16 = vector.broadcast %15 : vector<1x128xf32> to vector<304x128xf32>
      %17 = arith.addf %14, %16 : vector<304x128xf32>
      %c0_16 = arith.constant 0 : index
      %c0_17 = arith.constant 0 : index
      %c0_18 = arith.constant 0 : index
      %c0_19 = arith.constant 0 : index
      %18 = vector.load %arg7[%c0_16, %c0_17, %c0_18, %c0_19] : memref<1x1x304x128xf32, #tpu.memory_space<vmem>>, vector<1x1x304x128xf32>
      %19 = vector.shape_cast %18 : vector<1x1x304x128xf32> to vector<304x128xf32>
      %20 = vector.shape_cast %17 : vector<304x128xf32> to vector<1x1x304x128xf32>
      tpu.vector_store %arg7[%c0_16, %c0_17, %c0_18, %c0_19], %20 {strides = array<i32>} : memref<1x1x304x128xf32, #tpu.memory_space<vmem>>, vector<1x1x304x128xf32>,
    } else {
    }
    return
  }
  func.func @transform_0(%arg0: i32, %arg1: i32, %arg2: i32, %arg3: i32) -> (i32, i32, i32, i32) {
    %0 = arith.addi %arg1, %arg3 : i32
    %c0_i32 = arith.constant 0 : i32
    %c0_i32_0 = arith.constant 0 : i32
    return %arg0, %0, %arg2, %c0_i32 : i32, i32, i32, i32
  }
  func.func @transform_1(%arg0: i32, %arg1: i32, %arg2: i32, %arg3: i32) -> (i32, i32, i32) {
    %c0_i32 = arith.constant 0 : i32
    %c0_i32_0 = arith.constant 0 : i32
    %c0_i32_1 = arith.constant 0 : i32
    return %arg3, %c0_i32, %c0_i32_0 : i32, i32, i32
  }
  func.func @transform_2(%arg0: i32, %arg1: i32, %arg2: i32, %arg3: i32) -> (i32, i32) {
    %c0_i32 = arith.constant 0 : i32
    %c0_i32_0 = arith.constant 0 : i32
    %c0_i32_1 = arith.constant 0 : i32
    return %c0_i32, %c0_i32_0 : i32, i32
  }
  func.func @transform_3(%arg0: i32, %arg1: i32, %arg2: i32, %arg3: i32) -> (i32, i32, i32, i32) {
    %c0_i32 = arith.constant 0 : i32
    %c0_i32_0 = arith.constant 0 : i32
    return %arg0, %arg1, %arg2, %c0_i32 : i32, i32, i32, i32
  }
}

module attributes {stable_mosaic.version = 11 : i64} {
  func.func @_conv_gemm_kernel(%arg0: i32, %arg1: i32, %arg2: i32, %arg3: i32, %arg4: memref<1x1x304x16xbf16, #tpu.memory_space<vmem>>, %arg5: memref<1x16x128xbf16, #tpu.memory_space<vmem>>, %arg6: memref<1x128xf32, #tpu.memory_space<vmem>>, %arg7: memref<1x1x304x128xf32, #tpu.memory_space<vmem>>, %arg8: memref<304x128xf32, #tpu.memory_space<vmem>>) attributes {dimension_semantics = [#tpu.dimension_semantics<parallel>, #tpu.dimension_semantics<parallel>, #tpu.dimension_semantics<parallel>, #tpu.dimension_semantics<arbitrary>], iteration_bounds = array<i64: 2, 2, 1, 2>, scalar_prefetch = 0 : i64, scratch_operands = 1 : i64, tpu.core_type = #tpu.core_type<tc>, window_params = [{transform_indices = @transform_0, window_bounds = array<i64: 1, 1, 304, 16>}, {transform_indices = @transform_1, window_bounds = array<i64: 1, 16, 128>}, {pipeline_mode = #tpu.pipeline_mode<synchronous>, transform_indices = @transform_2, window_bounds = array<i64: 1, 128>}, {transform_indices = @transform_3, window_bounds = array<i64: 1, 1, 304, 128>}]} {
    %c0_i32 = arith.constant 0 : i32
    %0 = arith.cmpi eq, %arg3, %c0_i32 : i32
    %1 = arith.extui %0 : i1 to i32
    %c0_i32_0 = arith.constant 0 : i32
    %2 = arith.cmpi ne, %1, %c0_i32_0 : i32
    scf.if %2 {
      %cst_12 = arith.constant 0.000000e+00 : f32
      %14 = vector.broadcast %cst_12 : f32 to vector<304x128xf32>
      %c0_13 = arith.constant 0 : index
      %c0_14 = arith.constant 0 : index
      %15 = vector.load %arg8[%c0_13, %c0_14] : memref<304x128xf32, #tpu.memory_space<vmem>>, vector<304x128xf32>
      tpu.vector_store %arg8[%c0_13, %c0_14], %14 {strides = array<i32>} : memref<304x128xf32, #tpu.memory_space<vmem>>, vector<304x128xf32>,
    } else {
    }
    %c0 = arith.constant 0 : index
    %c0_1 = arith.constant 0 : index
    %3 = vector.load %arg8[%c0, %c0_1] : memref<304x128xf32, #tpu.memory_space<vmem>>, vector<304x128xf32>
    %c0_2 = arith.constant 0 : index
    %c0_3 = arith.constant 0 : index
    %c0_4 = arith.constant 0 : index
    %c0_5 = arith.constant 0 : index
    %4 = vector.load %arg4[%c0_2, %c0_3, %c0_4, %c0_5] : memref<1x1x304x16xbf16, #tpu.memory_space<vmem>>, vector<1x1x304x16xbf16>
    %5 = vector.shape_cast %4 : vector<1x1x304x16xbf16> to vector<304x16xbf16>
    %c0_6 = arith.constant 0 : index
    %c0_7 = arith.constant 0 : index
    %c0_8 = arith.constant 0 : index
    %6 = vector.load %arg5[%c0_6, %c0_7, %c0_8] : memref<1x16x128xbf16, #tpu.memory_space<vmem>>, vector<1x16x128xbf16>
    %7 = vector.shape_cast %6 : vector<1x16x128xbf16> to vector<16x128xbf16>
    %cst = arith.constant dense<0.000000e+00> : vector<304x128xf32>
    %8 = tpu.matmul %5, %7, %cst {dimension_numbers = #tpu.dot_dimension_numbers<[1], [0], [0], [1], [0, 0, 1, 1], [], []>} : vector<304x16xbf16>, vector<16x128xbf16>, vector<304x128xf32> -> vector<304x128xf32>
    %9 = arith.addf %3, %8 : vector<304x128xf32>
    %c0_9 = arith.constant 0 : index
    %c0_10 = arith.constant 0 : index
    %10 = vector.load %arg8[%c0_9, %c0_10] : memref<304x128xf32, #tpu.memory_space<vmem>>, vector<304x128xf32>
    tpu.vector_store %arg8[%c0_9, %c0_10], %9 {strides = array<i32>} : memref<304x128xf32, #tpu.memory_space<vmem>>, vector<304x128xf32>,
    %c1_i32 = arith.constant 1 : i32
    %11 = arith.cmpi eq, %arg3, %c1_i32 : i32
    %12 = arith.extui %11 : i1 to i32
    %c0_i32_11 = arith.constant 0 : i32
    %13 = arith.cmpi ne, %12, %c0_i32_11 : i32
    scf.if %13 {
      %c0_12 = arith.constant 0 : index
      %c0_13 = arith.constant 0 : index
      %14 = vector.load %arg8[%c0_12, %c0_13] : memref<304x128xf32, #tpu.memory_space<vmem>>, vector<304x128xf32>
      %c0_14 = arith.constant 0 : index
      %c0_15 = arith.constant 0 : index
      %15 = vector.load %arg6[%c0_14, %c0_15] : memref<1x128xf32, #tpu.memory_space<vmem>>, vector<1x128xf32>
      %16 = vector.broadcast %15 : vector<1x128xf32> to vector<304x128xf32>
      %17 = arith.addf %14, %16 : vector<304x128xf32>
      %c0_16 = arith.constant 0 : index
      %c0_17 = arith.constant 0 : index
      %c0_18 = arith.constant 0 : index
      %c0_19 = arith.constant 0 : index
      %18 = vector.load %arg7[%c0_16, %c0_17, %c0_18, %c0_19] : memref<1x1x304x128xf32, #tpu.memory_space<vmem>>, vector<1x1x304x128xf32>
      %19 = vector.shape_cast %18 : vector<1x1x304x128xf32> to vector<304x128xf32>
      %20 = vector.shape_cast %17 : vector<304x128xf32> to vector<1x1x304x128xf32>
      tpu.vector_store %arg7[%c0_16, %c0_17, %c0_18, %c0_19], %20 {strides = array<i32>} : memref<1x1x304x128xf32, #tpu.memory_space<vmem>>, vector<1x1x304x128xf32>,
    } else {
    }
    return
  }
  func.func @transform_0(%arg0: i32, %arg1: i32, %arg2: i32, %arg3: i32) -> (i32, i32, i32, i32) {
    %0 = arith.addi %arg1, %arg3 : i32
    %c0_i32 = arith.constant 0 : i32
    %c0_i32_0 = arith.constant 0 : i32
    return %arg0, %0, %arg2, %c0_i32 : i32, i32, i32, i32
  }
  func.func @transform_1(%arg0: i32, %arg1: i32, %arg2: i32, %arg3: i32) -> (i32, i32, i32) {
    %c0_i32 = arith.constant 0 : i32
    %c0_i32_0 = arith.constant 0 : i32
    %c0_i32_1 = arith.constant 0 : i32
    return %arg3, %c0_i32, %c0_i32_0 : i32, i32, i32
  }
  func.func @transform_2(%arg0: i32, %arg1: i32, %arg2: i32, %arg3: i32) -> (i32, i32) {
    %c0_i32 = arith.constant 0 : i32
    %c0_i32_0 = arith.constant 0 : i32
    %c0_i32_1 = arith.constant 0 : i32
    return %c0_i32, %c0_i32_0 : i32, i32
  }
  func.func @transform_3(%arg0: i32, %arg1: i32, %arg2: i32, %arg3: i32) -> (i32, i32, i32, i32) {
    %c0_i32 = arith.constant 0 : i32
    %c0_i32_0 = arith.constant 0 : i32
    return %arg0, %arg1, %arg2, %c0_i32 : i32, i32, i32, i32
  }
}

module attributes {stable_mosaic.version = 11 : i64} {
  func.func @_conv_gemm_kernel(%arg0: i32, %arg1: i32, %arg2: i32, %arg3: i32, %arg4: memref<1x1x304x8xbf16, #tpu.memory_space<vmem>>, %arg5: memref<1x8x128xbf16, #tpu.memory_space<vmem>>, %arg6: memref<1x128xf32, #tpu.memory_space<vmem>>, %arg7: memref<1x1x304x128xf32, #tpu.memory_space<vmem>>, %arg8: memref<304x128xf32, #tpu.memory_space<vmem>>) attributes {dimension_semantics = [#tpu.dimension_semantics<parallel>, #tpu.dimension_semantics<parallel>, #tpu.dimension_semantics<parallel>, #tpu.dimension_semantics<arbitrary>], iteration_bounds = array<i64: 2, 2, 1, 2>, scalar_prefetch = 0 : i64, scratch_operands = 1 : i64, tpu.core_type = #tpu.core_type<tc>, window_params = [{transform_indices = @transform_0, window_bounds = array<i64: 1, 1, 304, 8>}, {transform_indices = @transform_1, window_bounds = array<i64: 1, 8, 128>}, {pipeline_mode = #tpu.pipeline_mode<synchronous>, transform_indices = @transform_2, window_bounds = array<i64: 1, 128>}, {transform_indices = @transform_3, window_bounds = array<i64: 1, 1, 304, 128>}]} {
    %c0_i32 = arith.constant 0 : i32
    %0 = arith.cmpi eq, %arg3, %c0_i32 : i32
    %1 = arith.extui %0 : i1 to i32
    %c0_i32_0 = arith.constant 0 : i32
    %2 = arith.cmpi ne, %1, %c0_i32_0 : i32
    scf.if %2 {
      %cst_12 = arith.constant 0.000000e+00 : f32
      %14 = vector.broadcast %cst_12 : f32 to vector<304x128xf32>
      %c0_13 = arith.constant 0 : index
      %c0_14 = arith.constant 0 : index
      %15 = vector.load %arg8[%c0_13, %c0_14] : memref<304x128xf32, #tpu.memory_space<vmem>>, vector<304x128xf32>
      tpu.vector_store %arg8[%c0_13, %c0_14], %14 {strides = array<i32>} : memref<304x128xf32, #tpu.memory_space<vmem>>, vector<304x128xf32>,
    } else {
    }
    %c0 = arith.constant 0 : index
    %c0_1 = arith.constant 0 : index
    %3 = vector.load %arg8[%c0, %c0_1] : memref<304x128xf32, #tpu.memory_space<vmem>>, vector<304x128xf32>
    %c0_2 = arith.constant 0 : index
    %c0_3 = arith.constant 0 : index
    %c0_4 = arith.constant 0 : index
    %c0_5 = arith.constant 0 : index
    %4 = vector.load %arg4[%c0_2, %c0_3, %c0_4, %c0_5] : memref<1x1x304x8xbf16, #tpu.memory_space<vmem>>, vector<1x1x304x8xbf16>
    %5 = vector.shape_cast %4 : vector<1x1x304x8xbf16> to vector<304x8xbf16>
    %c0_6 = arith.constant 0 : index
    %c0_7 = arith.constant 0 : index
    %c0_8 = arith.constant 0 : index
    %6 = vector.load %arg5[%c0_6, %c0_7, %c0_8] : memref<1x8x128xbf16, #tpu.memory_space<vmem>>, vector<1x8x128xbf16>
    %7 = vector.shape_cast %6 : vector<1x8x128xbf16> to vector<8x128xbf16>
    %cst = arith.constant dense<0.000000e+00> : vector<304x128xf32>
    %8 = tpu.matmul %5, %7, %cst {dimension_numbers = #tpu.dot_dimension_numbers<[1], [0], [0], [1], [0, 0, 1, 1], [], []>} : vector<304x8xbf16>, vector<8x128xbf16>, vector<304x128xf32> -> vector<304x128xf32>
    %9 = arith.addf %3, %8 : vector<304x128xf32>
    %c0_9 = arith.constant 0 : index
    %c0_10 = arith.constant 0 : index
    %10 = vector.load %arg8[%c0_9, %c0_10] : memref<304x128xf32, #tpu.memory_space<vmem>>, vector<304x128xf32>
    tpu.vector_store %arg8[%c0_9, %c0_10], %9 {strides = array<i32>} : memref<304x128xf32, #tpu.memory_space<vmem>>, vector<304x128xf32>,
    %c1_i32 = arith.constant 1 : i32
    %11 = arith.cmpi eq, %arg3, %c1_i32 : i32
    %12 = arith.extui %11 : i1 to i32
    %c0_i32_11 = arith.constant 0 : i32
    %13 = arith.cmpi ne, %12, %c0_i32_11 : i32
    scf.if %13 {
      %c0_12 = arith.constant 0 : index
      %c0_13 = arith.constant 0 : index
      %14 = vector.load %arg8[%c0_12, %c0_13] : memref<304x128xf32, #tpu.memory_space<vmem>>, vector<304x128xf32>
      %c0_14 = arith.constant 0 : index
      %c0_15 = arith.constant 0 : index
      %15 = vector.load %arg6[%c0_14, %c0_15] : memref<1x128xf32, #tpu.memory_space<vmem>>, vector<1x128xf32>
      %16 = vector.broadcast %15 : vector<1x128xf32> to vector<304x128xf32>
      %17 = arith.addf %14, %16 : vector<304x128xf32>
      %c0_16 = arith.constant 0 : index
      %c0_17 = arith.constant 0 : index
      %c0_18 = arith.constant 0 : index
      %c0_19 = arith.constant 0 : index
      %18 = vector.load %arg7[%c0_16, %c0_17, %c0_18, %c0_19] : memref<1x1x304x128xf32, #tpu.memory_space<vmem>>, vector<1x1x304x128xf32>
      %19 = vector.shape_cast %18 : vector<1x1x304x128xf32> to vector<304x128xf32>
      %20 = vector.shape_cast %17 : vector<304x128xf32> to vector<1x1x304x128xf32>
      tpu.vector_store %arg7[%c0_16, %c0_17, %c0_18, %c0_19], %20 {strides = array<i32>} : memref<1x1x304x128xf32, #tpu.memory_space<vmem>>, vector<1x1x304x128xf32>,
    } else {
    }
    return
  }
  func.func @transform_0(%arg0: i32, %arg1: i32, %arg2: i32, %arg3: i32) -> (i32, i32, i32, i32) {
    %0 = arith.addi %arg1, %arg3 : i32
    %c0_i32 = arith.constant 0 : i32
    %c0_i32_0 = arith.constant 0 : i32
    return %arg0, %0, %arg2, %c0_i32 : i32, i32, i32, i32
  }
  func.func @transform_1(%arg0: i32, %arg1: i32, %arg2: i32, %arg3: i32) -> (i32, i32, i32) {
    %c0_i32 = arith.constant 0 : i32
    %c0_i32_0 = arith.constant 0 : i32
    %c0_i32_1 = arith.constant 0 : i32
    return %arg3, %c0_i32, %c0_i32_0 : i32, i32, i32
  }
  func.func @transform_2(%arg0: i32, %arg1: i32, %arg2: i32, %arg3: i32) -> (i32, i32) {
    %c0_i32 = arith.constant 0 : i32
    %c0_i32_0 = arith.constant 0 : i32
    %c0_i32_1 = arith.constant 0 : i32
    return %c0_i32, %c0_i32_0 : i32, i32
  }
  func.func @transform_3(%arg0: i32, %arg1: i32, %arg2: i32, %arg3: i32) -> (i32, i32, i32, i32) {
    %c0_i32 = arith.constant 0 : i32
    %c0_i32_0 = arith.constant 0 : i32
    return %arg0, %arg1, %arg2, %c0_i32 : i32, i32, i32, i32
  }
}

</mosaic_0001>

<bundles_post_ra>
// kernel: decoder_forward.31
= control target key start
LH: loop header
LB: loop body
LE: loop exit
PB: predicated region body
PF: predicated region fallthrough
CT: control target
= control target key end

     0   :  { %s693_s12 = smov 0   ;;  %s695_s13 = smov 0   ;;  %s784_s0 = inlined_call_operand.vmem [shape: bf16[2,4,16,36], index: 0, kind: input, shape index: {}]   ;;  %s785_s1 = inlined_call_operand.vmem [shape: bf16[3,36,128], index: 1, kind: input, shape index: {}]   ;;  %s786_s2 = inlined_call_operand.vmem [shape: f32[1,128], index: 2, kind: input, shape index: {}]   ;;  %s787_s3 = inlined_call_operand.vmem [shape: f32[2,2,16,128], index: 3, kind: output, shape index: {}]  }
   0x1   :  { %s697_s14 = smov 0   ;;  %s699_s15 = smov 0  }
   0x2   :  { %s701_s16 = smov 0   ;;  %s703_s17 = smov 0  }
   0x3   :  { %s705_s18 = smov 0  }
   0x4 LB: > { %s28_s19 = sadd.s32 1, %s656_s15  ;;  %s35_s20 = sadd.s32 1, %s660_s16  ;;  %s668_s18 = sphi %s705_s18, %s13_s18   ;;  %s664_s17 = sphi %s703_s17, %s795_s17   ;;  %s660_s16 = sphi %s701_s16, %s794_s16   ;;  %s656_s15 = sphi %s699_s15, %s793_s15   ;;  %s652_s14 = sphi %s697_s14, %s792_s14   ;;  %s648_s13 = sphi %s695_s13, %s791_s13   ;;  %s644_s12 = sphi %s693_s12, %s790_s12  }
   0x5   : > { %p29_p0 = scmp.ge.s32.totalorder %s28_s19, 3  ;;  %p518_p1 = scmp.ge.s32.totalorder %s668_s18, 1 }
   0x6   : > { %p194_p2 = scmp.lt.s32.totalorder %s668_s18, 13  ;;  %s39_s21 = sadd.s32 1, %s664_s17 }
   0x7   : > { %s797_s19 = smov (%p29_p0, %s28_s19), 0  ;;  %s799_s20 = smov (!%p29_p0, %s35_s20), %s660_s16 }
   0x8   : > { %p195_p3 = pnand %p518_p1, %p194_p2  ;;  %p37_p4 = scmp.ge.s32.totalorder %s799_s20, 2 }
   0x9   : > { %s240_s22 = sadd.s32 (!%p195_p3), %s644_s12, %s648_s13  ;;  %p242_p6 = scmp.lt.s32.totalorder (!%p195_p3), %s652_s14, 1 }
   0xa   : > { %s801_s20 = smov (%p37_p4, %s799_s20), 0  ;;  %s803_s21 = smov (!%p37_p4, %s39_s21), %s664_s17 }
   0xb   : > { %p41_p5 = scmp.ge.s32.totalorder %s803_s21, 2  ;;  %198 = sbr.rel (%p195_p3) target bundleno = 271 (0x10f), region = 32 }
   0xc   : > { %p244_p7 = scmp.lt.s32.totalorder (!%p195_p3), %s240_s22, 3  ;;  %p256_p8 = scmp.lt.s32.totalorder (!%p195_p3), %s644_s12, 2 }
   0xd   : > { %s805_s21 = smov (%p41_p5, %s803_s21), 0  ;;  %p264_p9 = scmp.lt.s32.totalorder (!%p195_p3), %s648_s13, 1 }
   0xe   : > { %788 = sst [smem:[#allocation3_spill]] %s805_s21  ;;  %p526_p10 = scmp.ne.s32.totalorder (!%p195_p3), %s644_s12, 0 }
  0x12   : > { %s807_s14 = smov (!%p242_p6, %s652_s14), 1  ;;  %s809_s22 = smov (!%p244_p7, %s240_s22), 3 }
  0x13   : > { %s520_s23 = sshll.u32 %s807_s14, 3  ;;  %s519_s24 = sshll.u32 %s809_s22, 1  ;;  %v670_v0 = vmov (!%p526_p10), 0.0  }
  0x14   : > { %s251_s25 = sadd.s32 %s520_s23, %s519_s24  ;;  %s524_s30 = sshll.u32 %s807_s14, 2  ;;  %280 = vst [vmem:[#allocation2] sm:$0xff] (!%p526_p10), %v670_v0  ;;  %281 = vst [vmem:[#allocation2 + $0x8] sm:$0xff] (!%p526_p10), %v670_v0 }
  0x15   : > { %s521_s26 = sshll.u32 %s251_s25, 2  ;;  %s811_s13 = smov (!%p264_p9, %s648_s13), 1 }
  0x16   : > { %s253_s29 = scalar_lea.vmem %s784_s0, %s521_s26  ;;  %s523_s6 = sshll.u32 %s811_s13, 1 }
  0x17   : > { %s257_s4 = scalar_select %p256_p8, %s644_s12, 2 }
  0x18   : > { %s271_s10 = sadd.s32 %s524_s30, %s523_s6  ;;  %279 = sbr.rel (%p526_p10) target bundleno = 31 (0x1f), region = 36 }
  0x19   : > { %s550_s5 = smul.u32 20, %s257_s4  ;;  %s525_s11 = sshll.u32 %s271_s10, 3 }
  0x1a   : > { %s754_s23 = scalar_lea.vmem %s787_s3, %s525_s11 }
  0x1b   : > { %s260_s9 = scalar_lea.vmem %s785_s1, %s550_s5 }
  0x1f PF: > { %v610_v1 = vld [vmem:[%s260_s9] sm:$0xff]   ;;  %v671_v2 = vmov 0.0   ;;  %v611_v3 = vld [vmem:[%s260_s9 + $0x8] sm:$0xff]   ;;  %v612_v4 = vld [vmem:[%s260_s9 + $0x10] ss:$0 sps:$4 sm:$0x33]  }
  0x20   : > { %540 = vmatprep.subr.bf16.mxu0 %v671_v2  ;;  %vm672_vm0 = vmmov 0   ;;  %vm315_vm1 = vcmask 1041408   ;;  %v613_v6 = vld [vmem:[%s253_s29] sm:$0xff]   ;;  %vm311_vm2 = vcmask 293888   ;;  %v283_v9 = vld [vmem:[#allocation2 + $0x8] sm:$0xff]  ;;  %p532_p11 = scmp.ne.s32.totalorder %s644_s12, 2 }
  0x21   : > { %541 = vmatpush3.bf16.msra.mxu0 %v610_v1  ;;  %546 = vmatprep.mubr.msk.bf16.mxu0 %vm672_vm0, %v671_v2  ;;  %v317_v5 = vsel %vm315_vm1, %v612_v4, 0  ;;  %v282_v7 = vld [vmem:[#allocation2] sm:$0xff] }
  0x22   : > { %542 = vmatprep.subr.bf16.mxu0 %v671_v2  ;;  %v533_v16 = vld [vmem:[%s786_s2] ss:$0 sm:$0xff] (!%p532_p11) }
  0x25   : > { %543 = vmatpush3.bf16.msra.mxu0 %v611_v3 }
  0x26   : > { %544 = vmatprep.subr.bf16.mxu0 %v671_v2 }
  0x29   : > { %545 = vmatpush3.bf16.msra.mxu0 %v317_v5 }
  0x2c   : > { %547 = vmatmul.mubr.msk.bf16.vlgmr.msra.gmra.mrb[0].mxu0 %vm311_vm2, %v613_v6 }
  0xfe   : > { %367 = sbr.rel (%p532_p11) target bundleno = 271 (0x10f), region = 40 }
  0xff   : > { %v353_v8 = vpop.f32.mrb[0].mxu0 }
 0x100   : > { %v360_v10 = vadd.f32 %v353_v8, %v282_v7  ;;  %v548_v11 = vpop.f32.mrb[1].mxu0 }
 0x101   : > { %v356_v12 = vpop.f32.mrb[2].mxu0 }
 0x102   : > { %362 = vst [vmem:[#allocation2] sm:$0xff] %v360_v10  ;;  %v361_v13 = vadd.f32 %v356_v12, %v283_v9  ;;  %v549_v14 = vpop.f32.mrb[3].mxu0 }
 0x104   : > { %363 = vst [vmem:[#allocation2 + $0x8] sm:$0xff] %v361_v13 }
 0x109   : > { %v368_v15 = vld [vmem:[#allocation2] sm:$0xff] }
 0x10a   : > { %v377_v18 = vadd.f32 %v533_v16, %v368_v15 }
 0x10b   : > { %v369_v17 = vld [vmem:[#allocation2 + $0x8] sm:$0xff] }
 0x10c   : > { %v378_v19 = vadd.f32 %v533_v16, %v369_v17  ;;  %379 = vst [vmem:[%s754_s23] sm:$0xff] %v377_v18 }
 0x10e   : > { %380 = vst [vmem:[%s754_s23 + $0x8] sm:$0xff] %v378_v19 }
 0x10f PF: > { %s13_s18 = sadd.s32 1, %s668_s18   ;;  %s789_s21 = sld [smem:[#allocation3_spill]] }
 0x110   : > { %p10_p12 = scmp.ge.s32.totalorder %s13_s18, 14   ;;  %s790_s12 = smov %s656_s15 }
 0x111   : > { %s791_s13 = smov %s660_s16  ;;  %s792_s14 = smov %s664_s17 }
 0x112   : > { %s793_s15 = smov %s797_s19  ;;  %s794_s16 = smov %s801_s20 }
 0x113   :  { %12 = sbr.rel (!%p10_p12) target bundleno = 4 (0x4), region = 73 }
 0x115   : > { %s795_s17 = smov %s789_s21 }

// kernel: decoder_forward.32
= control target key start
LH: loop header
LB: loop body
LE: loop exit
PB: predicated region body
PF: predicated region fallthrough
CT: control target
= control target key end

     0   :  { %s721_s12 = smov 0   ;;  %s723_s13 = smov 0   ;;  %s815_s0 = inlined_call_operand.vmem [shape: bf16[2,4,16,72], index: 0, kind: input, shape index: {}]   ;;  %s816_s1 = inlined_call_operand.vmem [shape: bf16[3,72,128], index: 1, kind: input, shape index: {}]   ;;  %s817_s2 = inlined_call_operand.vmem [shape: f32[1,128], index: 2, kind: input, shape index: {}]   ;;  %s818_s3 = inlined_call_operand.vmem [shape: f32[2,2,16,128], index: 3, kind: output, shape index: {}]  }
   0x1   :  { %s725_s14 = smov 0   ;;  %s727_s15 = smov 0  }
   0x2   :  { %s729_s16 = smov 0   ;;  %s731_s17 = smov 0  }
   0x3   :  { %s733_s18 = smov 0  }
   0x4 LB: > { %s28_s19 = sadd.s32 1, %s684_s15  ;;  %s35_s20 = sadd.s32 1, %s688_s16  ;;  %s696_s18 = sphi %s733_s18, %s13_s18   ;;  %s692_s17 = sphi %s731_s17, %s824_s17   ;;  %s688_s16 = sphi %s729_s16, %s823_s16   ;;  %s684_s15 = sphi %s727_s15, %s822_s15   ;;  %s680_s14 = sphi %s725_s14, %s821_s14   ;;  %s676_s13 = sphi %s723_s13, %s820_s13   ;;  %s672_s12 = sphi %s721_s12, %s819_s12  }
   0x5   : > { %p29_p0 = scmp.ge.s32.totalorder %s28_s19, 3  ;;  %p536_p1 = scmp.ge.s32.totalorder %s696_s18, 1 }
   0x6   : > { %p194_p2 = scmp.lt.s32.totalorder %s696_s18, 13  ;;  %s39_s21 = sadd.s32 1, %s692_s17 }
   0x7   : > { %s826_s19 = smov (%p29_p0, %s28_s19), 0  ;;  %s828_s20 = smov (!%p29_p0, %s35_s20), %s688_s16 }
   0x8   : > { %p195_p3 = pnand %p536_p1, %p194_p2  ;;  %p37_p4 = scmp.ge.s32.totalorder %s828_s20, 2 }
   0x9   : > { %s240_s22 = sadd.s32 (!%p195_p3), %s672_s12, %s676_s13  ;;  %p242_p6 = scmp.lt.s32.totalorder (!%p195_p3), %s680_s14, 1 }
   0xa   : > { %s830_s20 = smov (%p37_p4, %s828_s20), 0  ;;  %s832_s21 = smov (!%p37_p4, %s39_s21), %s692_s17 }
   0xb   : > { %p41_p5 = scmp.ge.s32.totalorder %s832_s21, 2  ;;  %198 = sbr.rel (%p195_p3) target bundleno = 281 (0x119), region = 32 }
   0xc   : > { %p244_p7 = scmp.lt.s32.totalorder (!%p195_p3), %s240_s22, 3  ;;  %p256_p8 = scmp.lt.s32.totalorder (!%p195_p3), %s672_s12, 2 }
   0xd   : > { %s834_s21 = smov (%p41_p5, %s832_s21), 0  ;;  %p264_p9 = scmp.lt.s32.totalorder (!%p195_p3), %s676_s13, 1 }
   0xe   : > { %p544_p10 = scmp.ne.s32.totalorder (!%p195_p3), %s672_s12, 0 }
  0x12   : > { %s836_s14 = smov (!%p242_p6, %s680_s14), 1  ;;  %s838_s22 = smov (!%p244_p7, %s240_s22), 3 }
  0x13   : > { %s538_s23 = sshll.u32 %s836_s14, 3  ;;  %s537_s24 = sshll.u32 %s838_s22, 1  ;;  %v698_v0 = vmov (!%p544_p10), 0.0  }
  0x14   : > { %s251_s25 = sadd.s32 %s538_s23, %s537_s24  ;;  %s542_s30 = sshll.u32 %s836_s14, 2  ;;  %280 = vst [vmem:[#allocation2] sm:$0xff] (!%p544_p10), %v698_v0  ;;  %281 = vst [vmem:[#allocation2 + $0x8] sm:$0xff] (!%p544_p10), %v698_v0 }
  0x15   : > { %s539_s26 = sshll.u32 %s251_s25, 2  ;;  %s840_s13 = smov (!%p264_p9, %s676_s13), 1 }
  0x16   : > { %s774_s29 = scalar_lea.vmem %s815_s0, %s539_s26  ;;  %s541_s6 = sshll.u32 %s840_s13, 1 }
  0x17   : > { %s257_s4 = scalar_select %p256_p8, %s672_s12, 2 }
  0x18   : > { %s271_s10 = sadd.s32 %s542_s30, %s541_s6  ;;  %279 = sbr.rel (%p544_p10) target bundleno = 31 (0x1f), region = 36 }
  0x19   : > { %s576_s5 = smul.u32 36, %s257_s4  ;;  %s543_s11 = sshll.u32 %s271_s10, 3 }
  0x1a   : > { %s784_s24 = scalar_lea.vmem %s818_s3, %s543_s11 }
  0x1b   : > { %s260_s9 = scalar_lea.vmem %s816_s1, %s576_s5 }
  0x1f PF: > { %v636_v1 = vld [vmem:[%s260_s9] sm:$0xff]   ;;  %v699_v2 = vmov 0.0   ;;  %v637_v3 = vld [vmem:[%s260_s9 + $0x8] sm:$0xff]   ;;  %vm700_vm0 = vmmov 0   ;;  %v638_v4 = vld [vmem:[%s260_s9 + $0x10] sm:$0xff]   ;;  %vm331_vm1 = vcmask 1043456  }
  0x20   : > { %562 = vmatprep.subr.bf16.mxu0 %v699_v2  ;;  %572 = vmatprep.mubr.msk.bf16.mxu0 %vm700_vm0, %v699_v2  ;;  %v639_v5 = vld [vmem:[%s260_s9 + $0x18] sm:$0xff]   ;;  %v640_v6 = vld [vmem:[%s260_s9 + $0x20] ss:$0 sps:$4 sm:$0xff]   ;;  %vm327_vm2 = vcmask 588800   ;;  %v283_v11 = vld [vmem:[#allocation2 + $0x8] sm:$0xff]  ;;  %p552_p11 = scmp.ne.s32.totalorder %s672_s12, 2 }
  0x21   : > { %563 = vmatpush3.bf16.msra.mxu0 %v636_v1  ;;  %v333_v7 = vsel %vm331_vm1, %v640_v6, 0  ;;  %v641_v8 = vld [vmem:[%s774_s29] sm:$0xff]  }
  0x22   : > { %564 = vmatprep.subr.bf16.mxu0 %v699_v2  ;;  %v282_v9 = vld [vmem:[#allocation2] sm:$0xff] }
  0x23   : > { %v553_v18 = vld [vmem:[%s817_s2] ss:$0 sm:$0xff] (!%p552_p11) }
  0x25   : > { %565 = vmatpush3.bf16.msra.mxu0 %v637_v3 }
  0x26   : > { %566 = vmatprep.subr.bf16.mxu0 %v699_v2 }
  0x29   : > { %567 = vmatpush3.bf16.msra.mxu0 %v638_v4 }
  0x2a   : > { %568 = vmatprep.subr.bf16.mxu0 %v699_v2 }
  0x2d   : > { %569 = vmatpush3.bf16.msra.mxu0 %v639_v5 }
  0x2e   : > { %570 = vmatprep.subr.bf16.mxu0 %v699_v2 }
  0x31   : > { %571 = vmatpush3.bf16.msra.mxu0 %v333_v7 }
  0x34   : > { %573 = vmatmul.mubr.msk.bf16.vlgmr.msra.gmra.mrb[0].mxu0 %vm327_vm2, %v641_v8 }
 0x106   : > { %383 = sbr.rel (%p552_p11) target bundleno = 281 (0x119), region = 40 }
 0x107   : > { %v369_v10 = vpop.f32.mrb[0].mxu0 }
 0x108   : > { %v376_v12 = vadd.f32 %v369_v10, %v282_v9  ;;  %v574_v13 = vpop.f32.mrb[1].mxu0 }
 0x109   : > { %v372_v14 = vpop.f32.mrb[2].mxu0 }
 0x10a   : > { %378 = vst [vmem:[#allocation2] sm:$0xff] %v376_v12  ;;  %v377_v15 = vadd.f32 %v372_v14, %v283_v11  ;;  %v575_v16 = vpop.f32.mrb[3].mxu0 }
 0x10c   : > { %379 = vst [vmem:[#allocation2 + $0x8] sm:$0xff] %v377_v15 }
 0x111   : > { %v384_v17 = vld [vmem:[#allocation2] sm:$0xff] }
 0x112   : > { %v393_v20 = vadd.f32 %v553_v18, %v384_v17 }
 0x113   : > { %v385_v19 = vld [vmem:[#allocation2 + $0x8] sm:$0xff] }
 0x114   : > { %v394_v21 = vadd.f32 %v553_v18, %v385_v19  ;;  %v395_v22 = vmax.f32 %v393_v20, 0.0 }
 0x116   : > { %v396_v23 = vmax.f32 %v394_v21, 0.0  ;;  %397 = vst [vmem:[%s784_s24] sm:$0xff] %v395_v22 }
 0x118   : > { %398 = vst [vmem:[%s784_s24 + $0x8] sm:$0xff] %v396_v23 }
 0x119 PF: > { %s13_s18 = sadd.s32 1, %s696_s18   ;;  %s819_s12 = smov %s684_s15 }
 0x11a   : > { %p10_p12 = scmp.ge.s32.totalorder %s13_s18, 14   ;;  %s820_s13 = smov %s688_s16 }
 0x11b   : > { %s821_s14 = smov %s692_s17  ;;  %s822_s15 = smov %s826_s19 }
 0x11c   : > { %s823_s16 = smov %s830_s20  ;;  %s824_s17 = smov %s834_s21 }
 0x11d   :  { %12 = sbr.rel (!%p10_p12) target bundleno = 4 (0x4), region = 73 }

// kernel: decoder_forward.33
= control target key start
LH: loop header
LB: loop body
LE: loop exit
PB: predicated region body
PF: predicated region fallthrough
CT: control target
= control target key end

     0   :  { %s734_s15 = smov 0   ;;  %s736_s16 = smov 0   ;;  %s794_s0 = inlined_call_operand.vmem [shape: bf16[2,2,16,4], index: 0, kind: input, shape index: {}]   ;;  %s795_s1 = inlined_call_operand.vmem [shape: bf16[1,4,128], index: 1, kind: input, shape index: {}]   ;;  %s796_s2 = inlined_call_operand.vmem [shape: f32[1,128], index: 2, kind: input, shape index: {}]   ;;  %s797_s3 = inlined_call_operand.vmem [shape: f32[2,2,16,128], index: 3, kind: input, shape index: {}]   ;;  %s798_s4 = inlined_call_operand.vmem [shape: f32[2,2,16,128], index: 4, kind: output, shape index: {}]  }
   0x1   :  { %s738_s17 = smov 0   ;;  %s740_s18 = smov 0  }
   0x2   :  { %s742_s19 = smov 0  }
   0x3 LB: > { %s36_s20 = sadd.s32 1, %s697_s17  ;;  %s40_s21 = sadd.s32 1, %s701_s18  ;;  %s705_s19 = sphi %s742_s19, %s14_s19   ;;  %s701_s18 = sphi %s740_s18, %s802_s18   ;;  %s697_s17 = sphi %s738_s17, %s801_s17   ;;  %s693_s16 = sphi %s736_s16, %s800_s16   ;;  %s689_s15 = sphi %s734_s15, %s799_s15  }
   0x4   : > { %p38_p0 = scmp.ge.s32.totalorder %s36_s20, 2  ;;  %p601_p1 = scmp.ge.s32.totalorder %s705_s19, 1 }
   0x5   : > { %p241_p2 = scmp.lt.s32.totalorder %s705_s19, 5 }
   0x6   : > { %s804_s20 = smov (%p38_p0, %s36_s20), 0  ;;  %s806_s21 = smov (!%p38_p0, %s40_s21), %s701_s18 }
   0x7   : > { %p242_p3 = pnand %p601_p1, %p241_p2  ;;  %p42_p4 = scmp.ge.s32.totalorder %s806_s21, 2 }
   0x8   : > { %v360_v0 = vld [vmem:[%s795_s1] sm:$0x3] (!%p242_p3)  ;;  %vm370_vm0 = vcmask (!%p242_p3), 1041408   ;;  %p303_p5 = scmp.lt.s32.totalorder (!%p242_p3), %s693_s16, 1  ;;  %v707_v1 = vmov (!%p242_p3), 0.0   ;;  %vm708_vm1 = vmmov (!%p242_p3), 0  }
   0x9   : > { %s808_s21 = smov (%p42_p4, %s806_s21), 0  ;;  %245 = sbr.rel (%p242_p3) target bundleno = 241 (0xf1), region = 36 }
   0xa   : > { %618 = vmatprep.subr.bf16.mxu0 (!%p242_p3), %v707_v1  ;;  %v372_v2 = vsel (!%p242_p3), %vm370_vm0, %v360_v0, 0  ;;  %620 = vmatprep.mubr.msk.bf16.mxu0 (!%p242_p3), %vm708_vm1, %v707_v1  ;;  %p305_p6 = scmp.lt.s32.totalorder (!%p242_p3), %s689_s15, 1  ;;  %vm366_vm2 = vcmask (!%p242_p3), 31744   ;;  %v613_v4 = vld [vmem:[%s796_s2] ss:$0 sm:$0xff] (!%p242_p3) }
   0xb   : > { %619 = vmatpush3.bf16.msra.mxu0 (!%p242_p3), %v372_v2 }
  0x10   : > { %s810_s16 = smov (!%p303_p5, %s693_s16), 1  ;;  %s812_s15 = smov (!%p305_p6, %s689_s15), 1 }
  0x11   : > { %s603_s24 = sshll.u32 %s810_s16, 2  ;;  %s602_s25 = sshll.u32 %s812_s15, 1 }
  0x12   : > { %s312_s26 = sadd.s32 %s603_s24, %s602_s25 }
  0x13   : > { %s604_s27 = sshll.u32 %s312_s26, 2  ;;  %s607_s5 = sshll.u32 %s312_s26, 3 }
  0x14   : > { %s314_s30 = scalar_lea.vmem %s794_s0, %s604_s27  ;;  %s333_s8 = scalar_lea.vmem %s797_s3, %s607_s5 }
  0x15   : > { %v666_v3 = vld [vmem:[%s314_s30] sm:$0xff]   ;;  %s347_s13 = scalar_lea.vmem %s798_s4, %s607_s5  ;;  %v434_v10 = vld [vmem:[%s333_s8 + $0x8] sm:$0xff] }
  0x16   : > { %621 = vmatmul.mubr.msk.bf16.vlgmr.msra.gmra.mrb[0].mxu0 %vm366_vm2, %v666_v3  ;;  %v433_v6 = vld [vmem:[%s333_s8] sm:$0xff] }
  0xe9   : > { %v408_v5 = vpop.f32.mrb[0].mxu0 }
  0xea   : > { %v431_v7 = vadd.f32 %v613_v4, %v408_v5  ;;  %v622_v8 = vpop.f32.mrb[1].mxu0 }
  0xeb   : > { %v411_v9 = vpop.f32.mrb[2].mxu0 }
  0xec   : > { %v435_v11 = vadd.f32 %v433_v6, %v431_v7  ;;  %v432_v12 = vadd.f32 %v613_v4, %v411_v9  ;;  %v623_v13 = vpop.f32.mrb[3].mxu0 }
  0xee   : > { %437 = vst [vmem:[%s347_s13] sm:$0xff] %v435_v11  ;;  %v436_v14 = vadd.f32 %v434_v10, %v432_v12 }
  0xf0   : > { %438 = vst [vmem:[%s347_s13 + $0x8] sm:$0xff] %v436_v14 }
  0xf1 PF: > { %s14_s19 = sadd.s32 1, %s705_s19   ;;  %s799_s15 = smov %s697_s17 }
  0xf2   : > { %p11_p7 = scmp.ge.s32.totalorder %s14_s19, 6   ;;  %s800_s16 = smov %s701_s18 }
  0xf3   : > { %s801_s17 = smov %s804_s20  ;;  %s802_s18 = smov %s808_s21 }
  0xf4   :  { %13 = sbr.rel (!%p11_p7) target bundleno = 3 (0x3), region = 80 }

// kernel: decoder_forward.35
= control target key start
LH: loop header
LB: loop body
LE: loop exit
PB: predicated region body
PF: predicated region fallthrough
CT: control target
= control target key end

     0   :  { %s736_s15 = smov 0   ;;  %s738_s16 = smov 0   ;;  %s796_s0 = inlined_call_operand.vmem [shape: bf16[2,2,16,4], index: 0, kind: input, shape index: {}]   ;;  %s797_s1 = inlined_call_operand.vmem [shape: bf16[1,4,128], index: 1, kind: input, shape index: {}]   ;;  %s798_s2 = inlined_call_operand.vmem [shape: f32[1,128], index: 2, kind: input, shape index: {}]   ;;  %s799_s3 = inlined_call_operand.vmem [shape: f32[2,2,16,128], index: 3, kind: input, shape index: {}]   ;;  %s800_s4 = inlined_call_operand.vmem [shape: f32[2,2,16,128], index: 4, kind: output, shape index: {}]  }
   0x1   :  { %s740_s17 = smov 0   ;;  %s742_s18 = smov 0  }
   0x2   :  { %s744_s19 = smov 0  }
   0x3 LB: > { %s36_s20 = sadd.s32 1, %s699_s17  ;;  %s40_s21 = sadd.s32 1, %s703_s18  ;;  %s707_s19 = sphi %s744_s19, %s14_s19   ;;  %s703_s18 = sphi %s742_s18, %s804_s18   ;;  %s699_s17 = sphi %s740_s17, %s803_s17   ;;  %s695_s16 = sphi %s738_s16, %s802_s16   ;;  %s691_s15 = sphi %s736_s15, %s801_s15  }
   0x4   : > { %p38_p0 = scmp.ge.s32.totalorder %s36_s20, 2  ;;  %p603_p1 = scmp.ge.s32.totalorder %s707_s19, 1 }
   0x5   : > { %p241_p2 = scmp.lt.s32.totalorder %s707_s19, 5 }
   0x6   : > { %s806_s20 = smov (%p38_p0, %s36_s20), 0  ;;  %s808_s21 = smov (!%p38_p0, %s40_s21), %s703_s18 }
   0x7   : > { %p242_p3 = pnand %p603_p1, %p241_p2  ;;  %p42_p4 = scmp.ge.s32.totalorder %s808_s21, 2 }
   0x8   : > { %v360_v0 = vld [vmem:[%s797_s1] sm:$0x3] (!%p242_p3)  ;;  %vm370_vm0 = vcmask (!%p242_p3), 1041408   ;;  %p303_p5 = scmp.lt.s32.totalorder (!%p242_p3), %s695_s16, 1  ;;  %v709_v1 = vmov (!%p242_p3), 0.0   ;;  %vm710_vm1 = vmmov (!%p242_p3), 0  }
   0x9   : > { %s810_s21 = smov (%p42_p4, %s808_s21), 0  ;;  %245 = sbr.rel (%p242_p3) target bundleno = 243 (0xf3), region = 36 }
   0xa   : > { %620 = vmatprep.subr.bf16.mxu0 (!%p242_p3), %v709_v1  ;;  %v372_v2 = vsel (!%p242_p3), %vm370_vm0, %v360_v0, 0  ;;  %622 = vmatprep.mubr.msk.bf16.mxu0 (!%p242_p3), %vm710_vm1, %v709_v1  ;;  %p305_p6 = scmp.lt.s32.totalorder (!%p242_p3), %s691_s15, 1  ;;  %vm366_vm2 = vcmask (!%p242_p3), 31744   ;;  %v615_v4 = vld [vmem:[%s798_s2] ss:$0 sm:$0xff] (!%p242_p3) }
   0xb   : > { %621 = vmatpush3.bf16.msra.mxu0 (!%p242_p3), %v372_v2 }
  0x10   : > { %s812_s16 = smov (!%p303_p5, %s695_s16), 1  ;;  %s814_s15 = smov (!%p305_p6, %s691_s15), 1 }
  0x11   : > { %s605_s24 = sshll.u32 %s812_s16, 2  ;;  %s604_s25 = sshll.u32 %s814_s15, 1 }
  0x12   : > { %s312_s26 = sadd.s32 %s605_s24, %s604_s25 }
  0x13   : > { %s606_s27 = sshll.u32 %s312_s26, 2  ;;  %s609_s5 = sshll.u32 %s312_s26, 3 }
  0x14   : > { %s314_s30 = scalar_lea.vmem %s796_s0, %s606_s27  ;;  %s333_s8 = scalar_lea.vmem %s799_s3, %s609_s5 }
  0x15   : > { %v668_v3 = vld [vmem:[%s314_s30] sm:$0xff]   ;;  %v434_v10 = vld [vmem:[%s333_s8 + $0x8] sm:$0xff]  ;;  %s347_s13 = scalar_lea.vmem %s800_s4, %s609_s5 }
  0x16   : > { %623 = vmatmul.mubr.msk.bf16.vlgmr.msra.gmra.mrb[0].mxu0 %vm366_vm2, %v668_v3  ;;  %v433_v6 = vld [vmem:[%s333_s8] sm:$0xff] }
  0xe9   : > { %v408_v5 = vpop.f32.mrb[0].mxu0 }
  0xea   : > { %v431_v7 = vadd.f32 %v615_v4, %v408_v5  ;;  %v624_v8 = vpop.f32.mrb[1].mxu0 }
  0xeb   : > { %v411_v9 = vpop.f32.mrb[2].mxu0 }
  0xec   : > { %v435_v11 = vadd.f32 %v433_v6, %v431_v7  ;;  %v432_v12 = vadd.f32 %v615_v4, %v411_v9  ;;  %v625_v13 = vpop.f32.mrb[3].mxu0 }
  0xee   : > { %v437_v14 = vmax.f32 %v435_v11, 0.0  ;;  %v436_v15 = vadd.f32 %v434_v10, %v432_v12 }
  0xf0   : > { %439 = vst [vmem:[%s347_s13] sm:$0xff] %v437_v14  ;;  %v438_v16 = vmax.f32 %v436_v15, 0.0 }
  0xf2   : > { %440 = vst [vmem:[%s347_s13 + $0x8] sm:$0xff] %v438_v16 }
  0xf3 PF: > { %s14_s19 = sadd.s32 1, %s707_s19   ;;  %s801_s15 = smov %s699_s17 }
  0xf4   : > { %p11_p7 = scmp.ge.s32.totalorder %s14_s19, 6   ;;  %s802_s16 = smov %s703_s18 }
  0xf5   : > { %s803_s17 = smov %s806_s20  ;;  %s804_s18 = smov %s810_s21 }
  0xf6   :  { %13 = sbr.rel (!%p11_p7) target bundleno = 3 (0x3), region = 80 }

// kernel: decoder_forward.36
= control target key start
LH: loop header
LB: loop body
LE: loop exit
PB: predicated region body
PF: predicated region fallthrough
CT: control target
= control target key end

     0   :  { %s683_s12 = smov 0   ;;  %s685_s13 = smov 0   ;;  %s774_s0 = inlined_call_operand.vmem [shape: bf16[2,4,16,32], index: 0, kind: input, shape index: {}]   ;;  %s775_s1 = inlined_call_operand.vmem [shape: bf16[3,32,128], index: 1, kind: input, shape index: {}]   ;;  %s776_s2 = inlined_call_operand.vmem [shape: f32[1,128], index: 2, kind: input, shape index: {}]   ;;  %s777_s3 = inlined_call_operand.vmem [shape: f32[2,2,16,128], index: 3, kind: output, shape index: {}]  }
   0x1   :  { %s687_s14 = smov 0   ;;  %s689_s15 = smov 0  }
   0x2   :  { %s691_s16 = smov 0   ;;  %s693_s17 = smov 0  }
   0x3   :  { %s695_s18 = smov 0  }
   0x4 LB: > { %s28_s19 = sadd.s32 1, %s646_s15  ;;  %s35_s20 = sadd.s32 1, %s650_s16  ;;  %s658_s18 = sphi %s695_s18, %s13_s18   ;;  %s654_s17 = sphi %s693_s17, %s785_s17   ;;  %s650_s16 = sphi %s691_s16, %s784_s16   ;;  %s646_s15 = sphi %s689_s15, %s783_s15   ;;  %s642_s14 = sphi %s687_s14, %s782_s14   ;;  %s638_s13 = sphi %s685_s13, %s781_s13   ;;  %s634_s12 = sphi %s683_s12, %s780_s12  }
   0x5   : > { %p29_p0 = scmp.ge.s32.totalorder %s28_s19, 3  ;;  %p512_p1 = scmp.ge.s32.totalorder %s658_s18, 1 }
   0x6   : > { %p194_p2 = scmp.lt.s32.totalorder %s658_s18, 13  ;;  %s39_s21 = sadd.s32 1, %s654_s17 }
   0x7   : > { %s787_s19 = smov (%p29_p0, %s28_s19), 0  ;;  %s789_s20 = smov (!%p29_p0, %s35_s20), %s650_s16 }
   0x8   : > { %p195_p3 = pnand %p512_p1, %p194_p2  ;;  %p37_p4 = scmp.ge.s32.totalorder %s789_s20, 2 }
   0x9   : > { %s240_s22 = sadd.s32 (!%p195_p3), %s634_s12, %s638_s13  ;;  %p242_p6 = scmp.lt.s32.totalorder (!%p195_p3), %s642_s14, 1 }
   0xa   : > { %s791_s20 = smov (%p37_p4, %s789_s20), 0  ;;  %s793_s21 = smov (!%p37_p4, %s39_s21), %s654_s17 }
   0xb   : > { %p41_p5 = scmp.ge.s32.totalorder %s793_s21, 2  ;;  %198 = sbr.rel (%p195_p3) target bundleno = 269 (0x10d), region = 32 }
   0xc   : > { %p244_p7 = scmp.lt.s32.totalorder (!%p195_p3), %s240_s22, 3  ;;  %p256_p8 = scmp.lt.s32.totalorder (!%p195_p3), %s634_s12, 2 }
   0xd   : > { %s795_s21 = smov (%p41_p5, %s793_s21), 0  ;;  %p264_p9 = scmp.lt.s32.totalorder (!%p195_p3), %s638_s13, 1 }
   0xe   : > { %778 = sst [smem:[#allocation3_spill]] %s795_s21  ;;  %p521_p10 = scmp.ne.s32.totalorder (!%p195_p3), %s634_s12, 0 }
  0x12   : > { %s797_s14 = smov (!%p242_p6, %s642_s14), 1  ;;  %s799_s22 = smov (!%p244_p7, %s240_s22), 3 }
  0x13   : > { %s514_s23 = sshll.u32 %s797_s14, 3  ;;  %s513_s24 = sshll.u32 %s799_s22, 1  ;;  %v660_v0 = vmov (!%p521_p10), 0.0  }
  0x14   : > { %s251_s25 = sadd.s32 %s514_s23, %s513_s24  ;;  %s519_s30 = sshll.u32 %s797_s14, 2  ;;  %280 = vst [vmem:[#allocation2] sm:$0xff] (!%p521_p10), %v660_v0  ;;  %281 = vst [vmem:[#allocation2 + $0x8] sm:$0xff] (!%p521_p10), %v660_v0 }
  0x15   : > { %s515_s26 = sshll.u32 %s251_s25, 2  ;;  %s801_s13 = smov (!%p264_p9, %s638_s13), 1 }
  0x16   : > { %s253_s29 = scalar_lea.vmem %s774_s0, %s515_s26  ;;  %s518_s9 = sshll.u32 %s801_s13, 1 }
  0x17   : > { %s257_s4 = scalar_select %p256_p8, %s634_s12, 2 }
  0x18   : > { %s271_s10 = sadd.s32 %s519_s30, %s518_s9  ;;  %279 = sbr.rel (%p521_p10) target bundleno = 31 (0x1f), region = 36 }
  0x19   : > { %s530_s5 = sshll.u32 %s257_s4, 4  ;;  %s520_s11 = sshll.u32 %s271_s10, 3 }
  0x1a   : > { %s260_s8 = scalar_lea.vmem %s775_s1, %s530_s5  ;;  %s744_s23 = scalar_lea.vmem %s777_s3, %s520_s11 }
  0x1f PF: > { %v601_v1 = vld [vmem:[%s260_s8] sm:$0xff]   ;;  %v661_v2 = vmov 0.0   ;;  %v602_v3 = vld [vmem:[%s260_s8 + $0x8] sm:$0xff]   ;;  %vm662_vm0 = vmmov 0   ;;  %vm307_vm1 = vcmask 261120   ;;  %p526_p11 = scmp.ne.s32.totalorder %s634_s12, 2 }
  0x20   : > { %534 = vmatprep.subr.bf16.mxu0 %v661_v2  ;;  %538 = vmatprep.mubr.msk.bf16.mxu0 %vm662_vm0, %v661_v2  ;;  %v603_v4 = vld [vmem:[%s253_s29] sm:$0xff]   ;;  %v283_v7 = vld [vmem:[#allocation2 + $0x8] sm:$0xff] }
  0x21   : > { %535 = vmatpush3.bf16.msra.mxu0 %v601_v1  ;;  %v282_v5 = vld [vmem:[#allocation2] sm:$0xff] }
  0x22   : > { %536 = vmatprep.subr.bf16.mxu0 %v661_v2  ;;  %v527_v14 = vld [vmem:[%s776_s2] ss:$0 sm:$0xff] (!%p526_p11) }
  0x25   : > { %537 = vmatpush3.bf16.msra.mxu0 %v602_v3 }
  0x28   : > { %539 = vmatmul.mubr.msk.bf16.vlgmr.msra.gmra.mrb[0].mxu0 %vm307_vm1, %v603_v4 }
  0xfa   : > { %359 = sbr.rel (%p526_p11) target bundleno = 269 (0x10d), region = 40 }
  0xfb   : > { %v345_v6 = vpop.f32.mrb[0].mxu0 }
  0xfc   : > { %v352_v8 = vadd.f32 %v345_v6, %v282_v5  ;;  %v540_v9 = vpop.f32.mrb[1].mxu0 }
  0xfd   : > { %v348_v10 = vpop.f32.mrb[2].mxu0 }
  0xfe   : > { %354 = vst [vmem:[#allocation2] sm:$0xff] %v352_v8  ;;  %v353_v11 = vadd.f32 %v348_v10, %v283_v7  ;;  %v541_v12 = vpop.f32.mrb[3].mxu0 }
 0x100   : > { %355 = vst [vmem:[#allocation2 + $0x8] sm:$0xff] %v353_v11 }
 0x105   : > { %v360_v13 = vld [vmem:[#allocation2] sm:$0xff] }
 0x106   : > { %v369_v16 = vadd.f32 %v527_v14, %v360_v13 }
 0x107   : > { %v361_v15 = vld [vmem:[#allocation2 + $0x8] sm:$0xff] }
 0x108   : > { %v370_v17 = vadd.f32 %v527_v14, %v361_v15  ;;  %v371_v18 = vmax.f32 %v369_v16, 0.0 }
 0x10a   : > { %v372_v19 = vmax.f32 %v370_v17, 0.0  ;;  %373 = vst [vmem:[%s744_s23] sm:$0xff] %v371_v18 }
 0x10c   : > { %374 = vst [vmem:[%s744_s23 + $0x8] sm:$0xff] %v372_v19 }
 0x10d PF: > { %s13_s18 = sadd.s32 1, %s658_s18   ;;  %s779_s21 = sld [smem:[#allocation3_spill]] }
 0x10e   : > { %p10_p12 = scmp.ge.s32.totalorder %s13_s18, 14   ;;  %s780_s12 = smov %s646_s15 }
 0x10f   : > { %s781_s13 = smov %s650_s16  ;;  %s782_s14 = smov %s654_s17 }
 0x110   : > { %s783_s15 = smov %s787_s19  ;;  %s784_s16 = smov %s791_s20 }
 0x111   :  { %12 = sbr.rel (!%p10_p12) target bundleno = 4 (0x4), region = 73 }
 0x113   : > { %s785_s17 = smov %s779_s21 }

// kernel: decoder_forward.38
= control target key start
LH: loop header
LB: loop body
LE: loop exit
PB: predicated region body
PF: predicated region fallthrough
CT: control target
= control target key end

     0   :  { %s705_s12 = smov 0   ;;  %s707_s13 = smov 0   ;;  %s797_s0 = inlined_call_operand.vmem [shape: bf16[2,4,24,32], index: 0, kind: input, shape index: {}]   ;;  %s798_s1 = inlined_call_operand.vmem [shape: bf16[3,32,128], index: 1, kind: input, shape index: {}]   ;;  %s799_s2 = inlined_call_operand.vmem [shape: f32[1,128], index: 2, kind: input, shape index: {}]   ;;  %s800_s3 = inlined_call_operand.vmem [shape: f32[2,2,24,128], index: 3, kind: output, shape index: {}]  }
   0x1   :  { %s709_s14 = smov 0   ;;  %s711_s15 = smov 0  }
   0x2   :  { %s713_s16 = smov 0   ;;  %s715_s17 = smov 0  }
   0x3   :  { %s717_s18 = smov 0  }
   0x4 LB: > { %s28_s19 = sadd.s32 1, %s670_s15  ;;  %s35_s20 = sadd.s32 1, %s674_s16  ;;  %s682_s18 = sphi %s717_s18, %s13_s18   ;;  %s678_s17 = sphi %s715_s17, %s810_s17   ;;  %s674_s16 = sphi %s713_s16, %s809_s16   ;;  %s670_s15 = sphi %s711_s15, %s808_s15   ;;  %s666_s14 = sphi %s709_s14, %s807_s14   ;;  %s662_s13 = sphi %s707_s13, %s806_s13   ;;  %s658_s12 = sphi %s705_s12, %s805_s12  }
   0x5   : > { %p29_p0 = scmp.ge.s32.totalorder %s28_s19, 3  ;;  %p534_p1 = scmp.ge.s32.totalorder %s682_s18, 1 }
   0x6   : > { %p194_p2 = scmp.lt.s32.totalorder %s682_s18, 13  ;;  %s39_s21 = sadd.s32 1, %s678_s17 }
   0x7   : > { %s812_s19 = smov (%p29_p0, %s28_s19), 0  ;;  %s814_s20 = smov (!%p29_p0, %s35_s20), %s674_s16 }
   0x8   : > { %p195_p3 = pnand %p534_p1, %p194_p2  ;;  %p37_p4 = scmp.ge.s32.totalorder %s814_s20, 2 }
   0x9   : > { %s240_s22 = sadd.s32 (!%p195_p3), %s658_s12, %s662_s13  ;;  %p242_p6 = scmp.lt.s32.totalorder (!%p195_p3), %s666_s14, 1 }
   0xa   : > { %s816_s20 = smov (%p37_p4, %s814_s20), 0  ;;  %s818_s21 = smov (!%p37_p4, %s39_s21), %s678_s17 }
   0xb   : > { %801 = sst [smem:[#allocation3_spill]] %s816_s20  ;;  %p41_p5 = scmp.ge.s32.totalorder %s818_s21, 2 }
   0xc   : > { %198 = sbr.rel (%p195_p3) target bundleno = 273 (0x111), region = 32  ;;  %p244_p7 = scmp.lt.s32.totalorder (!%p195_p3), %s240_s22, 3 }
   0xd   : > { %s820_s21 = smov (%p41_p5, %s818_s21), 0  ;;  %p256_p8 = scmp.lt.s32.totalorder (!%p195_p3), %s658_s12, 2 }
   0xe   : > { %802 = sst [smem:[#allocation4_spill]] %s820_s21  ;;  %p264_p9 = scmp.lt.s32.totalorder (!%p195_p3), %s662_s13, 1 }
   0xf   : > { %p539_p10 = scmp.ne.s32.totalorder (!%p195_p3), %s658_s12, 0 }
  0x13   : > { %s822_s14 = smov (!%p242_p6, %s666_s14), 1  ;;  %s824_s22 = smov (!%p244_p7, %s240_s22), 3 }
  0x14   : > { %s564_s23 = smul.u32 12, %s822_s14  ;;  %s826_s13 = smov (!%p264_p9, %s662_s13), 1  ;;  %v684_v0 = vmov (!%p539_p10), 0.0  }
  0x15   : > { %s563_s24 = smul.u32 3, %s824_s22  ;;  %280 = vst [vmem:[#allocation2] sm:$0xff] (!%p539_p10), %v684_v0  ;;  %281 = vst [vmem:[#allocation2 + $0x8] sm:$0xff] (!%p539_p10), %v684_v0 }
  0x16   : > { %s257_s25 = scalar_select %p256_p8, %s658_s12, 2 }
  0x17   : > { %s251_s26 = sadd.s32 %s564_s23, %s563_s24  ;;  %s566_s27 = smul.u32 6, %s822_s14  ;;  %282 = vst [vmem:[#allocation2 + $0x10] sm:$0xff] (!%p539_p10), %v684_v0 }
  0x18   : > { %s535_s28 = sshll.u32 %s251_s26, 2  ;;  %s550_s29 = sshll.u32 %s257_s25, 4 }
  0x19   : > { %s253_s5 = scalar_lea.vmem %s797_s0, %s535_s28  ;;  %s260_s8 = scalar_lea.vmem %s798_s1, %s550_s29 }
  0x1a   : > { %s565_s9 = smul.u32 3, %s826_s13 }
  0x1b   : > { %279 = sbr.rel (%p539_p10) target bundleno = 34 (0x22), region = 36 }
  0x1c   : > { %s271_s10 = sadd.s32 %s566_s27, %s565_s9 }
  0x1d   : > { %s538_s11 = sshll.u32 %s271_s10, 3 }
  0x1e   : > { %s766_s20 = scalar_lea.vmem %s800_s3, %s538_s11 }
  0x22 PF: > { %v624_v1 = vld [vmem:[%s260_s8] sm:$0xff]   ;;  %v625_v2 = vld [vmem:[%s260_s8 + $0x8] sm:$0xff]   ;;  %vm313_vm0 = vcmask 261120   ;;  %v285_v5 = vld [vmem:[#allocation2 + $0x10] sm:$0xff]  ;;  %p546_p11 = scmp.ne.s32.totalorder %s658_s12, 2 }
  0x23   : > { %555 = vmatprep.subr.bf16.mxu0 %v624_v1  ;;  %v626_v3 = vld [vmem:[%s253_s5] sm:$0xff]   ;;  %v627_v4 = vld [vmem:[%s253_s5 + $0x8] ss:$0 sps:$4 sm:$0xff]  }
  0x24   : > { %556 = vmatpush3.bf16.msra.mxu0 %v624_v1  ;;  %559 = vmatprep.mubr.msk.bf16.mxu0 %vm313_vm0, %v626_v3  ;;  %v283_v6 = vld [vmem:[#allocation2] sm:$0xff]  ;;  %v284_v10 = vld [vmem:[#allocation2 + $0x8] sm:$0xff] }
  0x25   : > { %557 = vmatprep.subr.bf16.mxu0 %v625_v2  ;;  %v547_v16 = vld [vmem:[%s799_s2] ss:$0 sm:$0xff] (!%p546_p11) }
  0x28   : > { %558 = vmatpush3.bf16.msra.mxu0 %v625_v2 }
  0x2b   : > { %560 = vmatmul.mubr.msk.bf16.vlgmr.msra.gmra.mrb[0].mxu0 %vm313_vm0, %v627_v4 }
  0xfe   : > { %v561_v7 = vpop.f32.mrb[0].mxu0  ;;  %377 = sbr.rel (%p546_p11) target bundleno = 273 (0x111), region = 40 }
  0xff   : > { %v370_v8 = vadd.f32 %v561_v7, %v285_v5  ;;  %v354_v9 = vpop.f32.mrb[1].mxu0 }
 0x100   : > { %v368_v11 = vadd.f32 %v354_v9, %v283_v6  ;;  %v562_v12 = vpop.f32.mrb[2].mxu0 }
 0x101   : > { %373 = vst [vmem:[#allocation2 + $0x10] sm:$0xff] %v370_v8  ;;  %v357_v13 = vpop.f32.mrb[3].mxu0 }
 0x102   : > { %371 = vst [vmem:[#allocation2] sm:$0xff] %v368_v11  ;;  %v369_v14 = vadd.f32 %v357_v13, %v284_v10 }
 0x104   : > { %372 = vst [vmem:[#allocation2 + $0x8] sm:$0xff] %v369_v14 }
 0x108   : > { %v380_v20 = vld [vmem:[#allocation2 + $0x10] sm:$0xff] }
 0x109   : > { %v378_v15 = vld [vmem:[#allocation2] sm:$0xff]  ;;  %v390_v21 = vadd.f32 %v547_v16, %v380_v20 }
 0x10a   : > { %v388_v18 = vadd.f32 %v547_v16, %v378_v15 }
 0x10b   : > { %v379_v17 = vld [vmem:[#allocation2 + $0x8] sm:$0xff]  ;;  %v393_v24 = vmax.f32 %v390_v21, 0.0 }
 0x10c   : > { %v389_v19 = vadd.f32 %v547_v16, %v379_v17  ;;  %v391_v22 = vmax.f32 %v388_v18, 0.0 }
 0x10d   : > { %396 = vst [vmem:[%s766_s20 + $0x10] sm:$0xff] %v393_v24 }
 0x10e   : > { %v392_v23 = vmax.f32 %v389_v19, 0.0  ;;  %394 = vst [vmem:[%s766_s20] sm:$0xff] %v391_v22 }
 0x110   : > { %395 = vst [vmem:[%s766_s20 + $0x8] sm:$0xff] %v392_v23 }
 0x111 PF: > { %s13_s18 = sadd.s32 1, %s682_s18   ;;  %s803_s21 = sld [smem:[#allocation3_spill]] }
 0x112   : > { %p10_p12 = scmp.ge.s32.totalorder %s13_s18, 14   ;;  %s804_s23 = sld [smem:[#allocation4_spill]] }
 0x113   : > { %s805_s12 = smov %s670_s15  ;;  %s806_s13 = smov %s674_s16 }
 0x114   : > { %s807_s14 = smov %s678_s17  ;;  %s808_s15 = smov %s812_s19 }
 0x115   :  { %12 = sbr.rel (!%p10_p12) target bundleno = 4 (0x4), region = 73 }
 0x117   : > { %s809_s16 = smov %s803_s21 }
 0x118   : > { %s810_s17 = smov %s804_s23 }

// kernel: decoder_forward.41
= control target key start
LH: loop header
LB: loop body
LE: loop exit
PB: predicated region body
PF: predicated region fallthrough
CT: control target
= control target key end

     0   :  { %s834_s12 = smov 0   ;;  %s836_s13 = smov 0   ;;  %s944_s0 = inlined_call_operand.vmem [shape: bf16[2,4,72,32], index: 0, kind: input, shape index: {}]   ;;  %s945_s1 = inlined_call_operand.vmem [shape: bf16[3,32,128], index: 1, kind: input, shape index: {}]   ;;  %s946_s2 = inlined_call_operand.vmem [shape: f32[1,128], index: 2, kind: input, shape index: {}]   ;;  %s947_s3 = inlined_call_operand.vmem [shape: f32[2,2,72,128], index: 3, kind: output, shape index: {}]  }
   0x1   :  { %s838_s14 = smov 0   ;;  %s840_s15 = smov 0  }
   0x2   :  { %s842_s16 = smov 0   ;;  %s844_s17 = smov 0  }
   0x3   :  { %s846_s18 = smov 0  }
   0x4 LB: > { %s28_s19 = sadd.s32 1, %s797_s15  ;;  %s35_s20 = sadd.s32 1, %s801_s16  ;;  %s809_s18 = sphi %s846_s18, %s13_s18   ;;  %s805_s17 = sphi %s844_s17, %s955_s17   ;;  %s801_s16 = sphi %s842_s16, %s954_s16   ;;  %s797_s15 = sphi %s840_s15, %s953_s15   ;;  %s793_s14 = sphi %s838_s14, %s952_s14   ;;  %s789_s13 = sphi %s836_s13, %s951_s13   ;;  %s785_s12 = sphi %s834_s12, %s950_s12  }
   0x5   : > { %p29_p0 = scmp.ge.s32.totalorder %s28_s19, 3  ;;  %p627_p1 = scmp.ge.s32.totalorder %s809_s18, 1 }
   0x6   : > { %p194_p2 = scmp.lt.s32.totalorder %s809_s18, 13  ;;  %s39_s21 = sadd.s32 1, %s805_s17 }
   0x7   : > { %s957_s19 = smov (%p29_p0, %s28_s19), 0  ;;  %s959_s20 = smov (!%p29_p0, %s35_s20), %s801_s16 }
   0x8   : > { %p195_p3 = pnand %p627_p1, %p194_p2  ;;  %p37_p4 = scmp.ge.s32.totalorder %s959_s20, 2 }
   0x9   : > { %s240_s22 = sadd.s32 (!%p195_p3), %s785_s12, %s789_s13  ;;  %p242_p6 = scmp.lt.s32.totalorder (!%p195_p3), %s793_s14, 1 }
   0xa   : > { %s961_s20 = smov (%p37_p4, %s959_s20), 0  ;;  %s963_s21 = smov (!%p37_p4, %s39_s21), %s805_s17 }
   0xb   : > { %p41_p5 = scmp.ge.s32.totalorder %s963_s21, 2  ;;  %198 = sbr.rel (%p195_p3) target bundleno = 285 (0x11d), region = 32 }
   0xc   : > { %p244_p7 = scmp.lt.s32.totalorder (!%p195_p3), %s240_s22, 3  ;;  %p256_p8 = scmp.lt.s32.totalorder (!%p195_p3), %s785_s12, 2 }
   0xd   : > { %s965_s21 = smov (%p41_p5, %s963_s21), 0  ;;  %p264_p9 = scmp.lt.s32.totalorder (!%p195_p3), %s789_s13, 1 }
   0xe   : > { %948 = sst [smem:[#allocation3_spill]] %s965_s21  ;;  %p632_p10 = scmp.ne.s32.totalorder (!%p195_p3), %s785_s12, 0 }
  0x12   : > { %s967_s14 = smov (!%p242_p6, %s793_s14), 1  ;;  %s969_s22 = smov (!%p244_p7, %s240_s22), 3 }
  0x13   : > { %s686_s23 = smul.u32 36, %s967_s14  ;;  %s971_s13 = smov (!%p264_p9, %s789_s13), 1  ;;  %v811_v0 = vmov (!%p632_p10), 0.0  }
  0x14   : > { %s685_s24 = smul.u32 9, %s969_s22  ;;  %280 = vst [vmem:[#allocation2] sm:$0xff] (!%p632_p10), %v811_v0  ;;  %281 = vst [vmem:[#allocation2 + $0x8] sm:$0xff] (!%p632_p10), %v811_v0 }
  0x15   : > { %s257_s25 = scalar_select %p256_p8, %s785_s12, 2 }
  0x16   : > { %s251_s26 = sadd.s32 %s686_s23, %s685_s24  ;;  %s688_s27 = smul.u32 18, %s967_s14  ;;  %282 = vst [vmem:[#allocation2 + $0x10] sm:$0xff] (!%p632_p10), %v811_v0  ;;  %283 = vst [vmem:[#allocation2 + $0x18] sm:$0xff] (!%p632_p10), %v811_v0 }
  0x17   : > { %s628_s28 = sshll.u32 %s251_s26, 2  ;;  %s649_s29 = sshll.u32 %s257_s25, 4  ;;  %284 = vst [vmem:[#allocation2 + $0x20] sm:$0xff] (!%p632_p10), %v811_v0  ;;  %285 = vst [vmem:[#allocation2 + $0x28] sm:$0xff] (!%p632_p10), %v811_v0 }
  0x18   : > { %s888_s5 = scalar_lea.vmem %s944_s0, %s628_s28  ;;  %s260_s8 = scalar_lea.vmem %s945_s1, %s649_s29  ;;  %286 = vst [vmem:[#allocation2 + $0x30] sm:$0xff] (!%p632_p10), %v811_v0  ;;  %287 = vst [vmem:[#allocation2 + $0x38] sm:$0xff] (!%p632_p10), %v811_v0 }
  0x19   : > { %s687_s9 = smul.u32 9, %s971_s13  ;;  %288 = vst [vmem:[#allocation2 + $0x40] sm:$0xff] (!%p632_p10), %v811_v0 }
  0x1a   : > { %279 = sbr.rel (%p632_p10) target bundleno = 33 (0x21), region = 36 }
  0x1b   : > { %s271_s10 = sadd.s32 %s688_s27, %s687_s9 }
  0x1c   : > { %s631_s11 = sshll.u32 %s271_s10, 3 }
  0x1d   : > { %s897_s23 = scalar_lea.vmem %s947_s3, %s631_s11 }
  0x21 PF: > { %v748_v1 = vld [vmem:[%s260_s8] sm:$0xff]   ;;  %v812_v2 = vmov 0.0   ;;  %v749_v3 = vld [vmem:[%s260_s8 + $0x8] sm:$0xff]   ;;  %vm813_vm0 = vmmov 0   ;;  %vm346_vm1 = vcmask 261120   ;;  %v751_v5 = vld [vmem:[%s888_s5 + $0x18] sm:$0xff]  }
  0x22   : > { %657 = vmatprep.subr.bf16.mxu0 %v812_v2  ;;  %681 = vmatprep.subr.bf16.mxu1 %v812_v2  ;;  %v750_v4 = vld [vmem:[%s888_s5] sm:$0xff]   ;;  %v752_v6 = vld [vmem:[%s888_s5 + $0x8] sm:$0xff]   ;;  %v754_v8 = vld [vmem:[%s888_s5 + $0x10] sm:$0xff]   ;;  %p645_p11 = scmp.ne.s32.totalorder %s785_s12, 2 }
  0x23   : > { %658 = vmatpush3.bf16.msra.mxu0 %v748_v1  ;;  %661 = vmatprep.mubr.msk.bf16.mxu0 %vm813_vm0, %v812_v2  ;;  %v753_v7 = vld [vmem:[%s888_s5 + $0x20] ss:$0 sps:$4 sm:$0xff]   ;;  %v295_v10 = vld [vmem:[#allocation2 + $0x30] sm:$0xff]  ;;  %v290_v12 = vld [vmem:[#allocation2 + $0x8] sm:$0xff] }
  0x24   : > { %659 = vmatprep.subr.bf16.mxu0 %v812_v2  ;;  %683 = vmatpush3.bf16.msra.mxu1 %v748_v1  ;;  %v289_v9 = vld [vmem:[#allocation2] sm:$0xff]  ;;  %v296_v16 = vld [vmem:[#allocation2 + $0x38] sm:$0xff]  ;;  %v291_v25 = vld [vmem:[#allocation2 + $0x10] sm:$0xff] }
  0x25   : > { %682 = vmatprep.subr.bf16.mxu1 %v812_v2  ;;  %673 = vmatprep.mubr.msk.bf16.mxu1 %vm813_vm0, %v812_v2  ;;  %v297_v26 = vld [vmem:[#allocation2 + $0x40] sm:$0xff]  ;;  %v292_v28 = vld [vmem:[#allocation2 + $0x18] sm:$0xff]  ;;  %v294_v41 = vld [vmem:[#allocation2 + $0x28] sm:$0xff] }
  0x26   : > { %v293_v39 = vld [vmem:[#allocation2 + $0x20] sm:$0xff] }
  0x27   : > { %660 = vmatpush3.bf16.msra.mxu0 %v749_v3  ;;  %v646_v48 = vld [vmem:[%s946_s2] ss:$0 sm:$0xff] (!%p645_p11) }
  0x28   : > { %684 = vmatpush3.bf16.msra.mxu1 %v749_v3 }
  0x2a   : > { %662 = vmatmul.mubr.msk.bf16.vlgmr.msra.gmra.mrb[0].mxu0 %vm346_vm1, %v750_v4 }
  0x2b   : > { %665 = vmatprep.mubr.msk.bf16.mxu0 %vm813_vm0, %v812_v2  ;;  %674 = vmatmul.mubr.msk.bf16.vlgmr.msra.gmra.mrb[0].mxu1 %vm346_vm1, %v751_v5 }
  0x2c   : > { %677 = vmatprep.mubr.msk.bf16.mxu1 %vm813_vm0, %v812_v2 }
  0x32   : > { %666 = vmatmul.mubr.msk.bf16.gmra.mrb[4].mxu0 %vm346_vm1, %v752_v6 }
  0x33   : > { %669 = vmatprep.mubr.msk.bf16.mxu0 %vm813_vm0, %v812_v2  ;;  %678 = vmatmul.mubr.msk.bf16.gmra.mrb[4].mxu1 %vm346_vm1, %v753_v7 }
  0x3a   : > { %670 = vmatmul.mubr.msk.bf16.gmra.mrb[8].mxu0 %vm346_vm1, %v754_v8 }
  0xfd   : > { %v396_v11 = vpop.f32.mrb[0].mxu0 }
  0xfe   : > { %v434_v13 = vadd.f32 %v396_v11, %v289_v9  ;;  %v663_v14 = vpop.f32.mrb[1].mxu0  ;;  %v420_v15 = vpop.f32.mrb[0].mxu1 }
  0xff   : > { %v399_v17 = vpop.f32.mrb[2].mxu0  ;;  %v440_v18 = vadd.f32 %v420_v15, %v295_v10  ;;  %v675_v19 = vpop.f32.mrb[1].mxu1 }
 0x100   : > { %443 = vst [vmem:[#allocation2] sm:$0xff] %v434_v13  ;;  %v435_v20 = vadd.f32 %v399_v17, %v290_v12  ;;  %v664_v21 = vpop.f32.mrb[3].mxu0  ;;  %v423_v22 = vpop.f32.mrb[2].mxu1 }
 0x101   : > { %449 = vst [vmem:[#allocation2 + $0x30] sm:$0xff] %v440_v18  ;;  %v441_v23 = vadd.f32 %v423_v22, %v296_v16  ;;  %v676_v24 = vpop.f32.mrb[3].mxu1 }
 0x102   : > { %444 = vst [vmem:[#allocation2 + $0x8] sm:$0xff] %v435_v20 }
 0x103   : > { %450 = vst [vmem:[#allocation2 + $0x38] sm:$0xff] %v441_v23 }
 0x105   : > { %v404_v27 = vpop.f32.mrb[4].mxu0 }
 0x106   : > { %v436_v29 = vadd.f32 %v404_v27, %v291_v25  ;;  %v667_v30 = vpop.f32.mrb[5].mxu0  ;;  %v428_v31 = vpop.f32.mrb[4].mxu1 }
 0x107   : > { %v407_v32 = vpop.f32.mrb[6].mxu0  ;;  %v442_v33 = vadd.f32 %v428_v31, %v297_v26  ;;  %v679_v34 = vpop.f32.mrb[5].mxu1  ;;  %v456_v47 = vld [vmem:[#allocation2] sm:$0xff] (!%p645_p11) }
 0x108   : > { %445 = vst [vmem:[#allocation2 + $0x10] sm:$0xff] %v436_v29  ;;  %v437_v35 = vadd.f32 %v407_v32, %v292_v28  ;;  %v668_v36 = vpop.f32.mrb[7].mxu0  ;;  %v431_v37 = vpop.f32.mrb[6].mxu1  ;;  %v472_v50 = vadd.f32 (!%p645_p11), %v646_v48, %v456_v47  ;;  %v462_v59 = vld [vmem:[#allocation2 + $0x30] sm:$0xff] (!%p645_p11) }
 0x109   : > { %451 = vst [vmem:[#allocation2 + $0x40] sm:$0xff] %v442_v33  ;;  %v680_v38 = vpop.f32.mrb[7].mxu1  ;;  %v457_v49 = vld [vmem:[#allocation2 + $0x8] sm:$0xff] (!%p645_p11)  ;;  %v478_v62 = vadd.f32 (!%p645_p11), %v646_v48, %v462_v59 }
 0x10a   : > { %446 = vst [vmem:[#allocation2 + $0x18] sm:$0xff] %v437_v35  ;;  %v473_v51 = vadd.f32 (!%p645_p11), %v646_v48, %v457_v49  ;;  %v463_v60 = vld [vmem:[#allocation2 + $0x38] sm:$0xff] (!%p645_p11)  ;;  %481 = vst [vmem:[%s897_s23] sm:$0xff] (!%p645_p11), %v472_v50 }
 0x10b   : > { %v479_v63 = vadd.f32 (!%p645_p11), %v646_v48, %v463_v60  ;;  %487 = vst [vmem:[%s897_s23 + $0x30] sm:$0xff] (!%p645_p11), %v478_v62 }
 0x10c   : > { %455 = sbr.rel (%p645_p11) target bundleno = 285 (0x11d), region = 40  ;;  %482 = vst [vmem:[%s897_s23 + $0x8] sm:$0xff] (!%p645_p11), %v473_v51 }
 0x10d   : > { %v412_v40 = vpop.f32.mrb[8].mxu0  ;;  %488 = vst [vmem:[%s897_s23 + $0x38] sm:$0xff] (!%p645_p11), %v479_v63 }
 0x10e   : > { %v438_v42 = vadd.f32 %v412_v40, %v293_v39  ;;  %v671_v43 = vpop.f32.mrb[9].mxu0 }
 0x10f   : > { %v415_v44 = vpop.f32.mrb[10].mxu0  ;;  %v458_v52 = vld [vmem:[#allocation2 + $0x10] sm:$0xff] (!%p645_p11) }
 0x110   : > { %447 = vst [vmem:[#allocation2 + $0x20] sm:$0xff] %v438_v42  ;;  %v439_v45 = vadd.f32 %v415_v44, %v294_v41  ;;  %v672_v46 = vpop.f32.mrb[11].mxu0  ;;  %v474_v55 = vadd.f32 (!%p645_p11), %v646_v48, %v458_v52  ;;  %v464_v0 = vld [vmem:[#allocation2 + $0x40] sm:$0xff] (!%p645_p11) }
 0x111   : > { %v459_v53 = vld [vmem:[#allocation2 + $0x18] sm:$0xff] (!%p645_p11)  ;;  %v480_v1 = vadd.f32 (!%p645_p11), %v646_v48, %v464_v0 }
 0x112   : > { %448 = vst [vmem:[#allocation2 + $0x28] sm:$0xff] %v439_v45  ;;  %v475_v56 = vadd.f32 (!%p645_p11), %v646_v48, %v459_v53  ;;  %483 = vst [vmem:[%s897_s23 + $0x10] sm:$0xff] (!%p645_p11), %v474_v55 }
 0x113   : > { %489 = vst [vmem:[%s897_s23 + $0x40] sm:$0xff] %v480_v1 }
 0x114   : > { %484 = vst [vmem:[%s897_s23 + $0x18] sm:$0xff] %v475_v56 }
 0x117   : > { %v460_v54 = vld [vmem:[#allocation2 + $0x20] sm:$0xff] }
 0x118   : > { %v476_v57 = vadd.f32 %v646_v48, %v460_v54 }
 0x119   : > { %v461_v58 = vld [vmem:[#allocation2 + $0x28] sm:$0xff] }
 0x11a   : > { %v477_v61 = vadd.f32 %v646_v48, %v461_v58  ;;  %485 = vst [vmem:[%s897_s23 + $0x20] sm:$0xff] %v476_v57 }
 0x11c   : > { %486 = vst [vmem:[%s897_s23 + $0x28] sm:$0xff] %v477_v61 }
 0x11d PF: > { %s13_s18 = sadd.s32 1, %s809_s18   ;;  %s949_s21 = sld [smem:[#allocation3_spill]] }
 0x11e   : > { %p10_p12 = scmp.ge.s32.totalorder %s13_s18, 14   ;;  %s950_s12 = smov %s797_s15 }
 0x11f   : > { %s951_s13 = smov %s801_s16  ;;  %s952_s14 = smov %s805_s17 }
 0x120   : > { %s953_s15 = smov %s957_s19  ;;  %s954_s16 = smov %s961_s20 }
 0x121   :  { %12 = sbr.rel (!%p10_p12) target bundleno = 4 (0x4), region = 73 }
 0x123   : > { %s955_s17 = smov %s949_s21 }

// kernel: decoder_forward.43
= control target key start
LH: loop header
LB: loop body
LE: loop exit
PB: predicated region body
PF: predicated region fallthrough
CT: control target
= control target key end

     0   :  { %s845_s12 = smov 0   ;;  %s847_s13 = smov 0   ;;  %s956_s0 = inlined_call_operand.vmem [shape: bf16[2,4,80,32], index: 0, kind: input, shape index: {}]   ;;  %s957_s1 = inlined_call_operand.vmem [shape: bf16[3,32,128], index: 1, kind: input, shape index: {}]   ;;  %s958_s2 = inlined_call_operand.vmem [shape: f32[1,128], index: 2, kind: input, shape index: {}]   ;;  %s959_s3 = inlined_call_operand.vmem [shape: f32[2,2,80,128], index: 3, kind: output, shape index: {}]  }
   0x1   :  { %s849_s14 = smov 0   ;;  %s851_s15 = smov 0  }
   0x2   :  { %s853_s16 = smov 0   ;;  %s855_s17 = smov 0  }
   0x3   :  { %s857_s18 = smov 0  }
   0x4 LB: > { %s28_s19 = sadd.s32 1, %s808_s15  ;;  %s35_s20 = sadd.s32 1, %s812_s16  ;;  %s820_s18 = sphi %s857_s18, %s13_s18   ;;  %s816_s17 = sphi %s855_s17, %s967_s17   ;;  %s812_s16 = sphi %s853_s16, %s966_s16   ;;  %s808_s15 = sphi %s851_s15, %s965_s15   ;;  %s804_s14 = sphi %s849_s14, %s964_s14   ;;  %s800_s13 = sphi %s847_s13, %s963_s13   ;;  %s796_s12 = sphi %s845_s12, %s962_s12  }
   0x5   : > { %p29_p0 = scmp.ge.s32.totalorder %s28_s19, 3  ;;  %p638_p1 = scmp.ge.s32.totalorder %s820_s18, 1 }
   0x6   : > { %p194_p2 = scmp.lt.s32.totalorder %s820_s18, 13  ;;  %s39_s21 = sadd.s32 1, %s816_s17 }
   0x7   : > { %s969_s19 = smov (%p29_p0, %s28_s19), 0  ;;  %s971_s20 = smov (!%p29_p0, %s35_s20), %s812_s16 }
   0x8   : > { %p195_p3 = pnand %p638_p1, %p194_p2  ;;  %p37_p4 = scmp.ge.s32.totalorder %s971_s20, 2 }
   0x9   : > { %s240_s22 = sadd.s32 (!%p195_p3), %s796_s12, %s800_s13  ;;  %p242_p6 = scmp.lt.s32.totalorder (!%p195_p3), %s804_s14, 1 }
   0xa   : > { %s973_s20 = smov (%p37_p4, %s971_s20), 0  ;;  %s975_s21 = smov (!%p37_p4, %s39_s21), %s816_s17 }
   0xb   : > { %p41_p5 = scmp.ge.s32.totalorder %s975_s21, 2  ;;  %198 = sbr.rel (%p195_p3) target bundleno = 285 (0x11d), region = 32 }
   0xc   : > { %p244_p7 = scmp.lt.s32.totalorder (!%p195_p3), %s240_s22, 3  ;;  %p256_p8 = scmp.lt.s32.totalorder (!%p195_p3), %s796_s12, 2 }
   0xd   : > { %s977_s21 = smov (%p41_p5, %s975_s21), 0  ;;  %p264_p9 = scmp.lt.s32.totalorder (!%p195_p3), %s800_s13, 1 }
   0xe   : > { %960 = sst [smem:[#allocation3_spill]] %s977_s21  ;;  %p643_p10 = scmp.ne.s32.totalorder (!%p195_p3), %s796_s12, 0 }
  0x12   : > { %s979_s14 = smov (!%p242_p6, %s804_s14), 1  ;;  %s981_s22 = smov (!%p244_p7, %s240_s22), 3 }
  0x13   : > { %s697_s23 = smul.u32 40, %s979_s14  ;;  %s983_s13 = smov (!%p264_p9, %s800_s13), 1  ;;  %v822_v0 = vmov (!%p643_p10), 0.0  }
  0x14   : > { %s696_s24 = smul.u32 10, %s981_s22  ;;  %280 = vst [vmem:[#allocation2] sm:$0xff] (!%p643_p10), %v822_v0  ;;  %281 = vst [vmem:[#allocation2 + $0x8] sm:$0xff] (!%p643_p10), %v822_v0 }
  0x15   : > { %s257_s25 = scalar_select %p256_p8, %s796_s12, 2 }
  0x16   : > { %s251_s26 = sadd.s32 %s697_s23, %s696_s24  ;;  %s699_s27 = smul.u32 20, %s979_s14  ;;  %282 = vst [vmem:[#allocation2 + $0x10] sm:$0xff] (!%p643_p10), %v822_v0  ;;  %283 = vst [vmem:[#allocation2 + $0x18] sm:$0xff] (!%p643_p10), %v822_v0 }
  0x17   : > { %s639_s28 = sshll.u32 %s251_s26, 2  ;;  %s660_s29 = sshll.u32 %s257_s25, 4  ;;  %284 = vst [vmem:[#allocation2 + $0x20] sm:$0xff] (!%p643_p10), %v822_v0  ;;  %285 = vst [vmem:[#allocation2 + $0x28] sm:$0xff] (!%p643_p10), %v822_v0 }
  0x18   : > { %s899_s5 = scalar_lea.vmem %s956_s0, %s639_s28  ;;  %s260_s8 = scalar_lea.vmem %s957_s1, %s660_s29  ;;  %286 = vst [vmem:[#allocation2 + $0x30] sm:$0xff] (!%p643_p10), %v822_v0  ;;  %287 = vst [vmem:[#allocation2 + $0x38] sm:$0xff] (!%p643_p10), %v822_v0 }
  0x19   : > { %s698_s9 = smul.u32 10, %s983_s13  ;;  %288 = vst [vmem:[#allocation2 + $0x40] sm:$0xff] (!%p643_p10), %v822_v0  ;;  %289 = vst [vmem:[#allocation2 + $0x48] sm:$0xff] (!%p643_p10), %v822_v0 }
  0x1a   : > { %279 = sbr.rel (%p643_p10) target bundleno = 33 (0x21), region = 36 }
  0x1b   : > { %s271_s10 = sadd.s32 %s699_s27, %s698_s9 }
  0x1c   : > { %s642_s11 = sshll.u32 %s271_s10, 3 }
  0x1d   : > { %s908_s23 = scalar_lea.vmem %s959_s3, %s642_s11 }
  0x21 PF: > { %v759_v1 = vld [vmem:[%s260_s8] sm:$0xff]   ;;  %v823_v2 = vmov 0.0   ;;  %v760_v3 = vld [vmem:[%s260_s8 + $0x8] sm:$0xff]   ;;  %vm824_vm0 = vmmov 0   ;;  %v762_v5 = vld [vmem:[%s899_s5 + $0x18] sm:$0xff]   ;;  %vm351_vm1 = vcmask 261120  }
  0x22   : > { %668 = vmatprep.subr.bf16.mxu0 %v823_v2  ;;  %692 = vmatprep.subr.bf16.mxu1 %v823_v2  ;;  %v761_v4 = vld [vmem:[%s899_s5] sm:$0xff]   ;;  %v763_v6 = vld [vmem:[%s899_s5 + $0x8] sm:$0xff]   ;;  %v765_v8 = vld [vmem:[%s899_s5 + $0x10] sm:$0xff]   ;;  %p656_p11 = scmp.ne.s32.totalorder %s796_s12, 2 }
  0x23   : > { %669 = vmatpush3.bf16.msra.mxu0 %v759_v1  ;;  %694 = vmatpush3.bf16.msra.mxu1 %v759_v1  ;;  %v764_v7 = vld [vmem:[%s899_s5 + $0x20] sm:$0xff]   ;;  %v296_v10 = vld [vmem:[#allocation2 + $0x30] sm:$0xff]  ;;  %v291_v12 = vld [vmem:[#allocation2 + $0x8] sm:$0xff] }
  0x24   : > { %670 = vmatprep.subr.bf16.mxu0 %v823_v2  ;;  %672 = vmatprep.mubr.msk.bf16.mxu0 %vm824_vm0, %v823_v2  ;;  %v290_v9 = vld [vmem:[#allocation2] sm:$0xff]  ;;  %v297_v14 = vld [vmem:[#allocation2 + $0x38] sm:$0xff]  ;;  %v292_v25 = vld [vmem:[#allocation2 + $0x10] sm:$0xff] }
  0x25   : > { %693 = vmatprep.subr.bf16.mxu1 %v823_v2  ;;  %684 = vmatprep.mubr.msk.bf16.mxu1 %vm824_vm0, %v823_v2  ;;  %v298_v26 = vld [vmem:[#allocation2 + $0x40] sm:$0xff]  ;;  %v293_v28 = vld [vmem:[#allocation2 + $0x18] sm:$0xff]  ;;  %v299_v30 = vld [vmem:[#allocation2 + $0x48] sm:$0xff] }
  0x26   : > { %v294_v41 = vld [vmem:[#allocation2 + $0x20] sm:$0xff]  ;;  %v295_v43 = vld [vmem:[#allocation2 + $0x28] sm:$0xff] }
  0x27   : > { %671 = vmatpush3.bf16.msra.mxu0 %v760_v3  ;;  %695 = vmatpush3.bf16.msra.mxu1 %v760_v3  ;;  %v657_v50 = vld [vmem:[%s958_s2] ss:$0 sm:$0xff] (!%p656_p11) }
  0x2a   : > { %673 = vmatmul.mubr.msk.bf16.vlgmr.msra.gmra.mrb[0].mxu0 %vm351_vm1, %v761_v4  ;;  %685 = vmatmul.mubr.msk.bf16.vlgmr.msra.gmra.mrb[0].mxu1 %vm351_vm1, %v762_v5 }
  0x2b   : > { %676 = vmatprep.mubr.msk.bf16.mxu0 %vm824_vm0, %v823_v2  ;;  %688 = vmatprep.mubr.msk.bf16.mxu1 %vm824_vm0, %v823_v2 }
  0x32   : > { %677 = vmatmul.mubr.msk.bf16.gmra.mrb[4].mxu0 %vm351_vm1, %v763_v6  ;;  %689 = vmatmul.mubr.msk.bf16.gmra.mrb[4].mxu1 %vm351_vm1, %v764_v7 }
  0x33   : > { %680 = vmatprep.mubr.msk.bf16.mxu0 %vm824_vm0, %v823_v2 }
  0x3a   : > { %681 = vmatmul.mubr.msk.bf16.gmra.mrb[8].mxu0 %vm351_vm1, %v765_v8 }
  0xfd   : > { %v401_v11 = vpop.f32.mrb[0].mxu0  ;;  %v425_v13 = vpop.f32.mrb[0].mxu1 }
  0xfe   : > { %v440_v15 = vadd.f32 %v401_v11, %v290_v9  ;;  %v674_v16 = vpop.f32.mrb[1].mxu0  ;;  %v446_v17 = vadd.f32 %v425_v13, %v296_v10  ;;  %v686_v18 = vpop.f32.mrb[1].mxu1 }
  0xff   : > { %v404_v19 = vpop.f32.mrb[2].mxu0  ;;  %v428_v20 = vpop.f32.mrb[2].mxu1 }
 0x100   : > { %450 = vst [vmem:[#allocation2] sm:$0xff] %v440_v15  ;;  %v441_v21 = vadd.f32 %v404_v19, %v291_v12  ;;  %v675_v22 = vpop.f32.mrb[3].mxu0  ;;  %456 = vst [vmem:[#allocation2 + $0x30] sm:$0xff] %v446_v17  ;;  %v447_v23 = vadd.f32 %v428_v20, %v297_v14  ;;  %v687_v24 = vpop.f32.mrb[3].mxu1 }
 0x102   : > { %451 = vst [vmem:[#allocation2 + $0x8] sm:$0xff] %v441_v21  ;;  %457 = vst [vmem:[#allocation2 + $0x38] sm:$0xff] %v447_v23 }
 0x105   : > { %v409_v27 = vpop.f32.mrb[4].mxu0  ;;  %v433_v29 = vpop.f32.mrb[4].mxu1 }
 0x106   : > { %v442_v31 = vadd.f32 %v409_v27, %v292_v25  ;;  %v678_v32 = vpop.f32.mrb[5].mxu0  ;;  %v448_v33 = vadd.f32 %v433_v29, %v298_v26  ;;  %v690_v34 = vpop.f32.mrb[5].mxu1 }
 0x107   : > { %v412_v35 = vpop.f32.mrb[6].mxu0  ;;  %v436_v36 = vpop.f32.mrb[6].mxu1  ;;  %v464_v49 = vld [vmem:[#allocation2] sm:$0xff] (!%p656_p11)  ;;  %v470_v61 = vld [vmem:[#allocation2 + $0x30] sm:$0xff] (!%p656_p11) }
 0x108   : > { %452 = vst [vmem:[#allocation2 + $0x10] sm:$0xff] %v442_v31  ;;  %v443_v37 = vadd.f32 %v412_v35, %v293_v28  ;;  %v679_v38 = vpop.f32.mrb[7].mxu0  ;;  %458 = vst [vmem:[#allocation2 + $0x40] sm:$0xff] %v448_v33  ;;  %v449_v39 = vadd.f32 %v436_v36, %v299_v30  ;;  %v691_v40 = vpop.f32.mrb[7].mxu1  ;;  %v481_v52 = vadd.f32 (!%p656_p11), %v657_v50, %v464_v49 }
 0x109   : > { %v465_v51 = vld [vmem:[#allocation2 + $0x8] sm:$0xff] (!%p656_p11)  ;;  %v471_v62 = vld [vmem:[#allocation2 + $0x38] sm:$0xff] (!%p656_p11)  ;;  %v487_v0 = vadd.f32 (!%p656_p11), %v657_v50, %v470_v61 }
 0x10a   : > { %453 = vst [vmem:[#allocation2 + $0x18] sm:$0xff] %v443_v37  ;;  %459 = vst [vmem:[#allocation2 + $0x48] sm:$0xff] %v449_v39  ;;  %v482_v53 = vadd.f32 (!%p656_p11), %v657_v50, %v465_v51  ;;  %v488_v1 = vadd.f32 (!%p656_p11), %v657_v50, %v471_v62 }
 0x10b   : > { %491 = vst [vmem:[%s908_s23] sm:$0xff] (!%p656_p11), %v481_v52  ;;  %497 = vst [vmem:[%s908_s23 + $0x30] sm:$0xff] (!%p656_p11), %v487_v0 }
 0x10c   : > { %463 = sbr.rel (%p656_p11) target bundleno = 285 (0x11d), region = 40  ;;  %492 = vst [vmem:[%s908_s23 + $0x8] sm:$0xff] (!%p656_p11), %v482_v53  ;;  %498 = vst [vmem:[%s908_s23 + $0x38] sm:$0xff] (!%p656_p11), %v488_v1 }
 0x10d   : > { %v417_v42 = vpop.f32.mrb[8].mxu0 }
 0x10e   : > { %v444_v44 = vadd.f32 %v417_v42, %v294_v41  ;;  %v682_v45 = vpop.f32.mrb[9].mxu0 }
 0x10f   : > { %v420_v46 = vpop.f32.mrb[10].mxu0  ;;  %v466_v54 = vld [vmem:[#allocation2 + $0x10] sm:$0xff] (!%p656_p11)  ;;  %v472_v2 = vld [vmem:[#allocation2 + $0x40] sm:$0xff] (!%p656_p11) }
 0x110   : > { %454 = vst [vmem:[#allocation2 + $0x20] sm:$0xff] %v444_v44  ;;  %v445_v47 = vadd.f32 %v420_v46, %v295_v43  ;;  %v683_v48 = vpop.f32.mrb[11].mxu0  ;;  %v483_v57 = vadd.f32 (!%p656_p11), %v657_v50, %v466_v54  ;;  %v489_v4 = vadd.f32 (!%p656_p11), %v657_v50, %v472_v2 }
 0x111   : > { %v467_v55 = vld [vmem:[#allocation2 + $0x18] sm:$0xff] (!%p656_p11)  ;;  %v473_v3 = vld [vmem:[#allocation2 + $0x48] sm:$0xff] (!%p656_p11) }
 0x112   : > { %455 = vst [vmem:[#allocation2 + $0x28] sm:$0xff] %v445_v47  ;;  %v484_v58 = vadd.f32 (!%p656_p11), %v657_v50, %v467_v55  ;;  %493 = vst [vmem:[%s908_s23 + $0x10] sm:$0xff] (!%p656_p11), %v483_v57  ;;  %v490_v5 = vadd.f32 (!%p656_p11), %v657_v50, %v473_v3 }
 0x113   : > { %499 = vst [vmem:[%s908_s23 + $0x40] sm:$0xff] %v489_v4 }
 0x114   : > { %494 = vst [vmem:[%s908_s23 + $0x18] sm:$0xff] %v484_v58  ;;  %500 = vst [vmem:[%s908_s23 + $0x48] sm:$0xff] %v490_v5 }
 0x117   : > { %v468_v56 = vld [vmem:[#allocation2 + $0x20] sm:$0xff] }
 0x118   : > { %v485_v59 = vadd.f32 %v657_v50, %v468_v56 }
 0x119   : > { %v469_v60 = vld [vmem:[#allocation2 + $0x28] sm:$0xff] }
 0x11a   : > { %v486_v63 = vadd.f32 %v657_v50, %v469_v60  ;;  %495 = vst [vmem:[%s908_s23 + $0x20] sm:$0xff] %v485_v59 }
 0x11c   : > { %496 = vst [vmem:[%s908_s23 + $0x28] sm:$0xff] %v486_v63 }
 0x11d PF: > { %s13_s18 = sadd.s32 1, %s820_s18   ;;  %s961_s21 = sld [smem:[#allocation3_spill]] }
 0x11e   : > { %p10_p12 = scmp.ge.s32.totalorder %s13_s18, 14   ;;  %s962_s12 = smov %s808_s15 }
 0x11f   : > { %s963_s13 = smov %s812_s16  ;;  %s964_s14 = smov %s816_s17 }
 0x120   : > { %s965_s15 = smov %s969_s19  ;;  %s966_s16 = smov %s973_s20 }
 0x121   :  { %12 = sbr.rel (!%p10_p12) target bundleno = 4 (0x4), region = 73 }
 0x123   : > { %s967_s17 = smov %s961_s21 }

// kernel: decoder_forward.52
= control target key start
LH: loop header
LB: loop body
LE: loop exit
PB: predicated region body
PF: predicated region fallthrough
CT: control target
= control target key end

     0   :  { %s1380_s12 = smov 0   ;;  %s1382_s13 = smov 0   ;;  %s1609_s0 = inlined_call_operand.vmem [shape: bf16[2,3,304,4], index: 0, kind: input, shape index: {}]   ;;  %s1610_s1 = inlined_call_operand.vmem [shape: bf16[2,4,128], index: 1, kind: input, shape index: {}]   ;;  %s1611_s2 = inlined_call_operand.vmem [shape: f32[1,128], index: 2, kind: input, shape index: {}]   ;;  %s1612_s3 = inlined_call_operand.vmem [shape: f32[2,2,304,128], index: 3, kind: output, shape index: {}]  }
   0x1   :  { %s1384_s14 = smov 0   ;;  %s1386_s15 = smov 0  }
   0x2   :  { %s1388_s16 = smov 0   ;;  %s1390_s17 = smov 0  }
   0x3   :  { %s1392_s18 = smov 0  }
   0x4 LB: > { %s28_s19 = sadd.s32 1, %s1343_s15  ;;  %s35_s20 = sadd.s32 1, %s1347_s16  ;;  %s1355_s18 = sphi %s1392_s18, %s13_s18   ;;  %s1351_s17 = sphi %s1390_s17, %s1620_s17   ;;  %s1347_s16 = sphi %s1388_s16, %s1619_s16   ;;  %s1343_s15 = sphi %s1386_s15, %s1618_s15   ;;  %s1339_s14 = sphi %s1384_s14, %s1617_s14   ;;  %s1335_s13 = sphi %s1382_s13, %s1616_s13   ;;  %s1331_s12 = sphi %s1380_s12, %s1615_s12  }
   0x5   : > { %p29_p0 = scmp.ge.s32.totalorder %s28_s19, 2  ;;  %p1072_p1 = scmp.ge.s32.totalorder %s1355_s18, 1 }
   0x6   : > { %p193_p2 = scmp.lt.s32.totalorder %s1355_s18, 9  ;;  %s39_s21 = sadd.s32 1, %s1351_s17 }
   0x7   : > { %s1622_s19 = smov (%p29_p0, %s28_s19), 0  ;;  %s1624_s20 = smov (!%p29_p0, %s35_s20), %s1347_s16 }
   0x8   : > { %p194_p3 = pnand %p1072_p1, %p193_p2  ;;  %p37_p4 = scmp.ge.s32.totalorder %s1624_s20, 2 }
   0x9   : > { %s238_s22 = sadd.s32 (!%p194_p3), %s1331_s12, %s1335_s13  ;;  %p240_p6 = scmp.lt.s32.totalorder (!%p194_p3), %s1339_s14, 1 }
   0xa   : > { %s1626_s20 = smov (%p37_p4, %s1624_s20), 0  ;;  %s1628_s21 = smov (!%p37_p4, %s39_s21), %s1351_s17 }
   0xb   : > { %p41_p5 = scmp.ge.s32.totalorder %s1628_s21, 2  ;;  %197 = sbr.rel (%p194_p3) target bundleno = 344 (0x158), region = 32 }
   0xc   : > { %p242_p7 = scmp.lt.s32.totalorder (!%p194_p3), %s238_s22, 2  ;;  %p254_p8 = scmp.lt.s32.totalorder (!%p194_p3), %s1331_s12, 1 }
   0xd   : > { %s1630_s21 = smov (%p41_p5, %s1628_s21), 0  ;;  %p261_p9 = scmp.lt.s32.totalorder (!%p194_p3), %s1335_s13, 1 }
   0xe   : > { %1613 = sst [smem:[#allocation3_spill]] %s1630_s21  ;;  %p1076_p10 = scmp.ne.s32.totalorder (!%p194_p3), %s1331_s12, 0 }
  0x12   : > { %s1632_s14 = smov (!%p240_p6, %s1339_s14), 1  ;;  %s1634_s22 = smov (!%p242_p7, %s238_s22), 2 }
  0x13   : > { %s1220_s23 = smul.u32 114, %s1632_s14  ;;  %s1636_s13 = smov (!%p261_p9, %s1335_s13), 1  ;;  %v1357_v0 = vmov (!%p1076_p10), 0.0  }
  0x14   : > { %s1219_s24 = smul.u32 38, %s1634_s22  ;;  %277 = vst [vmem:[#allocation2] sm:$0xff] (!%p1076_p10), %v1357_v0  ;;  %278 = vst [vmem:[#allocation2 + $0x8] sm:$0xff] (!%p1076_p10), %v1357_v0 }
  0x15   : > { %s255_s25 = scalar_select %p254_p8, %s1331_s12, 1 }
  0x16   : > { %s249_s26 = sadd.s32 %s1220_s23, %s1219_s24  ;;  %s1222_s27 = smul.u32 76, %s1632_s14  ;;  %279 = vst [vmem:[#allocation2 + $0x10] sm:$0xff] (!%p1076_p10), %v1357_v0  ;;  %280 = vst [vmem:[#allocation2 + $0x18] sm:$0xff] (!%p1076_p10), %v1357_v0 }
  0x17   : > { %s1073_s28 = sshll.u32 %s249_s26, 2  ;;  %s1074_s29 = sshll.u32 %s255_s25, 1  ;;  %281 = vst [vmem:[#allocation2 + $0x20] sm:$0xff] (!%p1076_p10), %v1357_v0  ;;  %282 = vst [vmem:[#allocation2 + $0x28] sm:$0xff] (!%p1076_p10), %v1357_v0 }
  0x18   : > { %s1434_s5 = scalar_lea.vmem %s1609_s0, %s1073_s28  ;;  %s1439_s8 = scalar_lea.vmem %s1610_s1, %s1074_s29  ;;  %283 = vst [vmem:[#allocation2 + $0x30] sm:$0xff] (!%p1076_p10), %v1357_v0  ;;  %284 = vst [vmem:[#allocation2 + $0x38] sm:$0xff] (!%p1076_p10), %v1357_v0 }
  0x19   : > { %s1221_s9 = smul.u32 38, %s1636_s13  ;;  %285 = vst [vmem:[#allocation2 + $0x40] sm:$0xff] (!%p1076_p10), %v1357_v0  ;;  %286 = vst [vmem:[#allocation2 + $0x48] sm:$0xff] (!%p1076_p10), %v1357_v0 }
  0x1a   : > { %276 = sbr.rel (%p1076_p10) target bundleno = 40 (0x28), region = 36  ;;  %287 = vst [vmem:[#allocation2 + $0x50] sm:$0xff] (!%p1076_p10), %v1357_v0  ;;  %288 = vst [vmem:[#allocation2 + $0x58] sm:$0xff] (!%p1076_p10), %v1357_v0 }
  0x1b   : > { %s268_s10 = sadd.s32 %s1222_s27, %s1221_s9  ;;  %289 = vst [vmem:[#allocation2 + $0x60] sm:$0xff] (!%p1076_p10), %v1357_v0  ;;  %290 = vst [vmem:[#allocation2 + $0x68] sm:$0xff] (!%p1076_p10), %v1357_v0 }
  0x1c   : > { %s1075_s11 = sshll.u32 %s268_s10, 3  ;;  %291 = vst [vmem:[#allocation2 + $0x70] sm:$0xff] (!%p1076_p10), %v1357_v0  ;;  %292 = vst [vmem:[#allocation2 + $0x78] sm:$0xff] (!%p1076_p10), %v1357_v0 }
  0x1d   : > { %s1445_s14 = scalar_lea.vmem %s1612_s3, %s1075_s11  ;;  %293 = vst [vmem:[#allocation2 + $0x80] sm:$0xff] (!%p1076_p10), %v1357_v0  ;;  %294 = vst [vmem:[#allocation2 + $0x88] sm:$0xff] (!%p1076_p10), %v1357_v0 }
  0x1e   : > { %295 = vst [vmem:[#allocation2 + $0x90] sm:$0xff] (!%p1076_p10), %v1357_v0  ;;  %296 = vst [vmem:[#allocation2 + $0x98] sm:$0xff] (!%p1076_p10), %v1357_v0 }
  0x1f   : > { %297 = vst [vmem:[#allocation2 + $0xa0] sm:$0xff] (!%p1076_p10), %v1357_v0  ;;  %298 = vst [vmem:[#allocation2 + $0xa8] sm:$0xff] (!%p1076_p10), %v1357_v0 }
  0x20   : > { %299 = vst [vmem:[#allocation2 + $0xb0] sm:$0xff] (!%p1076_p10), %v1357_v0  ;;  %300 = vst [vmem:[#allocation2 + $0xb8] sm:$0xff] (!%p1076_p10), %v1357_v0 }
  0x21   : > { %301 = vst [vmem:[#allocation2 + $0xc0] sm:$0xff] %v1357_v0  ;;  %302 = vst [vmem:[#allocation2 + $0xc8] sm:$0xff] %v1357_v0 }
  0x22   : > { %303 = vst [vmem:[#allocation2 + $0xd0] sm:$0xff] %v1357_v0  ;;  %304 = vst [vmem:[#allocation2 + $0xd8] sm:$0xff] %v1357_v0 }
  0x23   : > { %305 = vst [vmem:[#allocation2 + $0xe0] sm:$0xff] %v1357_v0  ;;  %306 = vst [vmem:[#allocation2 + $0xe8] sm:$0xff] %v1357_v0 }
  0x24   : > { %307 = vst [vmem:[#allocation2 + $0xf0] sm:$0xff] %v1357_v0  ;;  %308 = vst [vmem:[#allocation2 + $0xf8] sm:$0xff] %v1357_v0 }
  0x25   : > { %309 = vst [vmem:[#allocation2 + $0x100] sm:$0xff] %v1357_v0  ;;  %310 = vst [vmem:[#allocation2 + $0x108] sm:$0xff] %v1357_v0 }
  0x26   : > { %311 = vst [vmem:[#allocation2 + $0x110] sm:$0xff] %v1357_v0  ;;  %312 = vst [vmem:[#allocation2 + $0x118] sm:$0xff] %v1357_v0 }
  0x27   : > { %313 = vst [vmem:[#allocation2 + $0x120] sm:$0xff] %v1357_v0  ;;  %314 = vst [vmem:[#allocation2 + $0x128] sm:$0xff] %v1357_v0 }
  0x28 PF: > { %v391_v1 = vld [vmem:[%s1439_s8] sm:$0x3]  ;;  %vm545_vm0 = vcmask 1041408   ;;  %v1358_v2 = vmov 0.0   ;;  %vm1359_vm1 = vmmov 0   ;;  %vm487_vm2 = vcmask 31744  }
  0x29   : > { %1139 = vmatprep.subr.bf16.mxu0 %v1358_v2  ;;  %v547_v3 = vsel %vm545_vm0, %v391_v1, 0  ;;  %1141 = vmatprep.mubr.msk.bf16.mxu0 %vm1359_vm1, %v1358_v2  ;;  %v1282_v4 = vld [vmem:[%s1434_s5] sm:$0xff]   ;;  %v1283_v5 = vld [vmem:[%s1434_s5 + $0x50] sm:$0xff]   ;;  %v1284_v6 = vld [vmem:[%s1434_s5 + $0x8] sm:$0xff]   ;;  %p1115_p11 = scmp.ne.s32.totalorder %s1331_s12, 1 }
  0x2a   : > { %1140 = vmatpush3.bf16.msra.mxu0 %v547_v3  ;;  %1217 = vmatprep.subr.bf16.mxu1 %v1358_v2  ;;  %v1285_v7 = vld [vmem:[%s1434_s5 + $0x58] sm:$0xff]   ;;  %v1286_v8 = vld [vmem:[%s1434_s5 + $0x10] sm:$0xff]   ;;  %v1287_v9 = vld [vmem:[%s1434_s5 + $0x60] sm:$0xff]  }
  0x2b   : > { %1218 = vmatpush3.bf16.msra.mxu1 %v547_v3  ;;  %1181 = vmatprep.mubr.msk.bf16.mxu1 %vm1359_vm1, %v1358_v2  ;;  %v1288_v10 = vld [vmem:[%s1434_s5 + $0x18] sm:$0xff]   ;;  %v1289_v11 = vld [vmem:[%s1434_s5 + $0x68] sm:$0xff]   ;;  %v1290_v12 = vld [vmem:[%s1434_s5 + $0x20] sm:$0xff]  }
  0x2c   : > { %v1291_v13 = vld [vmem:[%s1434_s5 + $0x70] sm:$0xff]   ;;  %v1292_v14 = vld [vmem:[%s1434_s5 + $0x28] sm:$0xff]   ;;  %v1293_v15 = vld [vmem:[%s1434_s5 + $0x78] sm:$0xff]  }
  0x2d   : > { %1142 = vmatmul.mubr.msk.bf16.vlgmr.msra.gmra.mrb[0].mxu0 %vm487_vm2, %v1282_v4  ;;  %v1294_v16 = vld [vmem:[%s1434_s5 + $0x30] sm:$0xff]   ;;  %v1295_v17 = vld [vmem:[%s1434_s5 + $0x80] sm:$0xff]   ;;  %v1296_v18 = vld [vmem:[%s1434_s5 + $0x38] sm:$0xff]  }
  0x2e   : > { %1182 = vmatmul.mubr.msk.bf16.vlgmr.msra.gmra.mrb[0].mxu1 %vm487_vm2, %v1283_v5  ;;  %1145 = vmatprep.mubr.msk.bf16.mxu0 %vm1359_vm1, %v1358_v2  ;;  %v1297_v19 = vld [vmem:[%s1434_s5 + $0x88] sm:$0xff]   ;;  %v1298_v20 = vld [vmem:[%s1434_s5 + $0x40] sm:$0xff]   ;;  %v1299_v21 = vld [vmem:[%s1434_s5 + $0x90] sm:$0xff]  }
  0x2f   : > { %1185 = vmatprep.mubr.msk.bf16.mxu1 %vm1359_vm1, %v1358_v2  ;;  %v1300_v22 = vld [vmem:[%s1434_s5 + $0x48] sm:$0xff]   ;;  %v315_v23 = vld [vmem:[#allocation2] sm:$0xff]  ;;  %v317_v39 = vld [vmem:[#allocation2 + $0x10] sm:$0xff] }
  0x30   : > { %v335_v24 = vld [vmem:[#allocation2 + $0xa0] sm:$0xff]  ;;  %v316_v26 = vld [vmem:[#allocation2 + $0x8] sm:$0xff]  ;;  %v337_v40 = vld [vmem:[#allocation2 + $0xb0] sm:$0xff] }
  0x31   : > { %v336_v30 = vld [vmem:[#allocation2 + $0xa8] sm:$0xff]  ;;  %v318_v42 = vld [vmem:[#allocation2 + $0x18] sm:$0xff]  ;;  %v319_v55 = vld [vmem:[#allocation2 + $0x20] sm:$0xff] }
  0x32   : > { %v338_v46 = vld [vmem:[#allocation2 + $0xb8] sm:$0xff]  ;;  %v339_v56 = vld [vmem:[#allocation2 + $0xc0] sm:$0xff]  ;;  %v320_v58 = vld [vmem:[#allocation2 + $0x28] sm:$0xff] }
  0x33   : > { %v340_v62 = vld [vmem:[#allocation2 + $0xc8] sm:$0xff] }
  0x35   : > { %1146 = vmatmul.mubr.msk.bf16.gmra.mrb[4].mxu0 %vm487_vm2, %v1284_v6 }
  0x36   : > { %1186 = vmatmul.mubr.msk.bf16.gmra.mrb[4].mxu1 %vm487_vm2, %v1285_v7  ;;  %1149 = vmatprep.mubr.msk.bf16.mxu0 %vm1359_vm1, %v1358_v2  ;;  %v321_v7 = vld [vmem:[#allocation2 + $0x30] sm:$0xff] }
  0x37   : > { %1189 = vmatprep.mubr.msk.bf16.mxu1 %vm1359_vm1, %v1358_v2 }
  0x3d   : > { %1150 = vmatmul.mubr.msk.bf16.gmra.mrb[8].mxu0 %vm487_vm2, %v1286_v8  ;;  %v341_v8 = vld [vmem:[#allocation2 + $0xd0] sm:$0xff] }
  0x3e   : > { %1190 = vmatmul.mubr.msk.bf16.gmra.mrb[8].mxu1 %vm487_vm2, %v1287_v9  ;;  %1153 = vmatprep.mubr.msk.bf16.mxu0 %vm1359_vm1, %v1358_v2 }
  0x3f   : > { %1193 = vmatprep.mubr.msk.bf16.mxu1 %vm1359_vm1, %v1358_v2 }
  0x45   : > { %1154 = vmatmul.mubr.msk.bf16.gmra.mrb[12].mxu0 %vm487_vm2, %v1288_v10  ;;  %v322_v10 = vld [vmem:[#allocation2 + $0x38] sm:$0xff] }
  0x46   : > { %1194 = vmatmul.mubr.msk.bf16.gmra.mrb[12].mxu1 %vm487_vm2, %v1289_v11  ;;  %1157 = vmatprep.mubr.msk.bf16.mxu0 %vm1359_vm1, %v1358_v2 }
  0x47   : > { %1197 = vmatprep.mubr.msk.bf16.mxu1 %vm1359_vm1, %v1358_v2 }
  0x4d   : > { %1158 = vmatmul.mubr.msk.bf16.gmra.mrb[16].mxu0 %vm487_vm2, %v1290_v12 }
  0x4e   : > { %1198 = vmatmul.mubr.msk.bf16.gmra.mrb[16].mxu1 %vm487_vm2, %v1291_v13  ;;  %1161 = vmatprep.mubr.msk.bf16.mxu0 %vm1359_vm1, %v1358_v2 }
  0x4f   : > { %1201 = vmatprep.mubr.msk.bf16.mxu1 %vm1359_vm1, %v1358_v2 }
  0x55   : > { %1162 = vmatmul.mubr.msk.bf16.gmra.mrb[20].mxu0 %vm487_vm2, %v1292_v14  ;;  %v342_v14 = vld [vmem:[#allocation2 + $0xd8] sm:$0xff] }
  0x56   : > { %1202 = vmatmul.mubr.msk.bf16.gmra.mrb[20].mxu1 %vm487_vm2, %v1293_v15  ;;  %1165 = vmatprep.mubr.msk.bf16.mxu0 %vm1359_vm1, %v1358_v2 }
  0x57   : > { %1205 = vmatprep.mubr.msk.bf16.mxu1 %vm1359_vm1, %v1358_v2 }
  0x5d   : > { %1166 = vmatmul.mubr.msk.bf16.gmra.mrb[24].mxu0 %vm487_vm2, %v1294_v16 }
  0x5e   : > { %1206 = vmatmul.mubr.msk.bf16.gmra.mrb[24].mxu1 %vm487_vm2, %v1295_v17  ;;  %1169 = vmatprep.mubr.msk.bf16.mxu0 %vm1359_vm1, %v1358_v2 }
  0x5f   : > { %1209 = vmatprep.mubr.msk.bf16.mxu1 %vm1359_vm1, %v1358_v2 }
  0x65   : > { %1170 = vmatmul.mubr.msk.bf16.gmra.mrb[28].mxu0 %vm487_vm2, %v1296_v18 }
  0x66   : > { %1210 = vmatmul.mubr.msk.bf16.gmra.mrb[28].mxu1 %vm487_vm2, %v1297_v19  ;;  %1173 = vmatprep.mubr.msk.bf16.mxu0 %vm1359_vm1, %v1358_v2 }
  0x67   : > { %1213 = vmatprep.mubr.msk.bf16.mxu1 %vm1359_vm1, %v1358_v2 }
  0x6d   : > { %1174 = vmatmul.mubr.msk.bf16.gmra.mrb[32].mxu0 %vm487_vm2, %v1298_v20 }
  0x6e   : > { %1214 = vmatmul.mubr.msk.bf16.gmra.mrb[32].mxu1 %vm487_vm2, %v1299_v21  ;;  %1177 = vmatprep.mubr.msk.bf16.mxu0 %vm1359_vm1, %v1358_v2 }
  0x75   : > { %1178 = vmatmul.mubr.msk.bf16.gmra.mrb[36].mxu0 %vm487_vm2, %v1300_v22 }
 0x100   : > { %v583_v25 = vpop.f32.mrb[0].mxu0 }
 0x101   : > { %v734_v27 = vadd.f32 %v583_v25, %v315_v23  ;;  %v1143_v28 = vpop.f32.mrb[1].mxu0  ;;  %v663_v29 = vpop.f32.mrb[0].mxu1  ;;  %v323_v23 = vld [vmem:[#allocation2 + $0x40] sm:$0xff] }
 0x102   : > { %v586_v31 = vpop.f32.mrb[2].mxu0  ;;  %v754_v32 = vadd.f32 %v663_v29, %v335_v24  ;;  %v1183_v33 = vpop.f32.mrb[1].mxu1  ;;  %v343_v24 = vld [vmem:[#allocation2 + $0xe0] sm:$0xff] }
 0x103   : > { %772 = vst [vmem:[#allocation2] sm:$0xff] %v734_v27  ;;  %v735_v34 = vadd.f32 %v586_v31, %v316_v26  ;;  %v1144_v35 = vpop.f32.mrb[3].mxu0  ;;  %v666_v36 = vpop.f32.mrb[2].mxu1  ;;  %v324_v26 = vld [vmem:[#allocation2 + $0x48] sm:$0xff] }
 0x104   : > { %792 = vst [vmem:[#allocation2 + $0xa0] sm:$0xff] %v754_v32  ;;  %v755_v37 = vadd.f32 %v666_v36, %v336_v30  ;;  %v1184_v38 = vpop.f32.mrb[3].mxu1  ;;  %v344_v30 = vld [vmem:[#allocation2 + $0xe8] sm:$0xff] }
 0x105   : > { %773 = vst [vmem:[#allocation2 + $0x8] sm:$0xff] %v735_v34 }
 0x106   : > { %793 = vst [vmem:[#allocation2 + $0xa8] sm:$0xff] %v755_v37 }
 0x108   : > { %v591_v41 = vpop.f32.mrb[4].mxu0 }
 0x109   : > { %v736_v43 = vadd.f32 %v591_v41, %v317_v39  ;;  %v1147_v44 = vpop.f32.mrb[5].mxu0  ;;  %v671_v45 = vpop.f32.mrb[4].mxu1  ;;  %v325_v39 = vld [vmem:[#allocation2 + $0x50] sm:$0xff] }
 0x10a   : > { %v594_v47 = vpop.f32.mrb[6].mxu0  ;;  %v756_v48 = vadd.f32 %v671_v45, %v337_v40  ;;  %v1187_v49 = vpop.f32.mrb[5].mxu1  ;;  %v345_v40 = vld [vmem:[#allocation2 + $0xf0] sm:$0xff] }
 0x10b   : > { %774 = vst [vmem:[#allocation2 + $0x10] sm:$0xff] %v736_v43  ;;  %v737_v50 = vadd.f32 %v594_v47, %v318_v42  ;;  %v1148_v51 = vpop.f32.mrb[7].mxu0  ;;  %v674_v52 = vpop.f32.mrb[6].mxu1  ;;  %v326_v42 = vld [vmem:[#allocation2 + $0x58] sm:$0xff] }
 0x10c   : > { %794 = vst [vmem:[#allocation2 + $0xb0] sm:$0xff] %v756_v48  ;;  %v757_v53 = vadd.f32 %v674_v52, %v338_v46  ;;  %v1188_v54 = vpop.f32.mrb[7].mxu1  ;;  %v346_v46 = vld [vmem:[#allocation2 + $0xf8] sm:$0xff] }
 0x10d   : > { %775 = vst [vmem:[#allocation2 + $0x18] sm:$0xff] %v737_v50 }
 0x10e   : > { %795 = vst [vmem:[#allocation2 + $0xb8] sm:$0xff] %v757_v53 }
 0x110   : > { %v599_v57 = vpop.f32.mrb[8].mxu0 }
 0x111   : > { %v738_v59 = vadd.f32 %v599_v57, %v319_v55  ;;  %v1151_v60 = vpop.f32.mrb[9].mxu0  ;;  %v679_v61 = vpop.f32.mrb[8].mxu1  ;;  %v327_v55 = vld [vmem:[#allocation2 + $0x60] sm:$0xff] }
 0x112   : > { %v602_v63 = vpop.f32.mrb[10].mxu0  ;;  %v758_v0 = vadd.f32 %v679_v61, %v339_v56  ;;  %v1191_v1 = vpop.f32.mrb[9].mxu1  ;;  %v347_v56 = vld [vmem:[#allocation2 + $0x100] sm:$0xff] }
 0x113   : > { %776 = vst [vmem:[#allocation2 + $0x20] sm:$0xff] %v738_v59  ;;  %v739_v2 = vadd.f32 %v602_v63, %v320_v58  ;;  %v1152_v3 = vpop.f32.mrb[11].mxu0  ;;  %v682_v4 = vpop.f32.mrb[10].mxu1  ;;  %v328_v58 = vld [vmem:[#allocation2 + $0x68] sm:$0xff] }
 0x114   : > { %796 = vst [vmem:[#allocation2 + $0xc0] sm:$0xff] %v758_v0  ;;  %v759_v5 = vadd.f32 %v682_v4, %v340_v62  ;;  %v1192_v6 = vpop.f32.mrb[11].mxu1  ;;  %v348_v62 = vld [vmem:[#allocation2 + $0x108] sm:$0xff] }
 0x115   : > { %777 = vst [vmem:[#allocation2 + $0x28] sm:$0xff] %v739_v2 }
 0x116   : > { %797 = vst [vmem:[#allocation2 + $0xc8] sm:$0xff] %v759_v5 }
 0x118   : > { %v607_v9 = vpop.f32.mrb[12].mxu0 }
 0x119   : > { %v740_v11 = vadd.f32 %v607_v9, %v321_v7  ;;  %v1155_v12 = vpop.f32.mrb[13].mxu0  ;;  %v687_v13 = vpop.f32.mrb[12].mxu1  ;;  %v329_v7 = vld [vmem:[#allocation2 + $0x70] sm:$0xff] }
 0x11a   : > { %v610_v15 = vpop.f32.mrb[14].mxu0  ;;  %v760_v16 = vadd.f32 %v687_v13, %v341_v8  ;;  %v1195_v17 = vpop.f32.mrb[13].mxu1  ;;  %v349_v8 = vld [vmem:[#allocation2 + $0x110] sm:$0xff] }
 0x11b   : > { %778 = vst [vmem:[#allocation2 + $0x30] sm:$0xff] %v740_v11  ;;  %v741_v18 = vadd.f32 %v610_v15, %v322_v10  ;;  %v1156_v19 = vpop.f32.mrb[15].mxu0  ;;  %v690_v20 = vpop.f32.mrb[14].mxu1  ;;  %v330_v10 = vld [vmem:[#allocation2 + $0x78] sm:$0xff] }
 0x11c   : > { %798 = vst [vmem:[#allocation2 + $0xd0] sm:$0xff] %v760_v16  ;;  %v761_v21 = vadd.f32 %v690_v20, %v342_v14  ;;  %v1196_v22 = vpop.f32.mrb[15].mxu1  ;;  %v350_v14 = vld [vmem:[#allocation2 + $0x118] sm:$0xff] }
 0x11d   : > { %779 = vst [vmem:[#allocation2 + $0x38] sm:$0xff] %v741_v18 }
 0x11e   : > { %799 = vst [vmem:[#allocation2 + $0xd8] sm:$0xff] %v761_v21 }
 0x120   : > { %v615_v25 = vpop.f32.mrb[16].mxu0 }
 0x121   : > { %v742_v27 = vadd.f32 %v615_v25, %v323_v23  ;;  %v1159_v28 = vpop.f32.mrb[17].mxu0  ;;  %v695_v29 = vpop.f32.mrb[16].mxu1  ;;  %v331_v23 = vld [vmem:[#allocation2 + $0x80] sm:$0xff] }
 0x122   : > { %v618_v31 = vpop.f32.mrb[18].mxu0  ;;  %v762_v32 = vadd.f32 %v695_v29, %v343_v24  ;;  %v1199_v33 = vpop.f32.mrb[17].mxu1  ;;  %v351_v24 = vld [vmem:[#allocation2 + $0x120] sm:$0xff] }
 0x123   : > { %780 = vst [vmem:[#allocation2 + $0x40] sm:$0xff] %v742_v27  ;;  %v743_v34 = vadd.f32 %v618_v31, %v324_v26  ;;  %v1160_v35 = vpop.f32.mrb[19].mxu0  ;;  %v698_v36 = vpop.f32.mrb[18].mxu1  ;;  %v332_v26 = vld [vmem:[#allocation2 + $0x88] sm:$0xff] }
 0x124   : > { %800 = vst [vmem:[#allocation2 + $0xe0] sm:$0xff] %v762_v32  ;;  %v763_v37 = vadd.f32 %v698_v36, %v344_v30  ;;  %v1200_v38 = vpop.f32.mrb[19].mxu1  ;;  %v352_v30 = vld [vmem:[#allocation2 + $0x128] sm:$0xff] }
 0x125   : > { %781 = vst [vmem:[#allocation2 + $0x48] sm:$0xff] %v743_v34 }
 0x126   : > { %801 = vst [vmem:[#allocation2 + $0xe8] sm:$0xff] %v763_v37 }
 0x128   : > { %v623_v41 = vpop.f32.mrb[20].mxu0 }
 0x129   : > { %v744_v43 = vadd.f32 %v623_v41, %v325_v39  ;;  %v1163_v44 = vpop.f32.mrb[21].mxu0  ;;  %v703_v45 = vpop.f32.mrb[20].mxu1  ;;  %v333_v39 = vld [vmem:[#allocation2 + $0x90] sm:$0xff]  ;;  %v334_v41 = vld [vmem:[#allocation2 + $0x98] sm:$0xff] }
 0x12a   : > { %v626_v47 = vpop.f32.mrb[22].mxu0  ;;  %v764_v48 = vadd.f32 %v703_v45, %v345_v40  ;;  %v1203_v49 = vpop.f32.mrb[21].mxu1 }
 0x12b   : > { %782 = vst [vmem:[#allocation2 + $0x50] sm:$0xff] %v744_v43  ;;  %v745_v50 = vadd.f32 %v626_v47, %v326_v42  ;;  %v1164_v51 = vpop.f32.mrb[23].mxu0  ;;  %v706_v52 = vpop.f32.mrb[22].mxu1  ;;  %v814_v47 = vld [vmem:[#allocation2] sm:$0xff] (!%p1115_p11)  ;;  %v815_v49 = vld [vmem:[#allocation2 + $0x8] sm:$0xff] (!%p1115_p11) }
 0x12c   : > { %802 = vst [vmem:[#allocation2 + $0xf0] sm:$0xff] %v764_v48  ;;  %v765_v53 = vadd.f32 %v706_v52, %v346_v46  ;;  %v1204_v54 = vpop.f32.mrb[23].mxu1  ;;  %v1510_v48 = vld [vmem:[%s1611_s2] ss:$0 sm:$0xff] (!%p1115_p11)  ;;  %v816_v52 = vld [vmem:[#allocation2 + $0x10] sm:$0xff] (!%p1115_p11) }
 0x12d   : > { %783 = vst [vmem:[#allocation2 + $0x58] sm:$0xff] %v745_v50  ;;  %v859_v50 = vadd.f32 (!%p1115_p11), %v1510_v48, %v814_v47  ;;  %v860_v51 = vadd.f32 (!%p1115_p11), %v1510_v48, %v815_v49  ;;  %v818_v54 = vld [vmem:[#allocation2 + $0x20] sm:$0xff] (!%p1115_p11) }
 0x12e   : > { %803 = vst [vmem:[#allocation2 + $0xf8] sm:$0xff] %v765_v53  ;;  %v817_v53 = vld [vmem:[#allocation2 + $0x18] sm:$0xff] (!%p1115_p11) }
 0x12f   : > { %897 = vst [vmem:[%s1445_s14] sm:$0xff] (!%p1115_p11), %v859_v50  ;;  %898 = vst [vmem:[%s1445_s14 + $0x8] sm:$0xff] (!%p1115_p11), %v860_v51 }
 0x130   : > { %v631_v57 = vpop.f32.mrb[24].mxu0 }
 0x131   : > { %v746_v59 = vadd.f32 %v631_v57, %v327_v55  ;;  %v1167_v60 = vpop.f32.mrb[25].mxu0  ;;  %v711_v61 = vpop.f32.mrb[24].mxu1  ;;  %v861_v55 = vadd.f32 (!%p1115_p11), %v1510_v48, %v816_v52  ;;  %v863_v57 = vadd.f32 (!%p1115_p11), %v1510_v48, %v818_v54 }
 0x132   : > { %v634_v63 = vpop.f32.mrb[26].mxu0  ;;  %v766_v0 = vadd.f32 %v711_v61, %v347_v56  ;;  %v1207_v1 = vpop.f32.mrb[25].mxu1  ;;  %v862_v56 = vadd.f32 (!%p1115_p11), %v1510_v48, %v817_v53  ;;  %v821_v60 = vld [vmem:[#allocation2 + $0x38] sm:$0xff] (!%p1115_p11) }
 0x133   : > { %784 = vst [vmem:[#allocation2 + $0x60] sm:$0xff] %v746_v59  ;;  %v747_v2 = vadd.f32 %v634_v63, %v328_v58  ;;  %v1168_v3 = vpop.f32.mrb[27].mxu0  ;;  %v714_v4 = vpop.f32.mrb[26].mxu1  ;;  %v819_v58 = vld [vmem:[#allocation2 + $0x28] sm:$0xff] (!%p1115_p11)  ;;  %v820_v59 = vld [vmem:[#allocation2 + $0x30] sm:$0xff] (!%p1115_p11)  ;;  %v866_v63 = vadd.f32 (!%p1115_p11), %v1510_v48, %v821_v60  ;;  %899 = vst [vmem:[%s1445_s14 + $0x10] sm:$0xff] (!%p1115_p11), %v861_v55 }
 0x134   : > { %804 = vst [vmem:[#allocation2 + $0x100] sm:$0xff] %v766_v0  ;;  %v767_v5 = vadd.f32 %v714_v4, %v348_v62  ;;  %v1208_v6 = vpop.f32.mrb[27].mxu1  ;;  %v864_v61 = vadd.f32 (!%p1115_p11), %v1510_v48, %v819_v58  ;;  %v865_v62 = vadd.f32 (!%p1115_p11), %v1510_v48, %v820_v59  ;;  %v822_v0 = vld [vmem:[#allocation2 + $0x40] sm:$0xff] (!%p1115_p11)  ;;  %v823_v1 = vld [vmem:[#allocation2 + $0x48] sm:$0xff] (!%p1115_p11)  ;;  %900 = vst [vmem:[%s1445_s14 + $0x18] sm:$0xff] (!%p1115_p11), %v862_v56 }
 0x135   : > { %785 = vst [vmem:[#allocation2 + $0x68] sm:$0xff] %v747_v2  ;;  %v824_v2 = vld [vmem:[#allocation2 + $0x50] sm:$0xff] (!%p1115_p11)  ;;  %901 = vst [vmem:[%s1445_s14 + $0x20] sm:$0xff] (!%p1115_p11), %v863_v57  ;;  %v867_v3 = vadd.f32 (!%p1115_p11), %v1510_v48, %v822_v0  ;;  %v868_v4 = vadd.f32 (!%p1115_p11), %v1510_v48, %v823_v1  ;;  %v825_v6 = vld [vmem:[#allocation2 + $0x58] sm:$0xff] (!%p1115_p11) }
 0x136   : > { %805 = vst [vmem:[#allocation2 + $0x108] sm:$0xff] %v767_v5  ;;  %v869_v5 = vadd.f32 (!%p1115_p11), %v1510_v48, %v824_v2  ;;  %902 = vst [vmem:[%s1445_s14 + $0x28] sm:$0xff] (!%p1115_p11), %v864_v61 }
 0x137   : > { %903 = vst [vmem:[%s1445_s14 + $0x30] sm:$0xff] (!%p1115_p11), %v865_v62  ;;  %904 = vst [vmem:[%s1445_s14 + $0x38] sm:$0xff] (!%p1115_p11), %v866_v63 }
 0x138   : > { %v639_v9 = vpop.f32.mrb[28].mxu0  ;;  %905 = vst [vmem:[%s1445_s14 + $0x40] sm:$0xff] (!%p1115_p11), %v867_v3  ;;  %906 = vst [vmem:[%s1445_s14 + $0x48] sm:$0xff] (!%p1115_p11), %v868_v4 }
 0x139   : > { %v748_v11 = vadd.f32 %v639_v9, %v329_v7  ;;  %v1171_v12 = vpop.f32.mrb[29].mxu0  ;;  %v719_v13 = vpop.f32.mrb[28].mxu1  ;;  %v870_v9 = vadd.f32 (!%p1115_p11), %v1510_v48, %v825_v6  ;;  %907 = vst [vmem:[%s1445_s14 + $0x50] sm:$0xff] (!%p1115_p11), %v869_v5 }
 0x13a   : > { %v642_v15 = vpop.f32.mrb[30].mxu0  ;;  %v768_v16 = vadd.f32 %v719_v13, %v349_v8  ;;  %v1211_v17 = vpop.f32.mrb[29].mxu1  ;;  %v826_v7 = vld [vmem:[#allocation2 + $0x60] sm:$0xff] (!%p1115_p11) }
 0x13b   : > { %786 = vst [vmem:[#allocation2 + $0x70] sm:$0xff] %v748_v11  ;;  %v749_v18 = vadd.f32 %v642_v15, %v330_v10  ;;  %v1172_v19 = vpop.f32.mrb[31].mxu0  ;;  %v722_v20 = vpop.f32.mrb[30].mxu1  ;;  %v871_v10 = vadd.f32 (!%p1115_p11), %v1510_v48, %v826_v7  ;;  %908 = vst [vmem:[%s1445_s14 + $0x58] sm:$0xff] (!%p1115_p11), %v870_v9  ;;  %v846_v49 = vld [vmem:[#allocation2 + $0x100] sm:$0xff] (!%p1115_p11) }
 0x13c   : > { %806 = vst [vmem:[#allocation2 + $0x110] sm:$0xff] %v768_v16  ;;  %v769_v21 = vadd.f32 %v722_v20, %v350_v14  ;;  %v1212_v22 = vpop.f32.mrb[31].mxu1  ;;  %v827_v8 = vld [vmem:[#allocation2 + $0x68] sm:$0xff] (!%p1115_p11)  ;;  %v891_v52 = vadd.f32 (!%p1115_p11), %v1510_v48, %v846_v49 }
 0x13d   : > { %787 = vst [vmem:[#allocation2 + $0x78] sm:$0xff] %v749_v18  ;;  %v872_v11 = vadd.f32 (!%p1115_p11), %v1510_v48, %v827_v8  ;;  %909 = vst [vmem:[%s1445_s14 + $0x60] sm:$0xff] (!%p1115_p11), %v871_v10  ;;  %v847_v50 = vld [vmem:[#allocation2 + $0x108] sm:$0xff] (!%p1115_p11) }
 0x13e   : > { %807 = vst [vmem:[#allocation2 + $0x118] sm:$0xff] %v769_v21  ;;  %v892_v53 = vadd.f32 (!%p1115_p11), %v1510_v48, %v847_v50  ;;  %929 = vst [vmem:[%s1445_s14 + $0x100] sm:$0xff] (!%p1115_p11), %v891_v52 }
 0x13f   : > { %910 = vst [vmem:[%s1445_s14 + $0x68] sm:$0xff] (!%p1115_p11), %v872_v11 }
 0x140   : > { %v647_v25 = vpop.f32.mrb[32].mxu0  ;;  %930 = vst [vmem:[%s1445_s14 + $0x108] sm:$0xff] (!%p1115_p11), %v892_v53 }
 0x141   : > { %v750_v27 = vadd.f32 %v647_v25, %v331_v23  ;;  %v1175_v28 = vpop.f32.mrb[33].mxu0  ;;  %v727_v29 = vpop.f32.mrb[32].mxu1  ;;  %v835_v25 = vld [vmem:[#allocation2 + $0xa8] sm:$0xff] (!%p1115_p11) }
 0x142   : > { %v650_v31 = vpop.f32.mrb[34].mxu0  ;;  %v770_v32 = vadd.f32 %v727_v29, %v351_v24  ;;  %v1215_v33 = vpop.f32.mrb[33].mxu1  ;;  %v828_v12 = vld [vmem:[#allocation2 + $0x70] sm:$0xff] (!%p1115_p11)  ;;  %v834_v24 = vld [vmem:[#allocation2 + $0xa0] sm:$0xff] (!%p1115_p11)  ;;  %v880_v28 = vadd.f32 (!%p1115_p11), %v1510_v48, %v835_v25 }
 0x143   : > { %788 = vst [vmem:[#allocation2 + $0x80] sm:$0xff] %v750_v27  ;;  %v751_v34 = vadd.f32 %v650_v31, %v332_v26  ;;  %v1176_v35 = vpop.f32.mrb[35].mxu0  ;;  %v730_v36 = vpop.f32.mrb[34].mxu1  ;;  %v873_v15 = vadd.f32 (!%p1115_p11), %v1510_v48, %v828_v12  ;;  %v836_v26 = vld [vmem:[#allocation2 + $0xb0] sm:$0xff] (!%p1115_p11)  ;;  %v879_v27 = vadd.f32 (!%p1115_p11), %v1510_v48, %v834_v24  ;;  %v838_v31 = vld [vmem:[#allocation2 + $0xc0] sm:$0xff] (!%p1115_p11) }
 0x144   : > { %808 = vst [vmem:[#allocation2 + $0x120] sm:$0xff] %v770_v32  ;;  %v771_v37 = vadd.f32 %v730_v36, %v352_v30  ;;  %v1216_v38 = vpop.f32.mrb[35].mxu1  ;;  %v829_v13 = vld [vmem:[#allocation2 + $0x78] sm:$0xff] (!%p1115_p11)  ;;  %v881_v29 = vadd.f32 (!%p1115_p11), %v1510_v48, %v836_v26  ;;  %v839_v32 = vld [vmem:[#allocation2 + $0xc8] sm:$0xff] (!%p1115_p11)  ;;  %v840_v36 = vld [vmem:[#allocation2 + $0xd0] sm:$0xff] (!%p1115_p11) }
 0x145   : > { %789 = vst [vmem:[#allocation2 + $0x88] sm:$0xff] %v751_v34  ;;  %v874_v16 = vadd.f32 (!%p1115_p11), %v1510_v48, %v829_v13  ;;  %911 = vst [vmem:[%s1445_s14 + $0x70] sm:$0xff] (!%p1115_p11), %v873_v15  ;;  %v837_v30 = vld [vmem:[#allocation2 + $0xb8] sm:$0xff] (!%p1115_p11)  ;;  %v883_v34 = vadd.f32 (!%p1115_p11), %v1510_v48, %v838_v31  ;;  %v884_v35 = vadd.f32 (!%p1115_p11), %v1510_v48, %v839_v32  ;;  %v842_v38 = vld [vmem:[#allocation2 + $0xe0] sm:$0xff] (!%p1115_p11) }
 0x146   : > { %809 = vst [vmem:[#allocation2 + $0x128] sm:$0xff] %v771_v37  ;;  %v882_v33 = vadd.f32 (!%p1115_p11), %v1510_v48, %v837_v30  ;;  %v841_v37 = vld [vmem:[#allocation2 + $0xd8] sm:$0xff] (!%p1115_p11)  ;;  %917 = vst [vmem:[%s1445_s14 + $0xa0] sm:$0xff] (!%p1115_p11), %v879_v27  ;;  %v848_v51 = vld [vmem:[#allocation2 + $0x110] sm:$0xff] (!%p1115_p11) }
 0x147   : > { %813 = sbr.rel (%p1115_p11) target bundleno = 344 (0x158), region = 40  ;;  %912 = vst [vmem:[%s1445_s14 + $0x78] sm:$0xff] (!%p1115_p11), %v874_v16  ;;  %918 = vst [vmem:[%s1445_s14 + $0xa8] sm:$0xff] (!%p1115_p11), %v880_v28  ;;  %v893_v54 = vadd.f32 (!%p1115_p11), %v1510_v48, %v848_v51  ;;  %v849_v55 = vld [vmem:[#allocation2 + $0x118] sm:$0xff] (!%p1115_p11) }
 0x148   : > { %v655_v40 = vpop.f32.mrb[36].mxu0  ;;  %919 = vst [vmem:[%s1445_s14 + $0xb0] sm:$0xff] (!%p1115_p11), %v881_v29  ;;  %920 = vst [vmem:[%s1445_s14 + $0xb8] sm:$0xff] (!%p1115_p11), %v882_v33  ;;  %v894_v58 = vadd.f32 (!%p1115_p11), %v1510_v48, %v849_v55 }
 0x149   : > { %v752_v42 = vadd.f32 %v655_v40, %v333_v39  ;;  %v1179_v43 = vpop.f32.mrb[37].mxu0  ;;  %v885_v39 = vadd.f32 (!%p1115_p11), %v1510_v48, %v840_v36  ;;  %v886_v40 = vadd.f32 (!%p1115_p11), %v1510_v48, %v841_v37  ;;  %921 = vst [vmem:[%s1445_s14 + $0xc0] sm:$0xff] (!%p1115_p11), %v883_v34  ;;  %922 = vst [vmem:[%s1445_s14 + $0xc8] sm:$0xff] (!%p1115_p11), %v884_v35 }
 0x14a   : > { %v658_v44 = vpop.f32.mrb[38].mxu0  ;;  %v830_v14 = vld [vmem:[#allocation2 + $0x80] sm:$0xff] (!%p1115_p11)  ;;  %v844_v43 = vld [vmem:[#allocation2 + $0xf0] sm:$0xff] (!%p1115_p11)  ;;  %931 = vst [vmem:[%s1445_s14 + $0x110] sm:$0xff] (!%p1115_p11), %v893_v54  ;;  %932 = vst [vmem:[%s1445_s14 + $0x118] sm:$0xff] (!%p1115_p11), %v894_v58 }
 0x14b   : > { %790 = vst [vmem:[#allocation2 + $0x90] sm:$0xff] %v752_v42  ;;  %v753_v45 = vadd.f32 %v658_v44, %v334_v41  ;;  %v1180_v46 = vpop.f32.mrb[39].mxu0  ;;  %v875_v17 = vadd.f32 (!%p1115_p11), %v1510_v48, %v830_v14  ;;  %v887_v41 = vadd.f32 (!%p1115_p11), %v1510_v48, %v842_v38  ;;  %v843_v42 = vld [vmem:[#allocation2 + $0xe8] sm:$0xff] (!%p1115_p11)  ;;  %v845_v44 = vld [vmem:[#allocation2 + $0xf8] sm:$0xff] (!%p1115_p11)  ;;  %923 = vst [vmem:[%s1445_s14 + $0xd0] sm:$0xff] (!%p1115_p11), %v885_v39 }
 0x14c   : > { %v831_v18 = vld [vmem:[#allocation2 + $0x88] sm:$0xff] (!%p1115_p11)  ;;  %v889_v46 = vadd.f32 (!%p1115_p11), %v1510_v48, %v844_v43  ;;  %v890_v47 = vadd.f32 (!%p1115_p11), %v1510_v48, %v845_v44  ;;  %924 = vst [vmem:[%s1445_s14 + $0xd8] sm:$0xff] (!%p1115_p11), %v886_v40  ;;  %v850_v56 = vld [vmem:[#allocation2 + $0x120] sm:$0xff] (!%p1115_p11) }
 0x14d   : > { %791 = vst [vmem:[#allocation2 + $0x98] sm:$0xff] %v753_v45  ;;  %v876_v21 = vadd.f32 (!%p1115_p11), %v1510_v48, %v831_v18  ;;  %913 = vst [vmem:[%s1445_s14 + $0x80] sm:$0xff] (!%p1115_p11), %v875_v17  ;;  %v888_v45 = vadd.f32 (!%p1115_p11), %v1510_v48, %v843_v42  ;;  %v851_v57 = vld [vmem:[#allocation2 + $0x128] sm:$0xff] (!%p1115_p11)  ;;  %v895_v59 = vadd.f32 (!%p1115_p11), %v1510_v48, %v850_v56 }
 0x14e   : > { %925 = vst [vmem:[%s1445_s14 + $0xe0] sm:$0xff] %v887_v41  ;;  %927 = vst [vmem:[%s1445_s14 + $0xf0] sm:$0xff] %v889_v46  ;;  %v896_v60 = vadd.f32 %v1510_v48, %v851_v57 }
 0x14f   : > { %914 = vst [vmem:[%s1445_s14 + $0x88] sm:$0xff] %v876_v21  ;;  %926 = vst [vmem:[%s1445_s14 + $0xe8] sm:$0xff] %v888_v45 }
 0x150   : > { %928 = vst [vmem:[%s1445_s14 + $0xf8] sm:$0xff] %v890_v47  ;;  %933 = vst [vmem:[%s1445_s14 + $0x120] sm:$0xff] %v895_v59 }
 0x151   : > { %934 = vst [vmem:[%s1445_s14 + $0x128] sm:$0xff] %v896_v60 }
 0x152   : > { %v832_v19 = vld [vmem:[#allocation2 + $0x90] sm:$0xff] }
 0x153   : > { %v877_v22 = vadd.f32 %v1510_v48, %v832_v19 }
 0x154   : > { %v833_v20 = vld [vmem:[#allocation2 + $0x98] sm:$0xff] }
 0x155   : > { %v878_v23 = vadd.f32 %v1510_v48, %v833_v20  ;;  %915 = vst [vmem:[%s1445_s14 + $0x90] sm:$0xff] %v877_v22 }
 0x157   : > { %916 = vst [vmem:[%s1445_s14 + $0x98] sm:$0xff] %v878_v23 }
 0x158 PF: > { %s13_s18 = sadd.s32 1, %s1355_s18   ;;  %s1614_s23 = sld [smem:[#allocation3_spill]] }
 0x159   : > { %p10_p12 = scmp.ge.s32.totalorder %s13_s18, 10   ;;  %s1615_s12 = smov %s1343_s15 }
 0x15a   : > { %s1616_s13 = smov %s1347_s16  ;;  %s1617_s14 = smov %s1351_s17 }
 0x15b   : > { %s1618_s15 = smov %s1622_s19  ;;  %s1619_s16 = smov %s1626_s20 }
 0x15c   :  { %12 = sbr.rel (!%p10_p12) target bundleno = 4 (0x4), region = 73 }
 0x15e   : > { %s1620_s17 = smov %s1614_s23 }

// kernel: decoder_forward.53
= control target key start
LH: loop header
LB: loop body
LE: loop exit
PB: predicated region body
PF: predicated region fallthrough
CT: control target
= control target key end

     0   :  { %s1390_s12 = smov 0   ;;  %s1392_s13 = smov 0   ;;  %s1619_s0 = inlined_call_operand.vmem [shape: bf16[2,3,304,16], index: 0, kind: input, shape index: {}]   ;;  %s1620_s1 = inlined_call_operand.vmem [shape: bf16[2,16,128], index: 1, kind: input, shape index: {}]   ;;  %s1621_s2 = inlined_call_operand.vmem [shape: f32[1,128], index: 2, kind: input, shape index: {}]   ;;  %s1622_s3 = inlined_call_operand.vmem [shape: f32[2,2,304,128], index: 3, kind: output, shape index: {}]  }
   0x1   :  { %s1394_s14 = smov 0   ;;  %s1396_s15 = smov 0  }
   0x2   :  { %s1398_s16 = smov 0   ;;  %s1400_s17 = smov 0  }
   0x3   :  { %s1402_s18 = smov 0  }
   0x4 LB: > { %s28_s19 = sadd.s32 1, %s1353_s15  ;;  %s35_s20 = sadd.s32 1, %s1357_s16  ;;  %s1365_s18 = sphi %s1402_s18, %s13_s18   ;;  %s1361_s17 = sphi %s1400_s17, %s1630_s17   ;;  %s1357_s16 = sphi %s1398_s16, %s1629_s16   ;;  %s1353_s15 = sphi %s1396_s15, %s1628_s15   ;;  %s1349_s14 = sphi %s1394_s14, %s1627_s14   ;;  %s1345_s13 = sphi %s1392_s13, %s1626_s13   ;;  %s1341_s12 = sphi %s1390_s12, %s1625_s12  }
   0x5   : > { %p29_p0 = scmp.ge.s32.totalorder %s28_s19, 2  ;;  %p1078_p1 = scmp.ge.s32.totalorder %s1365_s18, 1 }
   0x6   : > { %p194_p2 = scmp.lt.s32.totalorder %s1365_s18, 9  ;;  %s39_s21 = sadd.s32 1, %s1361_s17 }
   0x7   : > { %s1632_s19 = smov (%p29_p0, %s28_s19), 0  ;;  %s1634_s20 = smov (!%p29_p0, %s35_s20), %s1357_s16 }
   0x8   : > { %p195_p3 = pnand %p1078_p1, %p194_p2  ;;  %p37_p4 = scmp.ge.s32.totalorder %s1634_s20, 2 }
   0x9   : > { %s240_s22 = sadd.s32 (!%p195_p3), %s1341_s12, %s1345_s13  ;;  %p242_p6 = scmp.lt.s32.totalorder (!%p195_p3), %s1349_s14, 1 }
   0xa   : > { %s1636_s20 = smov (%p37_p4, %s1634_s20), 0  ;;  %s1638_s21 = smov (!%p37_p4, %s39_s21), %s1361_s17 }
   0xb   : > { %p41_p5 = scmp.ge.s32.totalorder %s1638_s21, 2  ;;  %198 = sbr.rel (%p195_p3) target bundleno = 344 (0x158), region = 32 }
   0xc   : > { %p244_p7 = scmp.lt.s32.totalorder (!%p195_p3), %s240_s22, 2  ;;  %p256_p8 = scmp.lt.s32.totalorder (!%p195_p3), %s1341_s12, 1 }
   0xd   : > { %s1640_s21 = smov (%p41_p5, %s1638_s21), 0  ;;  %p264_p9 = scmp.lt.s32.totalorder (!%p195_p3), %s1345_s13, 1 }
   0xe   : > { %1623 = sst [smem:[#allocation3_spill]] %s1640_s21  ;;  %p1083_p10 = scmp.ne.s32.totalorder (!%p195_p3), %s1341_s12, 0 }
  0x12   : > { %s1642_s14 = smov (!%p242_p6, %s1349_s14), 1  ;;  %s1644_s22 = smov (!%p244_p7, %s240_s22), 2 }
  0x13   : > { %s1229_s23 = smul.u32 114, %s1642_s14  ;;  %s1646_s13 = smov (!%p264_p9, %s1345_s13), 1  ;;  %v1367_v0 = vmov (!%p1083_p10), 0.0  }
  0x14   : > { %s1228_s24 = smul.u32 38, %s1644_s22  ;;  %280 = vst [vmem:[#allocation2] sm:$0xff] (!%p1083_p10), %v1367_v0  ;;  %281 = vst [vmem:[#allocation2 + $0x8] sm:$0xff] (!%p1083_p10), %v1367_v0 }
  0x15   : > { %s257_s25 = scalar_select %p256_p8, %s1341_s12, 1 }
  0x16   : > { %s251_s26 = sadd.s32 %s1229_s23, %s1228_s24  ;;  %s1231_s27 = smul.u32 76, %s1642_s14  ;;  %282 = vst [vmem:[#allocation2 + $0x10] sm:$0xff] (!%p1083_p10), %v1367_v0  ;;  %283 = vst [vmem:[#allocation2 + $0x18] sm:$0xff] (!%p1083_p10), %v1367_v0 }
  0x17   : > { %s1079_s28 = sshll.u32 %s251_s26, 2  ;;  %s1127_s29 = sshll.u32 %s257_s25, 3  ;;  %284 = vst [vmem:[#allocation2 + $0x20] sm:$0xff] (!%p1083_p10), %v1367_v0  ;;  %285 = vst [vmem:[#allocation2 + $0x28] sm:$0xff] (!%p1083_p10), %v1367_v0 }
  0x18   : > { %s1444_s5 = scalar_lea.vmem %s1619_s0, %s1079_s28  ;;  %s1449_s8 = scalar_lea.vmem %s1620_s1, %s1127_s29  ;;  %286 = vst [vmem:[#allocation2 + $0x30] sm:$0xff] (!%p1083_p10), %v1367_v0  ;;  %287 = vst [vmem:[#allocation2 + $0x38] sm:$0xff] (!%p1083_p10), %v1367_v0 }
  0x19   : > { %s1230_s9 = smul.u32 38, %s1646_s13  ;;  %288 = vst [vmem:[#allocation2 + $0x40] sm:$0xff] (!%p1083_p10), %v1367_v0  ;;  %289 = vst [vmem:[#allocation2 + $0x48] sm:$0xff] (!%p1083_p10), %v1367_v0 }
  0x1a   : > { %279 = sbr.rel (%p1083_p10) target bundleno = 40 (0x28), region = 36  ;;  %290 = vst [vmem:[#allocation2 + $0x50] sm:$0xff] (!%p1083_p10), %v1367_v0  ;;  %291 = vst [vmem:[#allocation2 + $0x58] sm:$0xff] (!%p1083_p10), %v1367_v0 }
  0x1b   : > { %s271_s10 = sadd.s32 %s1231_s27, %s1230_s9  ;;  %292 = vst [vmem:[#allocation2 + $0x60] sm:$0xff] (!%p1083_p10), %v1367_v0  ;;  %293 = vst [vmem:[#allocation2 + $0x68] sm:$0xff] (!%p1083_p10), %v1367_v0 }
  0x1c   : > { %s1082_s11 = sshll.u32 %s271_s10, 3  ;;  %294 = vst [vmem:[#allocation2 + $0x70] sm:$0xff] (!%p1083_p10), %v1367_v0  ;;  %295 = vst [vmem:[#allocation2 + $0x78] sm:$0xff] (!%p1083_p10), %v1367_v0 }
  0x1d   : > { %s1455_s14 = scalar_lea.vmem %s1622_s3, %s1082_s11  ;;  %296 = vst [vmem:[#allocation2 + $0x80] sm:$0xff] (!%p1083_p10), %v1367_v0  ;;  %297 = vst [vmem:[#allocation2 + $0x88] sm:$0xff] (!%p1083_p10), %v1367_v0 }
  0x1e   : > { %298 = vst [vmem:[#allocation2 + $0x90] sm:$0xff] (!%p1083_p10), %v1367_v0  ;;  %299 = vst [vmem:[#allocation2 + $0x98] sm:$0xff] (!%p1083_p10), %v1367_v0 }
  0x1f   : > { %300 = vst [vmem:[#allocation2 + $0xa0] sm:$0xff] (!%p1083_p10), %v1367_v0  ;;  %301 = vst [vmem:[#allocation2 + $0xa8] sm:$0xff] (!%p1083_p10), %v1367_v0 }
  0x20   : > { %302 = vst [vmem:[#allocation2 + $0xb0] sm:$0xff] (!%p1083_p10), %v1367_v0  ;;  %303 = vst [vmem:[#allocation2 + $0xb8] sm:$0xff] (!%p1083_p10), %v1367_v0 }
  0x21   : > { %304 = vst [vmem:[#allocation2 + $0xc0] sm:$0xff] %v1367_v0  ;;  %305 = vst [vmem:[#allocation2 + $0xc8] sm:$0xff] %v1367_v0 }
  0x22   : > { %306 = vst [vmem:[#allocation2 + $0xd0] sm:$0xff] %v1367_v0  ;;  %307 = vst [vmem:[#allocation2 + $0xd8] sm:$0xff] %v1367_v0 }
  0x23   : > { %308 = vst [vmem:[#allocation2 + $0xe0] sm:$0xff] %v1367_v0  ;;  %309 = vst [vmem:[#allocation2 + $0xe8] sm:$0xff] %v1367_v0 }
  0x24   : > { %310 = vst [vmem:[#allocation2 + $0xf0] sm:$0xff] %v1367_v0  ;;  %311 = vst [vmem:[#allocation2 + $0xf8] sm:$0xff] %v1367_v0 }
  0x25   : > { %312 = vst [vmem:[#allocation2 + $0x100] sm:$0xff] %v1367_v0  ;;  %313 = vst [vmem:[#allocation2 + $0x108] sm:$0xff] %v1367_v0 }
  0x26   : > { %314 = vst [vmem:[#allocation2 + $0x110] sm:$0xff] %v1367_v0  ;;  %315 = vst [vmem:[#allocation2 + $0x118] sm:$0xff] %v1367_v0 }
  0x27   : > { %316 = vst [vmem:[#allocation2 + $0x120] sm:$0xff] %v1367_v0  ;;  %317 = vst [vmem:[#allocation2 + $0x128] sm:$0xff] %v1367_v0 }
  0x28 PF: > { %v1291_v1 = vld [vmem:[%s1449_s8] sm:$0xff]   ;;  %v1368_v2 = vmov 0.0   ;;  %vm1369_vm0 = vmmov 0   ;;  %vm497_vm1 = vcmask 130048   ;;  %v1293_v4 = vld [vmem:[%s1444_s5 + $0x50] sm:$0xff]   ;;  %v1294_v5 = vld [vmem:[%s1444_s5 + $0x8] sm:$0xff]  }
  0x29   : > { %1148 = vmatprep.subr.bf16.mxu0 %v1368_v2  ;;  %v1292_v3 = vld [vmem:[%s1444_s5] sm:$0xff]   ;;  %1226 = vmatprep.subr.bf16.mxu1 %v1368_v2  ;;  %v1295_v6 = vld [vmem:[%s1444_s5 + $0x58] sm:$0xff]   ;;  %v1296_v7 = vld [vmem:[%s1444_s5 + $0x10] sm:$0xff]   ;;  %p1123_p11 = scmp.ne.s32.totalorder %s1341_s12, 1 }
  0x2a   : > { %1149 = vmatpush3.bf16.msra.mxu0 %v1291_v1  ;;  %1150 = vmatprep.mubr.msk.bf16.mxu0 %vm1369_vm0, %v1368_v2  ;;  %v1297_v8 = vld [vmem:[%s1444_s5 + $0x60] sm:$0xff]   ;;  %v1298_v9 = vld [vmem:[%s1444_s5 + $0x18] sm:$0xff]   ;;  %v1299_v10 = vld [vmem:[%s1444_s5 + $0x68] sm:$0xff]  }
  0x2b   : > { %1227 = vmatpush3.bf16.msra.mxu1 %v1291_v1  ;;  %1190 = vmatprep.mubr.msk.bf16.mxu1 %vm1369_vm0, %v1368_v2  ;;  %v1300_v11 = vld [vmem:[%s1444_s5 + $0x20] sm:$0xff]   ;;  %v1301_v12 = vld [vmem:[%s1444_s5 + $0x70] sm:$0xff]   ;;  %v1302_v13 = vld [vmem:[%s1444_s5 + $0x28] sm:$0xff]  }
  0x2c   : > { %v1303_v14 = vld [vmem:[%s1444_s5 + $0x78] sm:$0xff]   ;;  %v1304_v15 = vld [vmem:[%s1444_s5 + $0x30] sm:$0xff]   ;;  %v1305_v16 = vld [vmem:[%s1444_s5 + $0x80] sm:$0xff]  }
  0x2d   : > { %1151 = vmatmul.mubr.msk.bf16.vlgmr.msra.gmra.mrb[0].mxu0 %vm497_vm1, %v1292_v3  ;;  %v1306_v17 = vld [vmem:[%s1444_s5 + $0x38] sm:$0xff]   ;;  %v1307_v18 = vld [vmem:[%s1444_s5 + $0x88] sm:$0xff]   ;;  %v1308_v19 = vld [vmem:[%s1444_s5 + $0x40] sm:$0xff]  }
  0x2e   : > { %1191 = vmatmul.mubr.msk.bf16.vlgmr.msra.gmra.mrb[0].mxu1 %vm497_vm1, %v1293_v4  ;;  %1154 = vmatprep.mubr.msk.bf16.mxu0 %vm1369_vm0, %v1368_v2  ;;  %v1309_v20 = vld [vmem:[%s1444_s5 + $0x90] sm:$0xff]   ;;  %v1310_v21 = vld [vmem:[%s1444_s5 + $0x48] sm:$0xff]   ;;  %v318_v22 = vld [vmem:[#allocation2] sm:$0xff] }
  0x2f   : > { %1194 = vmatprep.mubr.msk.bf16.mxu1 %vm1369_vm0, %v1368_v2  ;;  %v338_v23 = vld [vmem:[#allocation2 + $0xa0] sm:$0xff]  ;;  %v319_v25 = vld [vmem:[#allocation2 + $0x8] sm:$0xff]  ;;  %v320_v38 = vld [vmem:[#allocation2 + $0x10] sm:$0xff] }
  0x30   : > { %v339_v29 = vld [vmem:[#allocation2 + $0xa8] sm:$0xff]  ;;  %v340_v39 = vld [vmem:[#allocation2 + $0xb0] sm:$0xff]  ;;  %v321_v41 = vld [vmem:[#allocation2 + $0x18] sm:$0xff] }
  0x31   : > { %v341_v45 = vld [vmem:[#allocation2 + $0xb8] sm:$0xff]  ;;  %v322_v54 = vld [vmem:[#allocation2 + $0x20] sm:$0xff]  ;;  %v323_v57 = vld [vmem:[#allocation2 + $0x28] sm:$0xff] }
  0x32   : > { %v342_v55 = vld [vmem:[#allocation2 + $0xc0] sm:$0xff]  ;;  %v343_v61 = vld [vmem:[#allocation2 + $0xc8] sm:$0xff] }
  0x35   : > { %1155 = vmatmul.mubr.msk.bf16.gmra.mrb[4].mxu0 %vm497_vm1, %v1294_v5 }
  0x36   : > { %1195 = vmatmul.mubr.msk.bf16.gmra.mrb[4].mxu1 %vm497_vm1, %v1295_v6  ;;  %1158 = vmatprep.mubr.msk.bf16.mxu0 %vm1369_vm0, %v1368_v2  ;;  %v324_v6 = vld [vmem:[#allocation2 + $0x30] sm:$0xff] }
  0x37   : > { %1198 = vmatprep.mubr.msk.bf16.mxu1 %vm1369_vm0, %v1368_v2 }
  0x3d   : > { %1159 = vmatmul.mubr.msk.bf16.gmra.mrb[8].mxu0 %vm497_vm1, %v1296_v7  ;;  %v344_v7 = vld [vmem:[#allocation2 + $0xd0] sm:$0xff] }
  0x3e   : > { %1199 = vmatmul.mubr.msk.bf16.gmra.mrb[8].mxu1 %vm497_vm1, %v1297_v8  ;;  %1162 = vmatprep.mubr.msk.bf16.mxu0 %vm1369_vm0, %v1368_v2 }
  0x3f   : > { %1202 = vmatprep.mubr.msk.bf16.mxu1 %vm1369_vm0, %v1368_v2 }
  0x45   : > { %1163 = vmatmul.mubr.msk.bf16.gmra.mrb[12].mxu0 %vm497_vm1, %v1298_v9  ;;  %v325_v9 = vld [vmem:[#allocation2 + $0x38] sm:$0xff] }
  0x46   : > { %1203 = vmatmul.mubr.msk.bf16.gmra.mrb[12].mxu1 %vm497_vm1, %v1299_v10  ;;  %1166 = vmatprep.mubr.msk.bf16.mxu0 %vm1369_vm0, %v1368_v2 }
  0x47   : > { %1206 = vmatprep.mubr.msk.bf16.mxu1 %vm1369_vm0, %v1368_v2 }
  0x4d   : > { %1167 = vmatmul.mubr.msk.bf16.gmra.mrb[16].mxu0 %vm497_vm1, %v1300_v11 }
  0x4e   : > { %1207 = vmatmul.mubr.msk.bf16.gmra.mrb[16].mxu1 %vm497_vm1, %v1301_v12  ;;  %1170 = vmatprep.mubr.msk.bf16.mxu0 %vm1369_vm0, %v1368_v2 }
  0x4f   : > { %1210 = vmatprep.mubr.msk.bf16.mxu1 %vm1369_vm0, %v1368_v2 }
  0x55   : > { %1171 = vmatmul.mubr.msk.bf16.gmra.mrb[20].mxu0 %vm497_vm1, %v1302_v13  ;;  %v345_v13 = vld [vmem:[#allocation2 + $0xd8] sm:$0xff] }
  0x56   : > { %1211 = vmatmul.mubr.msk.bf16.gmra.mrb[20].mxu1 %vm497_vm1, %v1303_v14  ;;  %1174 = vmatprep.mubr.msk.bf16.mxu0 %vm1369_vm0, %v1368_v2 }
  0x57   : > { %1214 = vmatprep.mubr.msk.bf16.mxu1 %vm1369_vm0, %v1368_v2 }
  0x5d   : > { %1175 = vmatmul.mubr.msk.bf16.gmra.mrb[24].mxu0 %vm497_vm1, %v1304_v15 }
  0x5e   : > { %1215 = vmatmul.mubr.msk.bf16.gmra.mrb[24].mxu1 %vm497_vm1, %v1305_v16  ;;  %1178 = vmatprep.mubr.msk.bf16.mxu0 %vm1369_vm0, %v1368_v2 }
  0x5f   : > { %1218 = vmatprep.mubr.msk.bf16.mxu1 %vm1369_vm0, %v1368_v2 }
  0x65   : > { %1179 = vmatmul.mubr.msk.bf16.gmra.mrb[28].mxu0 %vm497_vm1, %v1306_v17 }
  0x66   : > { %1219 = vmatmul.mubr.msk.bf16.gmra.mrb[28].mxu1 %vm497_vm1, %v1307_v18  ;;  %1182 = vmatprep.mubr.msk.bf16.mxu0 %vm1369_vm0, %v1368_v2 }
  0x67   : > { %1222 = vmatprep.mubr.msk.bf16.mxu1 %vm1369_vm0, %v1368_v2 }
  0x6d   : > { %1183 = vmatmul.mubr.msk.bf16.gmra.mrb[32].mxu0 %vm497_vm1, %v1308_v19 }
  0x6e   : > { %1223 = vmatmul.mubr.msk.bf16.gmra.mrb[32].mxu1 %vm497_vm1, %v1309_v20  ;;  %1186 = vmatprep.mubr.msk.bf16.mxu0 %vm1369_vm0, %v1368_v2 }
  0x75   : > { %1187 = vmatmul.mubr.msk.bf16.gmra.mrb[36].mxu0 %vm497_vm1, %v1310_v21 }
 0x100   : > { %v589_v24 = vpop.f32.mrb[0].mxu0 }
 0x101   : > { %v740_v26 = vadd.f32 %v589_v24, %v318_v22  ;;  %v1152_v27 = vpop.f32.mrb[1].mxu0  ;;  %v669_v28 = vpop.f32.mrb[0].mxu1  ;;  %v326_v22 = vld [vmem:[#allocation2 + $0x40] sm:$0xff] }
 0x102   : > { %v592_v30 = vpop.f32.mrb[2].mxu0  ;;  %v760_v31 = vadd.f32 %v669_v28, %v338_v23  ;;  %v1192_v32 = vpop.f32.mrb[1].mxu1  ;;  %v346_v23 = vld [vmem:[#allocation2 + $0xe0] sm:$0xff] }
 0x103   : > { %778 = vst [vmem:[#allocation2] sm:$0xff] %v740_v26  ;;  %v741_v33 = vadd.f32 %v592_v30, %v319_v25  ;;  %v1153_v34 = vpop.f32.mrb[3].mxu0  ;;  %v672_v35 = vpop.f32.mrb[2].mxu1  ;;  %v327_v25 = vld [vmem:[#allocation2 + $0x48] sm:$0xff] }
 0x104   : > { %798 = vst [vmem:[#allocation2 + $0xa0] sm:$0xff] %v760_v31  ;;  %v761_v36 = vadd.f32 %v672_v35, %v339_v29  ;;  %v1193_v37 = vpop.f32.mrb[3].mxu1  ;;  %v347_v29 = vld [vmem:[#allocation2 + $0xe8] sm:$0xff] }
 0x105   : > { %779 = vst [vmem:[#allocation2 + $0x8] sm:$0xff] %v741_v33 }
 0x106   : > { %799 = vst [vmem:[#allocation2 + $0xa8] sm:$0xff] %v761_v36 }
 0x108   : > { %v597_v40 = vpop.f32.mrb[4].mxu0 }
 0x109   : > { %v742_v42 = vadd.f32 %v597_v40, %v320_v38  ;;  %v1156_v43 = vpop.f32.mrb[5].mxu0  ;;  %v677_v44 = vpop.f32.mrb[4].mxu1  ;;  %v328_v38 = vld [vmem:[#allocation2 + $0x50] sm:$0xff] }
 0x10a   : > { %v600_v46 = vpop.f32.mrb[6].mxu0  ;;  %v762_v47 = vadd.f32 %v677_v44, %v340_v39  ;;  %v1196_v48 = vpop.f32.mrb[5].mxu1  ;;  %v348_v39 = vld [vmem:[#allocation2 + $0xf0] sm:$0xff] }
 0x10b   : > { %780 = vst [vmem:[#allocation2 + $0x10] sm:$0xff] %v742_v42  ;;  %v743_v49 = vadd.f32 %v600_v46, %v321_v41  ;;  %v1157_v50 = vpop.f32.mrb[7].mxu0  ;;  %v680_v51 = vpop.f32.mrb[6].mxu1  ;;  %v329_v41 = vld [vmem:[#allocation2 + $0x58] sm:$0xff] }
 0x10c   : > { %800 = vst [vmem:[#allocation2 + $0xb0] sm:$0xff] %v762_v47  ;;  %v763_v52 = vadd.f32 %v680_v51, %v341_v45  ;;  %v1197_v53 = vpop.f32.mrb[7].mxu1  ;;  %v349_v45 = vld [vmem:[#allocation2 + $0xf8] sm:$0xff] }
 0x10d   : > { %781 = vst [vmem:[#allocation2 + $0x18] sm:$0xff] %v743_v49 }
 0x10e   : > { %801 = vst [vmem:[#allocation2 + $0xb8] sm:$0xff] %v763_v52 }
 0x110   : > { %v605_v56 = vpop.f32.mrb[8].mxu0 }
 0x111   : > { %v744_v58 = vadd.f32 %v605_v56, %v322_v54  ;;  %v1160_v59 = vpop.f32.mrb[9].mxu0  ;;  %v685_v60 = vpop.f32.mrb[8].mxu1  ;;  %v330_v54 = vld [vmem:[#allocation2 + $0x60] sm:$0xff] }
 0x112   : > { %v608_v62 = vpop.f32.mrb[10].mxu0  ;;  %v764_v63 = vadd.f32 %v685_v60, %v342_v55  ;;  %v1200_v0 = vpop.f32.mrb[9].mxu1  ;;  %v350_v55 = vld [vmem:[#allocation2 + $0x100] sm:$0xff] }
 0x113   : > { %782 = vst [vmem:[#allocation2 + $0x20] sm:$0xff] %v744_v58  ;;  %v745_v1 = vadd.f32 %v608_v62, %v323_v57  ;;  %v1161_v2 = vpop.f32.mrb[11].mxu0  ;;  %v688_v3 = vpop.f32.mrb[10].mxu1  ;;  %v331_v57 = vld [vmem:[#allocation2 + $0x68] sm:$0xff] }
 0x114   : > { %802 = vst [vmem:[#allocation2 + $0xc0] sm:$0xff] %v764_v63  ;;  %v765_v4 = vadd.f32 %v688_v3, %v343_v61  ;;  %v1201_v5 = vpop.f32.mrb[11].mxu1  ;;  %v351_v61 = vld [vmem:[#allocation2 + $0x108] sm:$0xff] }
 0x115   : > { %783 = vst [vmem:[#allocation2 + $0x28] sm:$0xff] %v745_v1 }
 0x116   : > { %803 = vst [vmem:[#allocation2 + $0xc8] sm:$0xff] %v765_v4 }
 0x118   : > { %v613_v8 = vpop.f32.mrb[12].mxu0 }
 0x119   : > { %v746_v10 = vadd.f32 %v613_v8, %v324_v6  ;;  %v1164_v11 = vpop.f32.mrb[13].mxu0  ;;  %v693_v12 = vpop.f32.mrb[12].mxu1  ;;  %v332_v6 = vld [vmem:[#allocation2 + $0x70] sm:$0xff] }
 0x11a   : > { %v616_v14 = vpop.f32.mrb[14].mxu0  ;;  %v766_v15 = vadd.f32 %v693_v12, %v344_v7  ;;  %v1204_v16 = vpop.f32.mrb[13].mxu1  ;;  %v352_v7 = vld [vmem:[#allocation2 + $0x110] sm:$0xff] }
 0x11b   : > { %784 = vst [vmem:[#allocation2 + $0x30] sm:$0xff] %v746_v10  ;;  %v747_v17 = vadd.f32 %v616_v14, %v325_v9  ;;  %v1165_v18 = vpop.f32.mrb[15].mxu0  ;;  %v696_v19 = vpop.f32.mrb[14].mxu1  ;;  %v333_v9 = vld [vmem:[#allocation2 + $0x78] sm:$0xff] }
 0x11c   : > { %804 = vst [vmem:[#allocation2 + $0xd0] sm:$0xff] %v766_v15  ;;  %v767_v20 = vadd.f32 %v696_v19, %v345_v13  ;;  %v1205_v21 = vpop.f32.mrb[15].mxu1  ;;  %v353_v13 = vld [vmem:[#allocation2 + $0x118] sm:$0xff] }
 0x11d   : > { %785 = vst [vmem:[#allocation2 + $0x38] sm:$0xff] %v747_v17 }
 0x11e   : > { %805 = vst [vmem:[#allocation2 + $0xd8] sm:$0xff] %v767_v20 }
 0x120   : > { %v621_v24 = vpop.f32.mrb[16].mxu0 }
 0x121   : > { %v748_v26 = vadd.f32 %v621_v24, %v326_v22  ;;  %v1168_v27 = vpop.f32.mrb[17].mxu0  ;;  %v701_v28 = vpop.f32.mrb[16].mxu1  ;;  %v334_v22 = vld [vmem:[#allocation2 + $0x80] sm:$0xff] }
 0x122   : > { %v624_v30 = vpop.f32.mrb[18].mxu0  ;;  %v768_v31 = vadd.f32 %v701_v28, %v346_v23  ;;  %v1208_v32 = vpop.f32.mrb[17].mxu1  ;;  %v354_v23 = vld [vmem:[#allocation2 + $0x120] sm:$0xff] }
 0x123   : > { %786 = vst [vmem:[#allocation2 + $0x40] sm:$0xff] %v748_v26  ;;  %v749_v33 = vadd.f32 %v624_v30, %v327_v25  ;;  %v1169_v34 = vpop.f32.mrb[19].mxu0  ;;  %v704_v35 = vpop.f32.mrb[18].mxu1  ;;  %v335_v25 = vld [vmem:[#allocation2 + $0x88] sm:$0xff] }
 0x124   : > { %806 = vst [vmem:[#allocation2 + $0xe0] sm:$0xff] %v768_v31  ;;  %v769_v36 = vadd.f32 %v704_v35, %v347_v29  ;;  %v1209_v37 = vpop.f32.mrb[19].mxu1  ;;  %v355_v29 = vld [vmem:[#allocation2 + $0x128] sm:$0xff] }
 0x125   : > { %787 = vst [vmem:[#allocation2 + $0x48] sm:$0xff] %v749_v33 }
 0x126   : > { %807 = vst [vmem:[#allocation2 + $0xe8] sm:$0xff] %v769_v36 }
 0x128   : > { %v629_v40 = vpop.f32.mrb[20].mxu0 }
 0x129   : > { %v750_v42 = vadd.f32 %v629_v40, %v328_v38  ;;  %v1172_v43 = vpop.f32.mrb[21].mxu0  ;;  %v709_v44 = vpop.f32.mrb[20].mxu1  ;;  %v336_v38 = vld [vmem:[#allocation2 + $0x90] sm:$0xff]  ;;  %v337_v40 = vld [vmem:[#allocation2 + $0x98] sm:$0xff] }
 0x12a   : > { %v632_v46 = vpop.f32.mrb[22].mxu0  ;;  %v770_v47 = vadd.f32 %v709_v44, %v348_v39  ;;  %v1212_v48 = vpop.f32.mrb[21].mxu1 }
 0x12b   : > { %788 = vst [vmem:[#allocation2 + $0x50] sm:$0xff] %v750_v42  ;;  %v751_v49 = vadd.f32 %v632_v46, %v329_v41  ;;  %v1173_v50 = vpop.f32.mrb[23].mxu0  ;;  %v712_v51 = vpop.f32.mrb[22].mxu1  ;;  %v820_v46 = vld [vmem:[#allocation2] sm:$0xff] (!%p1123_p11)  ;;  %v821_v48 = vld [vmem:[#allocation2 + $0x8] sm:$0xff] (!%p1123_p11) }
 0x12c   : > { %808 = vst [vmem:[#allocation2 + $0xf0] sm:$0xff] %v770_v47  ;;  %v771_v52 = vadd.f32 %v712_v51, %v349_v45  ;;  %v1213_v53 = vpop.f32.mrb[23].mxu1  ;;  %v1520_v47 = vld [vmem:[%s1621_s2] ss:$0 sm:$0xff] (!%p1123_p11)  ;;  %v822_v51 = vld [vmem:[#allocation2 + $0x10] sm:$0xff] (!%p1123_p11) }
 0x12d   : > { %789 = vst [vmem:[#allocation2 + $0x58] sm:$0xff] %v751_v49  ;;  %v865_v49 = vadd.f32 (!%p1123_p11), %v1520_v47, %v820_v46  ;;  %v866_v50 = vadd.f32 (!%p1123_p11), %v1520_v47, %v821_v48  ;;  %v824_v53 = vld [vmem:[#allocation2 + $0x20] sm:$0xff] (!%p1123_p11) }
 0x12e   : > { %809 = vst [vmem:[#allocation2 + $0xf8] sm:$0xff] %v771_v52  ;;  %v823_v52 = vld [vmem:[#allocation2 + $0x18] sm:$0xff] (!%p1123_p11) }
 0x12f   : > { %903 = vst [vmem:[%s1455_s14] sm:$0xff] (!%p1123_p11), %v865_v49  ;;  %904 = vst [vmem:[%s1455_s14 + $0x8] sm:$0xff] (!%p1123_p11), %v866_v50 }
 0x130   : > { %v637_v56 = vpop.f32.mrb[24].mxu0 }
 0x131   : > { %v752_v58 = vadd.f32 %v637_v56, %v330_v54  ;;  %v1176_v59 = vpop.f32.mrb[25].mxu0  ;;  %v717_v60 = vpop.f32.mrb[24].mxu1  ;;  %v867_v54 = vadd.f32 (!%p1123_p11), %v1520_v47, %v822_v51  ;;  %v869_v56 = vadd.f32 (!%p1123_p11), %v1520_v47, %v824_v53 }
 0x132   : > { %v640_v62 = vpop.f32.mrb[26].mxu0  ;;  %v772_v63 = vadd.f32 %v717_v60, %v350_v55  ;;  %v1216_v0 = vpop.f32.mrb[25].mxu1  ;;  %v868_v55 = vadd.f32 (!%p1123_p11), %v1520_v47, %v823_v52  ;;  %v827_v59 = vld [vmem:[#allocation2 + $0x38] sm:$0xff] (!%p1123_p11) }
 0x133   : > { %790 = vst [vmem:[#allocation2 + $0x60] sm:$0xff] %v752_v58  ;;  %v753_v1 = vadd.f32 %v640_v62, %v331_v57  ;;  %v1177_v2 = vpop.f32.mrb[27].mxu0  ;;  %v720_v3 = vpop.f32.mrb[26].mxu1  ;;  %v825_v57 = vld [vmem:[#allocation2 + $0x28] sm:$0xff] (!%p1123_p11)  ;;  %v826_v58 = vld [vmem:[#allocation2 + $0x30] sm:$0xff] (!%p1123_p11)  ;;  %v872_v62 = vadd.f32 (!%p1123_p11), %v1520_v47, %v827_v59  ;;  %905 = vst [vmem:[%s1455_s14 + $0x10] sm:$0xff] (!%p1123_p11), %v867_v54 }
 0x134   : > { %810 = vst [vmem:[#allocation2 + $0x100] sm:$0xff] %v772_v63  ;;  %v773_v4 = vadd.f32 %v720_v3, %v351_v61  ;;  %v1217_v5 = vpop.f32.mrb[27].mxu1  ;;  %v870_v60 = vadd.f32 (!%p1123_p11), %v1520_v47, %v825_v57  ;;  %v871_v61 = vadd.f32 (!%p1123_p11), %v1520_v47, %v826_v58  ;;  %v828_v63 = vld [vmem:[#allocation2 + $0x40] sm:$0xff] (!%p1123_p11)  ;;  %v829_v0 = vld [vmem:[#allocation2 + $0x48] sm:$0xff] (!%p1123_p11)  ;;  %906 = vst [vmem:[%s1455_s14 + $0x18] sm:$0xff] (!%p1123_p11), %v868_v55 }
 0x135   : > { %791 = vst [vmem:[#allocation2 + $0x68] sm:$0xff] %v753_v1  ;;  %v830_v1 = vld [vmem:[#allocation2 + $0x50] sm:$0xff] (!%p1123_p11)  ;;  %907 = vst [vmem:[%s1455_s14 + $0x20] sm:$0xff] (!%p1123_p11), %v869_v56  ;;  %v873_v2 = vadd.f32 (!%p1123_p11), %v1520_v47, %v828_v63  ;;  %v874_v3 = vadd.f32 (!%p1123_p11), %v1520_v47, %v829_v0  ;;  %v831_v5 = vld [vmem:[#allocation2 + $0x58] sm:$0xff] (!%p1123_p11) }
 0x136   : > { %811 = vst [vmem:[#allocation2 + $0x108] sm:$0xff] %v773_v4  ;;  %v875_v4 = vadd.f32 (!%p1123_p11), %v1520_v47, %v830_v1  ;;  %908 = vst [vmem:[%s1455_s14 + $0x28] sm:$0xff] (!%p1123_p11), %v870_v60 }
 0x137   : > { %909 = vst [vmem:[%s1455_s14 + $0x30] sm:$0xff] (!%p1123_p11), %v871_v61  ;;  %910 = vst [vmem:[%s1455_s14 + $0x38] sm:$0xff] (!%p1123_p11), %v872_v62 }
 0x138   : > { %v645_v8 = vpop.f32.mrb[28].mxu0  ;;  %911 = vst [vmem:[%s1455_s14 + $0x40] sm:$0xff] (!%p1123_p11), %v873_v2  ;;  %912 = vst [vmem:[%s1455_s14 + $0x48] sm:$0xff] (!%p1123_p11), %v874_v3 }
 0x139   : > { %v754_v10 = vadd.f32 %v645_v8, %v332_v6  ;;  %v1180_v11 = vpop.f32.mrb[29].mxu0  ;;  %v725_v12 = vpop.f32.mrb[28].mxu1  ;;  %v876_v8 = vadd.f32 (!%p1123_p11), %v1520_v47, %v831_v5  ;;  %913 = vst [vmem:[%s1455_s14 + $0x50] sm:$0xff] (!%p1123_p11), %v875_v4 }
 0x13a   : > { %v648_v14 = vpop.f32.mrb[30].mxu0  ;;  %v774_v15 = vadd.f32 %v725_v12, %v352_v7  ;;  %v1220_v16 = vpop.f32.mrb[29].mxu1  ;;  %v832_v6 = vld [vmem:[#allocation2 + $0x60] sm:$0xff] (!%p1123_p11) }
 0x13b   : > { %792 = vst [vmem:[#allocation2 + $0x70] sm:$0xff] %v754_v10  ;;  %v755_v17 = vadd.f32 %v648_v14, %v333_v9  ;;  %v1181_v18 = vpop.f32.mrb[31].mxu0  ;;  %v728_v19 = vpop.f32.mrb[30].mxu1  ;;  %v877_v9 = vadd.f32 (!%p1123_p11), %v1520_v47, %v832_v6  ;;  %914 = vst [vmem:[%s1455_s14 + $0x58] sm:$0xff] (!%p1123_p11), %v876_v8  ;;  %v852_v48 = vld [vmem:[#allocation2 + $0x100] sm:$0xff] (!%p1123_p11) }
 0x13c   : > { %812 = vst [vmem:[#allocation2 + $0x110] sm:$0xff] %v774_v15  ;;  %v775_v20 = vadd.f32 %v728_v19, %v353_v13  ;;  %v1221_v21 = vpop.f32.mrb[31].mxu1  ;;  %v833_v7 = vld [vmem:[#allocation2 + $0x68] sm:$0xff] (!%p1123_p11)  ;;  %v897_v51 = vadd.f32 (!%p1123_p11), %v1520_v47, %v852_v48 }
 0x13d   : > { %793 = vst [vmem:[#allocation2 + $0x78] sm:$0xff] %v755_v17  ;;  %v878_v10 = vadd.f32 (!%p1123_p11), %v1520_v47, %v833_v7  ;;  %915 = vst [vmem:[%s1455_s14 + $0x60] sm:$0xff] (!%p1123_p11), %v877_v9  ;;  %v853_v49 = vld [vmem:[#allocation2 + $0x108] sm:$0xff] (!%p1123_p11) }
 0x13e   : > { %813 = vst [vmem:[#allocation2 + $0x118] sm:$0xff] %v775_v20  ;;  %v898_v52 = vadd.f32 (!%p1123_p11), %v1520_v47, %v853_v49  ;;  %935 = vst [vmem:[%s1455_s14 + $0x100] sm:$0xff] (!%p1123_p11), %v897_v51 }
 0x13f   : > { %916 = vst [vmem:[%s1455_s14 + $0x68] sm:$0xff] (!%p1123_p11), %v878_v10 }
 0x140   : > { %v653_v24 = vpop.f32.mrb[32].mxu0  ;;  %936 = vst [vmem:[%s1455_s14 + $0x108] sm:$0xff] (!%p1123_p11), %v898_v52 }
 0x141   : > { %v756_v26 = vadd.f32 %v653_v24, %v334_v22  ;;  %v1184_v27 = vpop.f32.mrb[33].mxu0  ;;  %v733_v28 = vpop.f32.mrb[32].mxu1  ;;  %v841_v24 = vld [vmem:[#allocation2 + $0xa8] sm:$0xff] (!%p1123_p11) }
 0x142   : > { %v656_v30 = vpop.f32.mrb[34].mxu0  ;;  %v776_v31 = vadd.f32 %v733_v28, %v354_v23  ;;  %v1224_v32 = vpop.f32.mrb[33].mxu1  ;;  %v834_v11 = vld [vmem:[#allocation2 + $0x70] sm:$0xff] (!%p1123_p11)  ;;  %v840_v23 = vld [vmem:[#allocation2 + $0xa0] sm:$0xff] (!%p1123_p11)  ;;  %v886_v27 = vadd.f32 (!%p1123_p11), %v1520_v47, %v841_v24 }
 0x143   : > { %794 = vst [vmem:[#allocation2 + $0x80] sm:$0xff] %v756_v26  ;;  %v757_v33 = vadd.f32 %v656_v30, %v335_v25  ;;  %v1185_v34 = vpop.f32.mrb[35].mxu0  ;;  %v736_v35 = vpop.f32.mrb[34].mxu1  ;;  %v879_v14 = vadd.f32 (!%p1123_p11), %v1520_v47, %v834_v11  ;;  %v842_v25 = vld [vmem:[#allocation2 + $0xb0] sm:$0xff] (!%p1123_p11)  ;;  %v885_v26 = vadd.f32 (!%p1123_p11), %v1520_v47, %v840_v23  ;;  %v844_v30 = vld [vmem:[#allocation2 + $0xc0] sm:$0xff] (!%p1123_p11) }
 0x144   : > { %814 = vst [vmem:[#allocation2 + $0x120] sm:$0xff] %v776_v31  ;;  %v777_v36 = vadd.f32 %v736_v35, %v355_v29  ;;  %v1225_v37 = vpop.f32.mrb[35].mxu1  ;;  %v835_v12 = vld [vmem:[#allocation2 + $0x78] sm:$0xff] (!%p1123_p11)  ;;  %v887_v28 = vadd.f32 (!%p1123_p11), %v1520_v47, %v842_v25  ;;  %v845_v31 = vld [vmem:[#allocation2 + $0xc8] sm:$0xff] (!%p1123_p11)  ;;  %v846_v35 = vld [vmem:[#allocation2 + $0xd0] sm:$0xff] (!%p1123_p11) }
 0x145   : > { %795 = vst [vmem:[#allocation2 + $0x88] sm:$0xff] %v757_v33  ;;  %v880_v15 = vadd.f32 (!%p1123_p11), %v1520_v47, %v835_v12  ;;  %917 = vst [vmem:[%s1455_s14 + $0x70] sm:$0xff] (!%p1123_p11), %v879_v14  ;;  %v843_v29 = vld [vmem:[#allocation2 + $0xb8] sm:$0xff] (!%p1123_p11)  ;;  %v889_v33 = vadd.f32 (!%p1123_p11), %v1520_v47, %v844_v30  ;;  %v890_v34 = vadd.f32 (!%p1123_p11), %v1520_v47, %v845_v31  ;;  %v848_v37 = vld [vmem:[#allocation2 + $0xe0] sm:$0xff] (!%p1123_p11) }
 0x146   : > { %815 = vst [vmem:[#allocation2 + $0x128] sm:$0xff] %v777_v36  ;;  %v888_v32 = vadd.f32 (!%p1123_p11), %v1520_v47, %v843_v29  ;;  %v847_v36 = vld [vmem:[#allocation2 + $0xd8] sm:$0xff] (!%p1123_p11)  ;;  %923 = vst [vmem:[%s1455_s14 + $0xa0] sm:$0xff] (!%p1123_p11), %v885_v26  ;;  %v854_v50 = vld [vmem:[#allocation2 + $0x110] sm:$0xff] (!%p1123_p11) }
 0x147   : > { %819 = sbr.rel (%p1123_p11) target bundleno = 344 (0x158), region = 40  ;;  %918 = vst [vmem:[%s1455_s14 + $0x78] sm:$0xff] (!%p1123_p11), %v880_v15  ;;  %924 = vst [vmem:[%s1455_s14 + $0xa8] sm:$0xff] (!%p1123_p11), %v886_v27  ;;  %v899_v53 = vadd.f32 (!%p1123_p11), %v1520_v47, %v854_v50  ;;  %v855_v54 = vld [vmem:[#allocation2 + $0x118] sm:$0xff] (!%p1123_p11) }
 0x148   : > { %v661_v39 = vpop.f32.mrb[36].mxu0  ;;  %925 = vst [vmem:[%s1455_s14 + $0xb0] sm:$0xff] (!%p1123_p11), %v887_v28  ;;  %926 = vst [vmem:[%s1455_s14 + $0xb8] sm:$0xff] (!%p1123_p11), %v888_v32  ;;  %v900_v57 = vadd.f32 (!%p1123_p11), %v1520_v47, %v855_v54 }
 0x149   : > { %v758_v41 = vadd.f32 %v661_v39, %v336_v38  ;;  %v1188_v42 = vpop.f32.mrb[37].mxu0  ;;  %v891_v38 = vadd.f32 (!%p1123_p11), %v1520_v47, %v846_v35  ;;  %v892_v39 = vadd.f32 (!%p1123_p11), %v1520_v47, %v847_v36  ;;  %927 = vst [vmem:[%s1455_s14 + $0xc0] sm:$0xff] (!%p1123_p11), %v889_v33  ;;  %928 = vst [vmem:[%s1455_s14 + $0xc8] sm:$0xff] (!%p1123_p11), %v890_v34 }
 0x14a   : > { %v664_v43 = vpop.f32.mrb[38].mxu0  ;;  %v836_v13 = vld [vmem:[#allocation2 + $0x80] sm:$0xff] (!%p1123_p11)  ;;  %v850_v42 = vld [vmem:[#allocation2 + $0xf0] sm:$0xff] (!%p1123_p11)  ;;  %937 = vst [vmem:[%s1455_s14 + $0x110] sm:$0xff] (!%p1123_p11), %v899_v53  ;;  %938 = vst [vmem:[%s1455_s14 + $0x118] sm:$0xff] (!%p1123_p11), %v900_v57 }
 0x14b   : > { %796 = vst [vmem:[#allocation2 + $0x90] sm:$0xff] %v758_v41  ;;  %v759_v44 = vadd.f32 %v664_v43, %v337_v40  ;;  %v1189_v45 = vpop.f32.mrb[39].mxu0  ;;  %v881_v16 = vadd.f32 (!%p1123_p11), %v1520_v47, %v836_v13  ;;  %v893_v40 = vadd.f32 (!%p1123_p11), %v1520_v47, %v848_v37  ;;  %v849_v41 = vld [vmem:[#allocation2 + $0xe8] sm:$0xff] (!%p1123_p11)  ;;  %v851_v43 = vld [vmem:[#allocation2 + $0xf8] sm:$0xff] (!%p1123_p11)  ;;  %929 = vst [vmem:[%s1455_s14 + $0xd0] sm:$0xff] (!%p1123_p11), %v891_v38 }
 0x14c   : > { %v837_v17 = vld [vmem:[#allocation2 + $0x88] sm:$0xff] (!%p1123_p11)  ;;  %v895_v45 = vadd.f32 (!%p1123_p11), %v1520_v47, %v850_v42  ;;  %v896_v46 = vadd.f32 (!%p1123_p11), %v1520_v47, %v851_v43  ;;  %930 = vst [vmem:[%s1455_s14 + $0xd8] sm:$0xff] (!%p1123_p11), %v892_v39  ;;  %v856_v55 = vld [vmem:[#allocation2 + $0x120] sm:$0xff] (!%p1123_p11) }
 0x14d   : > { %797 = vst [vmem:[#allocation2 + $0x98] sm:$0xff] %v759_v44  ;;  %v882_v20 = vadd.f32 (!%p1123_p11), %v1520_v47, %v837_v17  ;;  %919 = vst [vmem:[%s1455_s14 + $0x80] sm:$0xff] (!%p1123_p11), %v881_v16  ;;  %v894_v44 = vadd.f32 (!%p1123_p11), %v1520_v47, %v849_v41  ;;  %v857_v56 = vld [vmem:[#allocation2 + $0x128] sm:$0xff] (!%p1123_p11)  ;;  %v901_v58 = vadd.f32 (!%p1123_p11), %v1520_v47, %v856_v55 }
 0x14e   : > { %931 = vst [vmem:[%s1455_s14 + $0xe0] sm:$0xff] %v893_v40  ;;  %933 = vst [vmem:[%s1455_s14 + $0xf0] sm:$0xff] %v895_v45  ;;  %v902_v59 = vadd.f32 %v1520_v47, %v857_v56 }
 0x14f   : > { %920 = vst [vmem:[%s1455_s14 + $0x88] sm:$0xff] %v882_v20  ;;  %932 = vst [vmem:[%s1455_s14 + $0xe8] sm:$0xff] %v894_v44 }
 0x150   : > { %934 = vst [vmem:[%s1455_s14 + $0xf8] sm:$0xff] %v896_v46  ;;  %939 = vst [vmem:[%s1455_s14 + $0x120] sm:$0xff] %v901_v58 }
 0x151   : > { %940 = vst [vmem:[%s1455_s14 + $0x128] sm:$0xff] %v902_v59 }
 0x152   : > { %v838_v18 = vld [vmem:[#allocation2 + $0x90] sm:$0xff] }
 0x153   : > { %v883_v21 = vadd.f32 %v1520_v47, %v838_v18 }
 0x154   : > { %v839_v19 = vld [vmem:[#allocation2 + $0x98] sm:$0xff] }
 0x155   : > { %v884_v22 = vadd.f32 %v1520_v47, %v839_v19  ;;  %921 = vst [vmem:[%s1455_s14 + $0x90] sm:$0xff] %v883_v21 }
 0x157   : > { %922 = vst [vmem:[%s1455_s14 + $0x98] sm:$0xff] %v884_v22 }
 0x158 PF: > { %s13_s18 = sadd.s32 1, %s1365_s18   ;;  %s1624_s23 = sld [smem:[#allocation3_spill]] }
 0x159   : > { %p10_p12 = scmp.ge.s32.totalorder %s13_s18, 10   ;;  %s1625_s12 = smov %s1353_s15 }
 0x15a   : > { %s1626_s13 = smov %s1357_s16  ;;  %s1627_s14 = smov %s1361_s17 }
 0x15b   : > { %s1628_s15 = smov %s1632_s19  ;;  %s1629_s16 = smov %s1636_s20 }
 0x15c   :  { %12 = sbr.rel (!%p10_p12) target bundleno = 4 (0x4), region = 73 }
 0x15e   : > { %s1630_s17 = smov %s1624_s23 }

// kernel: decoder_forward.60
= control target key start
LH: loop header
LB: loop body
LE: loop exit
PB: predicated region body
PF: predicated region fallthrough
CT: control target
= control target key end

     0   :  { %s1380_s12 = smov 0   ;;  %s1382_s13 = smov 0   ;;  %s1609_s0 = inlined_call_operand.vmem [shape: bf16[2,3,304,8], index: 0, kind: input, shape index: {}]   ;;  %s1610_s1 = inlined_call_operand.vmem [shape: bf16[2,8,128], index: 1, kind: input, shape index: {}]   ;;  %s1611_s2 = inlined_call_operand.vmem [shape: f32[1,128], index: 2, kind: input, shape index: {}]   ;;  %s1612_s3 = inlined_call_operand.vmem [shape: f32[2,2,304,128], index: 3, kind: output, shape index: {}]  }
   0x1   :  { %s1384_s14 = smov 0   ;;  %s1386_s15 = smov 0  }
   0x2   :  { %s1388_s16 = smov 0   ;;  %s1390_s17 = smov 0  }
   0x3   :  { %s1392_s18 = smov 0  }
   0x4 LB: > { %s28_s19 = sadd.s32 1, %s1343_s15  ;;  %s35_s20 = sadd.s32 1, %s1347_s16  ;;  %s1355_s18 = sphi %s1392_s18, %s13_s18   ;;  %s1351_s17 = sphi %s1390_s17, %s1620_s17   ;;  %s1347_s16 = sphi %s1388_s16, %s1619_s16   ;;  %s1343_s15 = sphi %s1386_s15, %s1618_s15   ;;  %s1339_s14 = sphi %s1384_s14, %s1617_s14   ;;  %s1335_s13 = sphi %s1382_s13, %s1616_s13   ;;  %s1331_s12 = sphi %s1380_s12, %s1615_s12  }
   0x5   : > { %p29_p0 = scmp.ge.s32.totalorder %s28_s19, 2  ;;  %p1072_p1 = scmp.ge.s32.totalorder %s1355_s18, 1 }
   0x6   : > { %p193_p2 = scmp.lt.s32.totalorder %s1355_s18, 9  ;;  %s39_s21 = sadd.s32 1, %s1351_s17 }
   0x7   : > { %s1622_s19 = smov (%p29_p0, %s28_s19), 0  ;;  %s1624_s20 = smov (!%p29_p0, %s35_s20), %s1347_s16 }
   0x8   : > { %p194_p3 = pnand %p1072_p1, %p193_p2  ;;  %p37_p4 = scmp.ge.s32.totalorder %s1624_s20, 2 }
   0x9   : > { %s238_s22 = sadd.s32 (!%p194_p3), %s1331_s12, %s1335_s13  ;;  %p240_p6 = scmp.lt.s32.totalorder (!%p194_p3), %s1339_s14, 1 }
   0xa   : > { %s1626_s20 = smov (%p37_p4, %s1624_s20), 0  ;;  %s1628_s21 = smov (!%p37_p4, %s39_s21), %s1351_s17 }
   0xb   : > { %p41_p5 = scmp.ge.s32.totalorder %s1628_s21, 2  ;;  %197 = sbr.rel (%p194_p3) target bundleno = 344 (0x158), region = 32 }
   0xc   : > { %p242_p7 = scmp.lt.s32.totalorder (!%p194_p3), %s238_s22, 2  ;;  %p254_p8 = scmp.lt.s32.totalorder (!%p194_p3), %s1331_s12, 1 }
   0xd   : > { %s1630_s21 = smov (%p41_p5, %s1628_s21), 0  ;;  %p261_p9 = scmp.lt.s32.totalorder (!%p194_p3), %s1335_s13, 1 }
   0xe   : > { %1613 = sst [smem:[#allocation3_spill]] %s1630_s21  ;;  %p1076_p10 = scmp.ne.s32.totalorder (!%p194_p3), %s1331_s12, 0 }
  0x12   : > { %s1632_s14 = smov (!%p240_p6, %s1339_s14), 1  ;;  %s1634_s22 = smov (!%p242_p7, %s238_s22), 2 }
  0x13   : > { %s1220_s23 = smul.u32 114, %s1632_s14  ;;  %s1636_s13 = smov (!%p261_p9, %s1335_s13), 1  ;;  %v1357_v0 = vmov (!%p1076_p10), 0.0  }
  0x14   : > { %s1219_s24 = smul.u32 38, %s1634_s22  ;;  %277 = vst [vmem:[#allocation2] sm:$0xff] (!%p1076_p10), %v1357_v0  ;;  %278 = vst [vmem:[#allocation2 + $0x8] sm:$0xff] (!%p1076_p10), %v1357_v0 }
  0x15   : > { %s255_s25 = scalar_select %p254_p8, %s1331_s12, 1 }
  0x16   : > { %s249_s26 = sadd.s32 %s1220_s23, %s1219_s24  ;;  %s1222_s27 = smul.u32 76, %s1632_s14  ;;  %279 = vst [vmem:[#allocation2 + $0x10] sm:$0xff] (!%p1076_p10), %v1357_v0  ;;  %280 = vst [vmem:[#allocation2 + $0x18] sm:$0xff] (!%p1076_p10), %v1357_v0 }
  0x17   : > { %s1073_s28 = sshll.u32 %s249_s26, 2  ;;  %s1074_s29 = sshll.u32 %s255_s25, 2  ;;  %281 = vst [vmem:[#allocation2 + $0x20] sm:$0xff] (!%p1076_p10), %v1357_v0  ;;  %282 = vst [vmem:[#allocation2 + $0x28] sm:$0xff] (!%p1076_p10), %v1357_v0 }
  0x18   : > { %s1434_s5 = scalar_lea.vmem %s1609_s0, %s1073_s28  ;;  %s1439_s8 = scalar_lea.vmem %s1610_s1, %s1074_s29  ;;  %283 = vst [vmem:[#allocation2 + $0x30] sm:$0xff] (!%p1076_p10), %v1357_v0  ;;  %284 = vst [vmem:[#allocation2 + $0x38] sm:$0xff] (!%p1076_p10), %v1357_v0 }
  0x19   : > { %s1221_s9 = smul.u32 38, %s1636_s13  ;;  %285 = vst [vmem:[#allocation2 + $0x40] sm:$0xff] (!%p1076_p10), %v1357_v0  ;;  %286 = vst [vmem:[#allocation2 + $0x48] sm:$0xff] (!%p1076_p10), %v1357_v0 }
  0x1a   : > { %276 = sbr.rel (%p1076_p10) target bundleno = 40 (0x28), region = 36  ;;  %287 = vst [vmem:[#allocation2 + $0x50] sm:$0xff] (!%p1076_p10), %v1357_v0  ;;  %288 = vst [vmem:[#allocation2 + $0x58] sm:$0xff] (!%p1076_p10), %v1357_v0 }
  0x1b   : > { %s268_s10 = sadd.s32 %s1222_s27, %s1221_s9  ;;  %289 = vst [vmem:[#allocation2 + $0x60] sm:$0xff] (!%p1076_p10), %v1357_v0  ;;  %290 = vst [vmem:[#allocation2 + $0x68] sm:$0xff] (!%p1076_p10), %v1357_v0 }
  0x1c   : > { %s1075_s11 = sshll.u32 %s268_s10, 3  ;;  %291 = vst [vmem:[#allocation2 + $0x70] sm:$0xff] (!%p1076_p10), %v1357_v0  ;;  %292 = vst [vmem:[#allocation2 + $0x78] sm:$0xff] (!%p1076_p10), %v1357_v0 }
  0x1d   : > { %s1445_s14 = scalar_lea.vmem %s1612_s3, %s1075_s11  ;;  %293 = vst [vmem:[#allocation2 + $0x80] sm:$0xff] (!%p1076_p10), %v1357_v0  ;;  %294 = vst [vmem:[#allocation2 + $0x88] sm:$0xff] (!%p1076_p10), %v1357_v0 }
  0x1e   : > { %295 = vst [vmem:[#allocation2 + $0x90] sm:$0xff] (!%p1076_p10), %v1357_v0  ;;  %296 = vst [vmem:[#allocation2 + $0x98] sm:$0xff] (!%p1076_p10), %v1357_v0 }
  0x1f   : > { %297 = vst [vmem:[#allocation2 + $0xa0] sm:$0xff] (!%p1076_p10), %v1357_v0  ;;  %298 = vst [vmem:[#allocation2 + $0xa8] sm:$0xff] (!%p1076_p10), %v1357_v0 }
  0x20   : > { %299 = vst [vmem:[#allocation2 + $0xb0] sm:$0xff] (!%p1076_p10), %v1357_v0  ;;  %300 = vst [vmem:[#allocation2 + $0xb8] sm:$0xff] (!%p1076_p10), %v1357_v0 }
  0x21   : > { %301 = vst [vmem:[#allocation2 + $0xc0] sm:$0xff] %v1357_v0  ;;  %302 = vst [vmem:[#allocation2 + $0xc8] sm:$0xff] %v1357_v0 }
  0x22   : > { %303 = vst [vmem:[#allocation2 + $0xd0] sm:$0xff] %v1357_v0  ;;  %304 = vst [vmem:[#allocation2 + $0xd8] sm:$0xff] %v1357_v0 }
  0x23   : > { %305 = vst [vmem:[#allocation2 + $0xe0] sm:$0xff] %v1357_v0  ;;  %306 = vst [vmem:[#allocation2 + $0xe8] sm:$0xff] %v1357_v0 }
  0x24   : > { %307 = vst [vmem:[#allocation2 + $0xf0] sm:$0xff] %v1357_v0  ;;  %308 = vst [vmem:[#allocation2 + $0xf8] sm:$0xff] %v1357_v0 }
  0x25   : > { %309 = vst [vmem:[#allocation2 + $0x100] sm:$0xff] %v1357_v0  ;;  %310 = vst [vmem:[#allocation2 + $0x108] sm:$0xff] %v1357_v0 }
  0x26   : > { %311 = vst [vmem:[#allocation2 + $0x110] sm:$0xff] %v1357_v0  ;;  %312 = vst [vmem:[#allocation2 + $0x118] sm:$0xff] %v1357_v0 }
  0x27   : > { %313 = vst [vmem:[#allocation2 + $0x120] sm:$0xff] %v1357_v0  ;;  %314 = vst [vmem:[#allocation2 + $0x128] sm:$0xff] %v1357_v0 }
  0x28 PF: > { %v391_v1 = vld [vmem:[%s1439_s8] sm:$0xf]  ;;  %vm545_vm0 = vcmask 1043456   ;;  %v1358_v2 = vmov 0.0   ;;  %vm1359_vm1 = vmmov 0   ;;  %vm487_vm2 = vcmask 64512  }
  0x29   : > { %1139 = vmatprep.subr.bf16.mxu0 %v1358_v2  ;;  %v547_v3 = vsel %vm545_vm0, %v391_v1, 0  ;;  %1141 = vmatprep.mubr.msk.bf16.mxu0 %vm1359_vm1, %v1358_v2  ;;  %v1282_v4 = vld [vmem:[%s1434_s5] sm:$0xff]   ;;  %v1283_v5 = vld [vmem:[%s1434_s5 + $0x50] sm:$0xff]   ;;  %v1284_v6 = vld [vmem:[%s1434_s5 + $0x8] sm:$0xff]   ;;  %p1115_p11 = scmp.ne.s32.totalorder %s1331_s12, 1 }
  0x2a   : > { %1140 = vmatpush3.bf16.msra.mxu0 %v547_v3  ;;  %1217 = vmatprep.subr.bf16.mxu1 %v1358_v2  ;;  %v1285_v7 = vld [vmem:[%s1434_s5 + $0x58] sm:$0xff]   ;;  %v1286_v8 = vld [vmem:[%s1434_s5 + $0x10] sm:$0xff]   ;;  %v1287_v9 = vld [vmem:[%s1434_s5 + $0x60] sm:$0xff]  }
  0x2b   : > { %1218 = vmatpush3.bf16.msra.mxu1 %v547_v3  ;;  %1181 = vmatprep.mubr.msk.bf16.mxu1 %vm1359_vm1, %v1358_v2  ;;  %v1288_v10 = vld [vmem:[%s1434_s5 + $0x18] sm:$0xff]   ;;  %v1289_v11 = vld [vmem:[%s1434_s5 + $0x68] sm:$0xff]   ;;  %v1290_v12 = vld [vmem:[%s1434_s5 + $0x20] sm:$0xff]  }
  0x2c   : > { %v1291_v13 = vld [vmem:[%s1434_s5 + $0x70] sm:$0xff]   ;;  %v1292_v14 = vld [vmem:[%s1434_s5 + $0x28] sm:$0xff]   ;;  %v1293_v15 = vld [vmem:[%s1434_s5 + $0x78] sm:$0xff]  }
  0x2d   : > { %1142 = vmatmul.mubr.msk.bf16.vlgmr.msra.gmra.mrb[0].mxu0 %vm487_vm2, %v1282_v4  ;;  %v1294_v16 = vld [vmem:[%s1434_s5 + $0x30] sm:$0xff]   ;;  %v1295_v17 = vld [vmem:[%s1434_s5 + $0x80] sm:$0xff]   ;;  %v1296_v18 = vld [vmem:[%s1434_s5 + $0x38] sm:$0xff]  }
  0x2e   : > { %1182 = vmatmul.mubr.msk.bf16.vlgmr.msra.gmra.mrb[0].mxu1 %vm487_vm2, %v1283_v5  ;;  %1145 = vmatprep.mubr.msk.bf16.mxu0 %vm1359_vm1, %v1358_v2  ;;  %v1297_v19 = vld [vmem:[%s1434_s5 + $0x88] sm:$0xff]   ;;  %v1298_v20 = vld [vmem:[%s1434_s5 + $0x40] sm:$0xff]   ;;  %v1299_v21 = vld [vmem:[%s1434_s5 + $0x90] sm:$0xff]  }
  0x2f   : > { %1185 = vmatprep.mubr.msk.bf16.mxu1 %vm1359_vm1, %v1358_v2  ;;  %v1300_v22 = vld [vmem:[%s1434_s5 + $0x48] sm:$0xff]   ;;  %v315_v23 = vld [vmem:[#allocation2] sm:$0xff]  ;;  %v317_v39 = vld [vmem:[#allocation2 + $0x10] sm:$0xff] }
  0x30   : > { %v335_v24 = vld [vmem:[#allocation2 + $0xa0] sm:$0xff]  ;;  %v316_v26 = vld [vmem:[#allocation2 + $0x8] sm:$0xff]  ;;  %v337_v40 = vld [vmem:[#allocation2 + $0xb0] sm:$0xff] }
  0x31   : > { %v336_v30 = vld [vmem:[#allocation2 + $0xa8] sm:$0xff]  ;;  %v318_v42 = vld [vmem:[#allocation2 + $0x18] sm:$0xff]  ;;  %v319_v55 = vld [vmem:[#allocation2 + $0x20] sm:$0xff] }
  0x32   : > { %v338_v46 = vld [vmem:[#allocation2 + $0xb8] sm:$0xff]  ;;  %v339_v56 = vld [vmem:[#allocation2 + $0xc0] sm:$0xff]  ;;  %v320_v58 = vld [vmem:[#allocation2 + $0x28] sm:$0xff] }
  0x33   : > { %v340_v62 = vld [vmem:[#allocation2 + $0xc8] sm:$0xff] }
  0x35   : > { %1146 = vmatmul.mubr.msk.bf16.gmra.mrb[4].mxu0 %vm487_vm2, %v1284_v6 }
  0x36   : > { %1186 = vmatmul.mubr.msk.bf16.gmra.mrb[4].mxu1 %vm487_vm2, %v1285_v7  ;;  %1149 = vmatprep.mubr.msk.bf16.mxu0 %vm1359_vm1, %v1358_v2  ;;  %v321_v7 = vld [vmem:[#allocation2 + $0x30] sm:$0xff] }
  0x37   : > { %1189 = vmatprep.mubr.msk.bf16.mxu1 %vm1359_vm1, %v1358_v2 }
  0x3d   : > { %1150 = vmatmul.mubr.msk.bf16.gmra.mrb[8].mxu0 %vm487_vm2, %v1286_v8  ;;  %v341_v8 = vld [vmem:[#allocation2 + $0xd0] sm:$0xff] }
  0x3e   : > { %1190 = vmatmul.mubr.msk.bf16.gmra.mrb[8].mxu1 %vm487_vm2, %v1287_v9  ;;  %1153 = vmatprep.mubr.msk.bf16.mxu0 %vm1359_vm1, %v1358_v2 }
  0x3f   : > { %1193 = vmatprep.mubr.msk.bf16.mxu1 %vm1359_vm1, %v1358_v2 }
  0x45   : > { %1154 = vmatmul.mubr.msk.bf16.gmra.mrb[12].mxu0 %vm487_vm2, %v1288_v10  ;;  %v322_v10 = vld [vmem:[#allocation2 + $0x38] sm:$0xff] }
  0x46   : > { %1194 = vmatmul.mubr.msk.bf16.gmra.mrb[12].mxu1 %vm487_vm2, %v1289_v11  ;;  %1157 = vmatprep.mubr.msk.bf16.mxu0 %vm1359_vm1, %v1358_v2 }
  0x47   : > { %1197 = vmatprep.mubr.msk.bf16.mxu1 %vm1359_vm1, %v1358_v2 }
  0x4d   : > { %1158 = vmatmul.mubr.msk.bf16.gmra.mrb[16].mxu0 %vm487_vm2, %v1290_v12 }
  0x4e   : > { %1198 = vmatmul.mubr.msk.bf16.gmra.mrb[16].mxu1 %vm487_vm2, %v1291_v13  ;;  %1161 = vmatprep.mubr.msk.bf16.mxu0 %vm1359_vm1, %v1358_v2 }
  0x4f   : > { %1201 = vmatprep.mubr.msk.bf16.mxu1 %vm1359_vm1, %v1358_v2 }
  0x55   : > { %1162 = vmatmul.mubr.msk.bf16.gmra.mrb[20].mxu0 %vm487_vm2, %v1292_v14  ;;  %v342_v14 = vld [vmem:[#allocation2 + $0xd8] sm:$0xff] }
  0x56   : > { %1202 = vmatmul.mubr.msk.bf16.gmra.mrb[20].mxu1 %vm487_vm2, %v1293_v15  ;;  %1165 = vmatprep.mubr.msk.bf16.mxu0 %vm1359_vm1, %v1358_v2 }
  0x57   : > { %1205 = vmatprep.mubr.msk.bf16.mxu1 %vm1359_vm1, %v1358_v2 }
  0x5d   : > { %1166 = vmatmul.mubr.msk.bf16.gmra.mrb[24].mxu0 %vm487_vm2, %v1294_v16 }
  0x5e   : > { %1206 = vmatmul.mubr.msk.bf16.gmra.mrb[24].mxu1 %vm487_vm2, %v1295_v17  ;;  %1169 = vmatprep.mubr.msk.bf16.mxu0 %vm1359_vm1, %v1358_v2 }
  0x5f   : > { %1209 = vmatprep.mubr.msk.bf16.mxu1 %vm1359_vm1, %v1358_v2 }
  0x65   : > { %1170 = vmatmul.mubr.msk.bf16.gmra.mrb[28].mxu0 %vm487_vm2, %v1296_v18 }
  0x66   : > { %1210 = vmatmul.mubr.msk.bf16.gmra.mrb[28].mxu1 %vm487_vm2, %v1297_v19  ;;  %1173 = vmatprep.mubr.msk.bf16.mxu0 %vm1359_vm1, %v1358_v2 }
  0x67   : > { %1213 = vmatprep.mubr.msk.bf16.mxu1 %vm1359_vm1, %v1358_v2 }
  0x6d   : > { %1174 = vmatmul.mubr.msk.bf16.gmra.mrb[32].mxu0 %vm487_vm2, %v1298_v20 }
  0x6e   : > { %1214 = vmatmul.mubr.msk.bf16.gmra.mrb[32].mxu1 %vm487_vm2, %v1299_v21  ;;  %1177 = vmatprep.mubr.msk.bf16.mxu0 %vm1359_vm1, %v1358_v2 }
  0x75   : > { %1178 = vmatmul.mubr.msk.bf16.gmra.mrb[36].mxu0 %vm487_vm2, %v1300_v22 }
 0x100   : > { %v583_v25 = vpop.f32.mrb[0].mxu0 }
 0x101   : > { %v734_v27 = vadd.f32 %v583_v25, %v315_v23  ;;  %v1143_v28 = vpop.f32.mrb[1].mxu0  ;;  %v663_v29 = vpop.f32.mrb[0].mxu1  ;;  %v323_v23 = vld [vmem:[#allocation2 + $0x40] sm:$0xff] }
 0x102   : > { %v586_v31 = vpop.f32.mrb[2].mxu0  ;;  %v754_v32 = vadd.f32 %v663_v29, %v335_v24  ;;  %v1183_v33 = vpop.f32.mrb[1].mxu1  ;;  %v343_v24 = vld [vmem:[#allocation2 + $0xe0] sm:$0xff] }
 0x103   : > { %772 = vst [vmem:[#allocation2] sm:$0xff] %v734_v27  ;;  %v735_v34 = vadd.f32 %v586_v31, %v316_v26  ;;  %v1144_v35 = vpop.f32.mrb[3].mxu0  ;;  %v666_v36 = vpop.f32.mrb[2].mxu1  ;;  %v324_v26 = vld [vmem:[#allocation2 + $0x48] sm:$0xff] }
 0x104   : > { %792 = vst [vmem:[#allocation2 + $0xa0] sm:$0xff] %v754_v32  ;;  %v755_v37 = vadd.f32 %v666_v36, %v336_v30  ;;  %v1184_v38 = vpop.f32.mrb[3].mxu1  ;;  %v344_v30 = vld [vmem:[#allocation2 + $0xe8] sm:$0xff] }
 0x105   : > { %773 = vst [vmem:[#allocation2 + $0x8] sm:$0xff] %v735_v34 }
 0x106   : > { %793 = vst [vmem:[#allocation2 + $0xa8] sm:$0xff] %v755_v37 }
 0x108   : > { %v591_v41 = vpop.f32.mrb[4].mxu0 }
 0x109   : > { %v736_v43 = vadd.f32 %v591_v41, %v317_v39  ;;  %v1147_v44 = vpop.f32.mrb[5].mxu0  ;;  %v671_v45 = vpop.f32.mrb[4].mxu1  ;;  %v325_v39 = vld [vmem:[#allocation2 + $0x50] sm:$0xff] }
 0x10a   : > { %v594_v47 = vpop.f32.mrb[6].mxu0  ;;  %v756_v48 = vadd.f32 %v671_v45, %v337_v40  ;;  %v1187_v49 = vpop.f32.mrb[5].mxu1  ;;  %v345_v40 = vld [vmem:[#allocation2 + $0xf0] sm:$0xff] }
 0x10b   : > { %774 = vst [vmem:[#allocation2 + $0x10] sm:$0xff] %v736_v43  ;;  %v737_v50 = vadd.f32 %v594_v47, %v318_v42  ;;  %v1148_v51 = vpop.f32.mrb[7].mxu0  ;;  %v674_v52 = vpop.f32.mrb[6].mxu1  ;;  %v326_v42 = vld [vmem:[#allocation2 + $0x58] sm:$0xff] }
 0x10c   : > { %794 = vst [vmem:[#allocation2 + $0xb0] sm:$0xff] %v756_v48  ;;  %v757_v53 = vadd.f32 %v674_v52, %v338_v46  ;;  %v1188_v54 = vpop.f32.mrb[7].mxu1  ;;  %v346_v46 = vld [vmem:[#allocation2 + $0xf8] sm:$0xff] }
 0x10d   : > { %775 = vst [vmem:[#allocation2 + $0x18] sm:$0xff] %v737_v50 }
 0x10e   : > { %795 = vst [vmem:[#allocation2 + $0xb8] sm:$0xff] %v757_v53 }
 0x110   : > { %v599_v57 = vpop.f32.mrb[8].mxu0 }
 0x111   : > { %v738_v59 = vadd.f32 %v599_v57, %v319_v55  ;;  %v1151_v60 = vpop.f32.mrb[9].mxu0  ;;  %v679_v61 = vpop.f32.mrb[8].mxu1  ;;  %v327_v55 = vld [vmem:[#allocation2 + $0x60] sm:$0xff] }
 0x112   : > { %v602_v63 = vpop.f32.mrb[10].mxu0  ;;  %v758_v0 = vadd.f32 %v679_v61, %v339_v56  ;;  %v1191_v1 = vpop.f32.mrb[9].mxu1  ;;  %v347_v56 = vld [vmem:[#allocation2 + $0x100] sm:$0xff] }
 0x113   : > { %776 = vst [vmem:[#allocation2 + $0x20] sm:$0xff] %v738_v59  ;;  %v739_v2 = vadd.f32 %v602_v63, %v320_v58  ;;  %v1152_v3 = vpop.f32.mrb[11].mxu0  ;;  %v682_v4 = vpop.f32.mrb[10].mxu1  ;;  %v328_v58 = vld [vmem:[#allocation2 + $0x68] sm:$0xff] }
 0x114   : > { %796 = vst [vmem:[#allocation2 + $0xc0] sm:$0xff] %v758_v0  ;;  %v759_v5 = vadd.f32 %v682_v4, %v340_v62  ;;  %v1192_v6 = vpop.f32.mrb[11].mxu1  ;;  %v348_v62 = vld [vmem:[#allocation2 + $0x108] sm:$0xff] }
 0x115   : > { %777 = vst [vmem:[#allocation2 + $0x28] sm:$0xff] %v739_v2 }
 0x116   : > { %797 = vst [vmem:[#allocation2 + $0xc8] sm:$0xff] %v759_v5 }
 0x118   : > { %v607_v9 = vpop.f32.mrb[12].mxu0 }
 0x119   : > { %v740_v11 = vadd.f32 %v607_v9, %v321_v7  ;;  %v1155_v12 = vpop.f32.mrb[13].mxu0  ;;  %v687_v13 = vpop.f32.mrb[12].mxu1  ;;  %v329_v7 = vld [vmem:[#allocation2 + $0x70] sm:$0xff] }
 0x11a   : > { %v610_v15 = vpop.f32.mrb[14].mxu0  ;;  %v760_v16 = vadd.f32 %v687_v13, %v341_v8  ;;  %v1195_v17 = vpop.f32.mrb[13].mxu1  ;;  %v349_v8 = vld [vmem:[#allocation2 + $0x110] sm:$0xff] }
 0x11b   : > { %778 = vst [vmem:[#allocation2 + $0x30] sm:$0xff] %v740_v11  ;;  %v741_v18 = vadd.f32 %v610_v15, %v322_v10  ;;  %v1156_v19 = vpop.f32.mrb[15].mxu0  ;;  %v690_v20 = vpop.f32.mrb[14].mxu1  ;;  %v330_v10 = vld [vmem:[#allocation2 + $0x78] sm:$0xff] }
 0x11c   : > { %798 = vst [vmem:[#allocation2 + $0xd0] sm:$0xff] %v760_v16  ;;  %v761_v21 = vadd.f32 %v690_v20, %v342_v14  ;;  %v1196_v22 = vpop.f32.mrb[15].mxu1  ;;  %v350_v14 = vld [vmem:[#allocation2 + $0x118] sm:$0xff] }
 0x11d   : > { %779 = vst [vmem:[#allocation2 + $0x38] sm:$0xff] %v741_v18 }
 0x11e   : > { %799 = vst [vmem:[#allocation2 + $0xd8] sm:$0xff] %v761_v21 }
 0x120   : > { %v615_v25 = vpop.f32.mrb[16].mxu0 }
 0x121   : > { %v742_v27 = vadd.f32 %v615_v25, %v323_v23  ;;  %v1159_v28 = vpop.f32.mrb[17].mxu0  ;;  %v695_v29 = vpop.f32.mrb[16].mxu1  ;;  %v331_v23 = vld [vmem:[#allocation2 + $0x80] sm:$0xff] }
 0x122   : > { %v618_v31 = vpop.f32.mrb[18].mxu0  ;;  %v762_v32 = vadd.f32 %v695_v29, %v343_v24  ;;  %v1199_v33 = vpop.f32.mrb[17].mxu1  ;;  %v351_v24 = vld [vmem:[#allocation2 + $0x120] sm:$0xff] }
 0x123   : > { %780 = vst [vmem:[#allocation2 + $0x40] sm:$0xff] %v742_v27  ;;  %v743_v34 = vadd.f32 %v618_v31, %v324_v26  ;;  %v1160_v35 = vpop.f32.mrb[19].mxu0  ;;  %v698_v36 = vpop.f32.mrb[18].mxu1  ;;  %v332_v26 = vld [vmem:[#allocation2 + $0x88] sm:$0xff] }
 0x124   : > { %800 = vst [vmem:[#allocation2 + $0xe0] sm:$0xff] %v762_v32  ;;  %v763_v37 = vadd.f32 %v698_v36, %v344_v30  ;;  %v1200_v38 = vpop.f32.mrb[19].mxu1  ;;  %v352_v30 = vld [vmem:[#allocation2 + $0x128] sm:$0xff] }
 0x125   : > { %781 = vst [vmem:[#allocation2 + $0x48] sm:$0xff] %v743_v34 }
 0x126   : > { %801 = vst [vmem:[#allocation2 + $0xe8] sm:$0xff] %v763_v37 }
 0x128   : > { %v623_v41 = vpop.f32.mrb[20].mxu0 }
 0x129   : > { %v744_v43 = vadd.f32 %v623_v41, %v325_v39  ;;  %v1163_v44 = vpop.f32.mrb[21].mxu0  ;;  %v703_v45 = vpop.f32.mrb[20].mxu1  ;;  %v333_v39 = vld [vmem:[#allocation2 + $0x90] sm:$0xff]  ;;  %v334_v41 = vld [vmem:[#allocation2 + $0x98] sm:$0xff] }
 0x12a   : > { %v626_v47 = vpop.f32.mrb[22].mxu0  ;;  %v764_v48 = vadd.f32 %v703_v45, %v345_v40  ;;  %v1203_v49 = vpop.f32.mrb[21].mxu1 }
 0x12b   : > { %782 = vst [vmem:[#allocation2 + $0x50] sm:$0xff] %v744_v43  ;;  %v745_v50 = vadd.f32 %v626_v47, %v326_v42  ;;  %v1164_v51 = vpop.f32.mrb[23].mxu0  ;;  %v706_v52 = vpop.f32.mrb[22].mxu1  ;;  %v814_v47 = vld [vmem:[#allocation2] sm:$0xff] (!%p1115_p11)  ;;  %v815_v49 = vld [vmem:[#allocation2 + $0x8] sm:$0xff] (!%p1115_p11) }
 0x12c   : > { %802 = vst [vmem:[#allocation2 + $0xf0] sm:$0xff] %v764_v48  ;;  %v765_v53 = vadd.f32 %v706_v52, %v346_v46  ;;  %v1204_v54 = vpop.f32.mrb[23].mxu1  ;;  %v1510_v48 = vld [vmem:[%s1611_s2] ss:$0 sm:$0xff] (!%p1115_p11)  ;;  %v816_v52 = vld [vmem:[#allocation2 + $0x10] sm:$0xff] (!%p1115_p11) }
 0x12d   : > { %783 = vst [vmem:[#allocation2 + $0x58] sm:$0xff] %v745_v50  ;;  %v859_v50 = vadd.f32 (!%p1115_p11), %v1510_v48, %v814_v47  ;;  %v860_v51 = vadd.f32 (!%p1115_p11), %v1510_v48, %v815_v49  ;;  %v818_v54 = vld [vmem:[#allocation2 + $0x20] sm:$0xff] (!%p1115_p11) }
 0x12e   : > { %803 = vst [vmem:[#allocation2 + $0xf8] sm:$0xff] %v765_v53  ;;  %v817_v53 = vld [vmem:[#allocation2 + $0x18] sm:$0xff] (!%p1115_p11) }
 0x12f   : > { %897 = vst [vmem:[%s1445_s14] sm:$0xff] (!%p1115_p11), %v859_v50  ;;  %898 = vst [vmem:[%s1445_s14 + $0x8] sm:$0xff] (!%p1115_p11), %v860_v51 }
 0x130   : > { %v631_v57 = vpop.f32.mrb[24].mxu0 }
 0x131   : > { %v746_v59 = vadd.f32 %v631_v57, %v327_v55  ;;  %v1167_v60 = vpop.f32.mrb[25].mxu0  ;;  %v711_v61 = vpop.f32.mrb[24].mxu1  ;;  %v861_v55 = vadd.f32 (!%p1115_p11), %v1510_v48, %v816_v52  ;;  %v863_v57 = vadd.f32 (!%p1115_p11), %v1510_v48, %v818_v54 }
 0x132   : > { %v634_v63 = vpop.f32.mrb[26].mxu0  ;;  %v766_v0 = vadd.f32 %v711_v61, %v347_v56  ;;  %v1207_v1 = vpop.f32.mrb[25].mxu1  ;;  %v862_v56 = vadd.f32 (!%p1115_p11), %v1510_v48, %v817_v53  ;;  %v821_v60 = vld [vmem:[#allocation2 + $0x38] sm:$0xff] (!%p1115_p11) }
 0x133   : > { %784 = vst [vmem:[#allocation2 + $0x60] sm:$0xff] %v746_v59  ;;  %v747_v2 = vadd.f32 %v634_v63, %v328_v58  ;;  %v1168_v3 = vpop.f32.mrb[27].mxu0  ;;  %v714_v4 = vpop.f32.mrb[26].mxu1  ;;  %v819_v58 = vld [vmem:[#allocation2 + $0x28] sm:$0xff] (!%p1115_p11)  ;;  %v820_v59 = vld [vmem:[#allocation2 + $0x30] sm:$0xff] (!%p1115_p11)  ;;  %v866_v63 = vadd.f32 (!%p1115_p11), %v1510_v48, %v821_v60  ;;  %899 = vst [vmem:[%s1445_s14 + $0x10] sm:$0xff] (!%p1115_p11), %v861_v55 }
 0x134   : > { %804 = vst [vmem:[#allocation2 + $0x100] sm:$0xff] %v766_v0  ;;  %v767_v5 = vadd.f32 %v714_v4, %v348_v62  ;;  %v1208_v6 = vpop.f32.mrb[27].mxu1  ;;  %v864_v61 = vadd.f32 (!%p1115_p11), %v1510_v48, %v819_v58  ;;  %v865_v62 = vadd.f32 (!%p1115_p11), %v1510_v48, %v820_v59  ;;  %v822_v0 = vld [vmem:[#allocation2 + $0x40] sm:$0xff] (!%p1115_p11)  ;;  %v823_v1 = vld [vmem:[#allocation2 + $0x48] sm:$0xff] (!%p1115_p11)  ;;  %900 = vst [vmem:[%s1445_s14 + $0x18] sm:$0xff] (!%p1115_p11), %v862_v56 }
 0x135   : > { %785 = vst [vmem:[#allocation2 + $0x68] sm:$0xff] %v747_v2  ;;  %v824_v2 = vld [vmem:[#allocation2 + $0x50] sm:$0xff] (!%p1115_p11)  ;;  %901 = vst [vmem:[%s1445_s14 + $0x20] sm:$0xff] (!%p1115_p11), %v863_v57  ;;  %v867_v3 = vadd.f32 (!%p1115_p11), %v1510_v48, %v822_v0  ;;  %v868_v4 = vadd.f32 (!%p1115_p11), %v1510_v48, %v823_v1  ;;  %v825_v6 = vld [vmem:[#allocation2 + $0x58] sm:$0xff] (!%p1115_p11) }
 0x136   : > { %805 = vst [vmem:[#allocation2 + $0x108] sm:$0xff] %v767_v5  ;;  %v869_v5 = vadd.f32 (!%p1115_p11), %v1510_v48, %v824_v2  ;;  %902 = vst [vmem:[%s1445_s14 + $0x28] sm:$0xff] (!%p1115_p11), %v864_v61 }
 0x137   : > { %903 = vst [vmem:[%s1445_s14 + $0x30] sm:$0xff] (!%p1115_p11), %v865_v62  ;;  %904 = vst [vmem:[%s1445_s14 + $0x38] sm:$0xff] (!%p1115_p11), %v866_v63 }
 0x138   : > { %v639_v9 = vpop.f32.mrb[28].mxu0  ;;  %905 = vst [vmem:[%s1445_s14 + $0x40] sm:$0xff] (!%p1115_p11), %v867_v3  ;;  %906 = vst [vmem:[%s1445_s14 + $0x48] sm:$0xff] (!%p1115_p11), %v868_v4 }
 0x139   : > { %v748_v11 = vadd.f32 %v639_v9, %v329_v7  ;;  %v1171_v12 = vpop.f32.mrb[29].mxu0  ;;  %v719_v13 = vpop.f32.mrb[28].mxu1  ;;  %v870_v9 = vadd.f32 (!%p1115_p11), %v1510_v48, %v825_v6  ;;  %907 = vst [vmem:[%s1445_s14 + $0x50] sm:$0xff] (!%p1115_p11), %v869_v5 }
 0x13a   : > { %v642_v15 = vpop.f32.mrb[30].mxu0  ;;  %v768_v16 = vadd.f32 %v719_v13, %v349_v8  ;;  %v1211_v17 = vpop.f32.mrb[29].mxu1  ;;  %v826_v7 = vld [vmem:[#allocation2 + $0x60] sm:$0xff] (!%p1115_p11) }
 0x13b   : > { %786 = vst [vmem:[#allocation2 + $0x70] sm:$0xff] %v748_v11  ;;  %v749_v18 = vadd.f32 %v642_v15, %v330_v10  ;;  %v1172_v19 = vpop.f32.mrb[31].mxu0  ;;  %v722_v20 = vpop.f32.mrb[30].mxu1  ;;  %v871_v10 = vadd.f32 (!%p1115_p11), %v1510_v48, %v826_v7  ;;  %908 = vst [vmem:[%s1445_s14 + $0x58] sm:$0xff] (!%p1115_p11), %v870_v9  ;;  %v846_v49 = vld [vmem:[#allocation2 + $0x100] sm:$0xff] (!%p1115_p11) }
 0x13c   : > { %806 = vst [vmem:[#allocation2 + $0x110] sm:$0xff] %v768_v16  ;;  %v769_v21 = vadd.f32 %v722_v20, %v350_v14  ;;  %v1212_v22 = vpop.f32.mrb[31].mxu1  ;;  %v827_v8 = vld [vmem:[#allocation2 + $0x68] sm:$0xff] (!%p1115_p11)  ;;  %v891_v52 = vadd.f32 (!%p1115_p11), %v1510_v48, %v846_v49 }
 0x13d   : > { %787 = vst [vmem:[#allocation2 + $0x78] sm:$0xff] %v749_v18  ;;  %v872_v11 = vadd.f32 (!%p1115_p11), %v1510_v48, %v827_v8  ;;  %909 = vst [vmem:[%s1445_s14 + $0x60] sm:$0xff] (!%p1115_p11), %v871_v10  ;;  %v847_v50 = vld [vmem:[#allocation2 + $0x108] sm:$0xff] (!%p1115_p11) }
 0x13e   : > { %807 = vst [vmem:[#allocation2 + $0x118] sm:$0xff] %v769_v21  ;;  %v892_v53 = vadd.f32 (!%p1115_p11), %v1510_v48, %v847_v50  ;;  %929 = vst [vmem:[%s1445_s14 + $0x100] sm:$0xff] (!%p1115_p11), %v891_v52 }
 0x13f   : > { %910 = vst [vmem:[%s1445_s14 + $0x68] sm:$0xff] (!%p1115_p11), %v872_v11 }
 0x140   : > { %v647_v25 = vpop.f32.mrb[32].mxu0  ;;  %930 = vst [vmem:[%s1445_s14 + $0x108] sm:$0xff] (!%p1115_p11), %v892_v53 }
 0x141   : > { %v750_v27 = vadd.f32 %v647_v25, %v331_v23  ;;  %v1175_v28 = vpop.f32.mrb[33].mxu0  ;;  %v727_v29 = vpop.f32.mrb[32].mxu1  ;;  %v835_v25 = vld [vmem:[#allocation2 + $0xa8] sm:$0xff] (!%p1115_p11) }
 0x142   : > { %v650_v31 = vpop.f32.mrb[34].mxu0  ;;  %v770_v32 = vadd.f32 %v727_v29, %v351_v24  ;;  %v1215_v33 = vpop.f32.mrb[33].mxu1  ;;  %v828_v12 = vld [vmem:[#allocation2 + $0x70] sm:$0xff] (!%p1115_p11)  ;;  %v834_v24 = vld [vmem:[#allocation2 + $0xa0] sm:$0xff] (!%p1115_p11)  ;;  %v880_v28 = vadd.f32 (!%p1115_p11), %v1510_v48, %v835_v25 }
 0x143   : > { %788 = vst [vmem:[#allocation2 + $0x80] sm:$0xff] %v750_v27  ;;  %v751_v34 = vadd.f32 %v650_v31, %v332_v26  ;;  %v1176_v35 = vpop.f32.mrb[35].mxu0  ;;  %v730_v36 = vpop.f32.mrb[34].mxu1  ;;  %v873_v15 = vadd.f32 (!%p1115_p11), %v1510_v48, %v828_v12  ;;  %v836_v26 = vld [vmem:[#allocation2 + $0xb0] sm:$0xff] (!%p1115_p11)  ;;  %v879_v27 = vadd.f32 (!%p1115_p11), %v1510_v48, %v834_v24  ;;  %v838_v31 = vld [vmem:[#allocation2 + $0xc0] sm:$0xff] (!%p1115_p11) }
 0x144   : > { %808 = vst [vmem:[#allocation2 + $0x120] sm:$0xff] %v770_v32  ;;  %v771_v37 = vadd.f32 %v730_v36, %v352_v30  ;;  %v1216_v38 = vpop.f32.mrb[35].mxu1  ;;  %v829_v13 = vld [vmem:[#allocation2 + $0x78] sm:$0xff] (!%p1115_p11)  ;;  %v881_v29 = vadd.f32 (!%p1115_p11), %v1510_v48, %v836_v26  ;;  %v839_v32 = vld [vmem:[#allocation2 + $0xc8] sm:$0xff] (!%p1115_p11)  ;;  %v840_v36 = vld [vmem:[#allocation2 + $0xd0] sm:$0xff] (!%p1115_p11) }
 0x145   : > { %789 = vst [vmem:[#allocation2 + $0x88] sm:$0xff] %v751_v34  ;;  %v874_v16 = vadd.f32 (!%p1115_p11), %v1510_v48, %v829_v13  ;;  %911 = vst [vmem:[%s1445_s14 + $0x70] sm:$0xff] (!%p1115_p11), %v873_v15  ;;  %v837_v30 = vld [vmem:[#allocation2 + $0xb8] sm:$0xff] (!%p1115_p11)  ;;  %v883_v34 = vadd.f32 (!%p1115_p11), %v1510_v48, %v838_v31  ;;  %v884_v35 = vadd.f32 (!%p1115_p11), %v1510_v48, %v839_v32  ;;  %v842_v38 = vld [vmem:[#allocation2 + $0xe0] sm:$0xff] (!%p1115_p11) }
 0x146   : > { %809 = vst [vmem:[#allocation2 + $0x128] sm:$0xff] %v771_v37  ;;  %v882_v33 = vadd.f32 (!%p1115_p11), %v1510_v48, %v837_v30  ;;  %v841_v37 = vld [vmem:[#allocation2 + $0xd8] sm:$0xff] (!%p1115_p11)  ;;  %917 = vst [vmem:[%s1445_s14 + $0xa0] sm:$0xff] (!%p1115_p11), %v879_v27  ;;  %v848_v51 = vld [vmem:[#allocation2 + $0x110] sm:$0xff] (!%p1115_p11) }
 0x147   : > { %813 = sbr.rel (%p1115_p11) target bundleno = 344 (0x158), region = 40  ;;  %912 = vst [vmem:[%s1445_s14 + $0x78] sm:$0xff] (!%p1115_p11), %v874_v16  ;;  %918 = vst [vmem:[%s1445_s14 + $0xa8] sm:$0xff] (!%p1115_p11), %v880_v28  ;;  %v893_v54 = vadd.f32 (!%p1115_p11), %v1510_v48, %v848_v51  ;;  %v849_v55 = vld [vmem:[#allocation2 + $0x118] sm:$0xff] (!%p1115_p11) }
 0x148   : > { %v655_v40 = vpop.f32.mrb[36].mxu0  ;;  %919 = vst [vmem:[%s1445_s14 + $0xb0] sm:$0xff] (!%p1115_p11), %v881_v29  ;;  %920 = vst [vmem:[%s1445_s14 + $0xb8] sm:$0xff] (!%p1115_p11), %v882_v33  ;;  %v894_v58 = vadd.f32 (!%p1115_p11), %v1510_v48, %v849_v55 }
 0x149   : > { %v752_v42 = vadd.f32 %v655_v40, %v333_v39  ;;  %v1179_v43 = vpop.f32.mrb[37].mxu0  ;;  %v885_v39 = vadd.f32 (!%p1115_p11), %v1510_v48, %v840_v36  ;;  %v886_v40 = vadd.f32 (!%p1115_p11), %v1510_v48, %v841_v37  ;;  %921 = vst [vmem:[%s1445_s14 + $0xc0] sm:$0xff] (!%p1115_p11), %v883_v34  ;;  %922 = vst [vmem:[%s1445_s14 + $0xc8] sm:$0xff] (!%p1115_p11), %v884_v35 }
 0x14a   : > { %v658_v44 = vpop.f32.mrb[38].mxu0  ;;  %v830_v14 = vld [vmem:[#allocation2 + $0x80] sm:$0xff] (!%p1115_p11)  ;;  %v844_v43 = vld [vmem:[#allocation2 + $0xf0] sm:$0xff] (!%p1115_p11)  ;;  %931 = vst [vmem:[%s1445_s14 + $0x110] sm:$0xff] (!%p1115_p11), %v893_v54  ;;  %932 = vst [vmem:[%s1445_s14 + $0x118] sm:$0xff] (!%p1115_p11), %v894_v58 }
 0x14b   : > { %790 = vst [vmem:[#allocation2 + $0x90] sm:$0xff] %v752_v42  ;;  %v753_v45 = vadd.f32 %v658_v44, %v334_v41  ;;  %v1180_v46 = vpop.f32.mrb[39].mxu0  ;;  %v875_v17 = vadd.f32 (!%p1115_p11), %v1510_v48, %v830_v14  ;;  %v887_v41 = vadd.f32 (!%p1115_p11), %v1510_v48, %v842_v38  ;;  %v843_v42 = vld [vmem:[#allocation2 + $0xe8] sm:$0xff] (!%p1115_p11)  ;;  %v845_v44 = vld [vmem:[#allocation2 + $0xf8] sm:$0xff] (!%p1115_p11)  ;;  %923 = vst [vmem:[%s1445_s14 + $0xd0] sm:$0xff] (!%p1115_p11), %v885_v39 }
 0x14c   : > { %v831_v18 = vld [vmem:[#allocation2 + $0x88] sm:$0xff] (!%p1115_p11)  ;;  %v889_v46 = vadd.f32 (!%p1115_p11), %v1510_v48, %v844_v43  ;;  %v890_v47 = vadd.f32 (!%p1115_p11), %v1510_v48, %v845_v44  ;;  %924 = vst [vmem:[%s1445_s14 + $0xd8] sm:$0xff] (!%p1115_p11), %v886_v40  ;;  %v850_v56 = vld [vmem:[#allocation2 + $0x120] sm:$0xff] (!%p1115_p11) }
 0x14d   : > { %791 = vst [vmem:[#allocation2 + $0x98] sm:$0xff] %v753_v45  ;;  %v876_v21 = vadd.f32 (!%p1115_p11), %v1510_v48, %v831_v18  ;;  %913 = vst [vmem:[%s1445_s14 + $0x80] sm:$0xff] (!%p1115_p11), %v875_v17  ;;  %v888_v45 = vadd.f32 (!%p1115_p11), %v1510_v48, %v843_v42  ;;  %v851_v57 = vld [vmem:[#allocation2 + $0x128] sm:$0xff] (!%p1115_p11)  ;;  %v895_v59 = vadd.f32 (!%p1115_p11), %v1510_v48, %v850_v56 }
 0x14e   : > { %925 = vst [vmem:[%s1445_s14 + $0xe0] sm:$0xff] %v887_v41  ;;  %927 = vst [vmem:[%s1445_s14 + $0xf0] sm:$0xff] %v889_v46  ;;  %v896_v60 = vadd.f32 %v1510_v48, %v851_v57 }
 0x14f   : > { %914 = vst [vmem:[%s1445_s14 + $0x88] sm:$0xff] %v876_v21  ;;  %926 = vst [vmem:[%s1445_s14 + $0xe8] sm:$0xff] %v888_v45 }
 0x150   : > { %928 = vst [vmem:[%s1445_s14 + $0xf8] sm:$0xff] %v890_v47  ;;  %933 = vst [vmem:[%s1445_s14 + $0x120] sm:$0xff] %v895_v59 }
 0x151   : > { %934 = vst [vmem:[%s1445_s14 + $0x128] sm:$0xff] %v896_v60 }
 0x152   : > { %v832_v19 = vld [vmem:[#allocation2 + $0x90] sm:$0xff] }
 0x153   : > { %v877_v22 = vadd.f32 %v1510_v48, %v832_v19 }
 0x154   : > { %v833_v20 = vld [vmem:[#allocation2 + $0x98] sm:$0xff] }
 0x155   : > { %v878_v23 = vadd.f32 %v1510_v48, %v833_v20  ;;  %915 = vst [vmem:[%s1445_s14 + $0x90] sm:$0xff] %v877_v22 }
 0x157   : > { %916 = vst [vmem:[%s1445_s14 + $0x98] sm:$0xff] %v878_v23 }
 0x158 PF: > { %s13_s18 = sadd.s32 1, %s1355_s18   ;;  %s1614_s23 = sld [smem:[#allocation3_spill]] }
 0x159   : > { %p10_p12 = scmp.ge.s32.totalorder %s13_s18, 10   ;;  %s1615_s12 = smov %s1343_s15 }
 0x15a   : > { %s1616_s13 = smov %s1347_s16  ;;  %s1617_s14 = smov %s1351_s17 }
 0x15b   : > { %s1618_s15 = smov %s1622_s19  ;;  %s1619_s16 = smov %s1626_s20 }
 0x15c   :  { %12 = sbr.rel (!%p10_p12) target bundleno = 4 (0x4), region = 73 }
 0x15e   : > { %s1620_s17 = smov %s1614_s23 }

</bundles_post_ra>
